<compile_context>
chip_gen: v5e
topology: v5e:2x2
jax: 0.10.0
libtpu: 0.0.40
codegen_flags: <defaults>
</compile_context>

<pallas_src>
import functools

import numpy as np

import jax
import jax.numpy as jnp
from jax import lax
from jax.experimental import pallas as pl
from jax.experimental.pallas import tpu as pltpu


def _conv1dnet_kernel(x_ref, s1_ref, s2_ref, s3_ref,
                      w1_ref, b1_ref, wf1_ref, bf1_ref,
                      w2_ref, b2_ref, wf2_ref, bf2_ref,
                      w3_ref, b3_ref,
                      o_ref,
                      xp_ref, col1_ref, h1p_ref, col2_ref, h2p_ref, col3_ref,
                      *, B, L, K, out_len):
    """Whole forward for all B batch elements (batch folded into lanes).

    Writes the already-decimated concat([fc1(out1), fc2(out2), out3])[::20]
    as a (B*C4, out_len) slab.
    """
    c1 = w1_ref.shape[0]          # out_features // 4
    c2 = w2_ref.shape[0]          # out_features // 2
    c4 = w3_ref.shape[0]          # out_features
    half = (K - 1) // 2           # 12 for K=25

    # ---------------- conv1: Cin=1, dilation=1, padding=half, + ReLU ----------
    p1 = half
    Lp1 = L + 2 * p1
    xp_ref[...] = jnp.zeros(xp_ref.shape, jnp.float32)          # single full zero
    for b in range(B):
        xp_ref[:, b * Lp1 + p1: b * Lp1 + p1 + L] = x_ref[:, b * L:(b + 1) * L]
    xp = xp_ref[...]                                            # (1, B*Lp1)
    for k in range(K):                                          # im2col (unrolled)
        for b in range(B):
            col1_ref[k:k + 1, b * L:(b + 1) * L] = xp[:, b * Lp1 + k: b * Lp1 + k + L]
    h1 = jnp.dot(w1_ref[...], col1_ref[...],
                 preferred_element_type=jnp.float32)            # (C1, B*L)
    h1 = jnp.maximum(h1 + b1_ref[...], 0.0)

    # ---------------- fc1 (1x1 conv) ------------------------------------------
    o1 = jnp.dot(wf1_ref[...], h1,
                 preferred_element_type=jnp.float32) + bf1_ref[...]   # (C4, B*L)

    # ---------------- conv2: Cin=C1, dilation=2, padding=2*half, + ReLU -------
    d2, p2 = 2, 2 * half
    Lp2 = L + 2 * p2
    h1p_ref[...] = jnp.zeros(h1p_ref.shape, jnp.float32)
    for b in range(B):
        h1p_ref[:, b * Lp2 + p2: b * Lp2 + p2 + L] = h1[:, b * L:(b + 1) * L]
    h1p = h1p_ref[...]                                          # (C1, B*Lp2)
    for k in range(K):
        for b in range(B):
            col2_ref[k * c1:(k + 1) * c1, b * L:(b + 1) * L] = (
                h1p[:, b * Lp2 + k * d2: b * Lp2 + k * d2 + L])
    h2 = jnp.dot(w2_ref[...], col2_ref[...],
                 preferred_element_type=jnp.float32)            # (C2, B*L)
    h2 = jnp.maximum(h2 + b2_ref[...], 0.0)

    # ---------------- fc2 (1x1 conv) ------------------------------------------
    o2 = jnp.dot(wf2_ref[...], h2,
                 preferred_element_type=jnp.float32) + bf2_ref[...]   # (C4, B*L)

    # ---------------- conv3: Cin=C2, dilation=3, padding=3*half, + ReLU -------
    d3, p3 = 3, 3 * half
    Lp3 = L + 2 * p3
    h2p_ref[...] = jnp.zeros(h2p_ref.shape, jnp.float32)
    for b in range(B):
        h2p_ref[:, b * Lp3 + p3: b * Lp3 + p3 + L] = h2[:, b * L:(b + 1) * L]
    h2p = h2p_ref[...]                                          # (C2, B*Lp3)
    for k in range(K):
        for b in range(B):
            col3_ref[k * c2:(k + 1) * c2, b * L:(b + 1) * L] = (
                h2p[:, b * Lp3 + k * d3: b * Lp3 + k * d3 + L])
    h3 = jnp.dot(w3_ref[...], col3_ref[...],
                 preferred_element_type=jnp.float32)            # (C4, B*L)
    h3 = jnp.maximum(h3 + b3_ref[...], 0.0)

    # ------- fused concat + ::20 decimation via constant selection matmuls ----
    # out_flat[c, b*out_len + t] = concat(o1_b, o2_b, o3_b)[c, 20*t]
    out_flat = (jnp.dot(o1, s1_ref[...], preferred_element_type=jnp.float32)
                + jnp.dot(o2, s2_ref[...], preferred_element_type=jnp.float32)
                + jnp.dot(h3, s3_ref[...], preferred_element_type=jnp.float32))
    for b in range(B):
        o_ref[b * c4:(b + 1) * c4, :] = out_flat[:, b * out_len:(b + 1) * out_len]


def prepare_params(p):
    """One-time weight prep (hoisted out of the per-call path)."""
    def flat(w):  # (Cout, Cin, K) -> (Cout, K*Cin), row order k*Cin + cin (matches im2col)
        cout, ci, k = w.shape
        return jnp.transpose(w, (0, 2, 1)).reshape(cout, k * ci)

    C1 = p["w1"].shape[0]
    C2 = p["w2"].shape[0]
    C4 = p["w3"].shape[0]
    return {
        "w1f": flat(p["w1"]), "b1c": p["b1"].reshape(C1, 1),
        "wf1m": p["wf1"][:, :, 0], "bf1c": p["bf1"].reshape(C4, 1),
        "w2f": flat(p["w2"]), "b2c": p["b2"].reshape(C2, 1),
        "wf2m": p["wf2"][:, :, 0], "bf2c": p["bf2"].reshape(C4, 1),
        "w3f": flat(p["w3"]), "b3c": p["b3"].reshape(C4, 1),
    }


@jax.jit
def conv1dnet_forward(x, fp):
    """Full Conv1DNet forward. x: (B, 1, L) f32 -> (B, C4, ceil(3L/20))."""
    B, cin, L = x.shape
    assert cin == 1
    C1, K = fp["w1f"].shape            # conv1 has Cin=1, so K*Cin == K
    C2 = fp["w2f"].shape[0]
    C4 = fp["w3f"].shape[0]
    half = (K - 1) // 2
    STRIDE = 20
    out_len = (3 * L + STRIDE - 1) // STRIDE

    # Compile-time constant 0/1 selection matrices: one per branch, mapping the
    # batch-folded (C, B*L) branch output to its decimated output columns.
    s_np = [np.zeros((B * L, B * out_len), np.float32) for _ in range(3)]
    for b in range(B):
        for t in range(out_len):
            g = STRIDE * t                       # index into the 3L concat
            s_np[g // L][b * L + g % L, b * out_len + t] = 1.0
    s1, s2, s3 = (jnp.asarray(s) for s in s_np)

    x2 = x.reshape(1, B * L)                      # batch folded onto lanes

    def const_spec(r, c):
        return pl.BlockSpec((r, c), lambda i: (0, 0))

    kern = functools.partial(_conv1dnet_kernel, B=B, L=L, K=K, out_len=out_len)

    out2d = pl.pallas_call(
        kern,
        out_shape=jax.ShapeDtypeStruct((B * C4, out_len), jnp.float32),
        grid=(1,),                                # single fused step (1 TC on v5e/v6e)
        in_specs=[
            const_spec(1, B * L),                 # x (batch folded)
            const_spec(B * L, B * out_len),       # S1
            const_spec(B * L, B * out_len),       # S2
            const_spec(B * L, B * out_len),       # S3
            const_spec(C1, K),                    # w1 flat  (16, 25)
            const_spec(C1, 1),                    # b1
            const_spec(C4, C1),                   # wf1      (64, 16)
            const_spec(C4, 1),                    # bf1
            const_spec(C2, K * C1),               # w2 flat  (32, 400)
            const_spec(C2, 1),                    # b2
            const_spec(C4, C2),                   # wf2      (64, 32)
            const_spec(C4, 1),                    # bf2
            const_spec(C4, K * C2),               # w3 flat  (64, 800)
            const_spec(C4, 1),                    # b3
        ],
        out_specs=const_spec(B * C4, out_len),
        scratch_shapes=[
            pltpu.VMEM((1, B * (L + 2 * half)), jnp.float32),    # padded input
            pltpu.VMEM((K, B * L), jnp.float32),                 # im2col conv1
            pltpu.VMEM((C1, B * (L + 4 * half)), jnp.float32),   # padded out1
            pltpu.VMEM((K * C1, B * L), jnp.float32),            # im2col conv2
            pltpu.VMEM((C2, B * (L + 6 * half)), jnp.float32),   # padded out2
            pltpu.VMEM((K * C2, B * L), jnp.float32),            # im2col conv3
        ],
        compiler_params=pltpu.CompilerParams(dimension_semantics=("arbitrary",)),
    )(x2, s1, s2, s3,
      fp["w1f"], fp["b1c"], fp["wf1m"], fp["bf1c"],
      fp["w2f"], fp["b2c"], fp["wf2m"], fp["bf2c"],
      fp["w3f"], fp["b3c"])

    # Free (contiguous) reshape back to (B, C4, out_len).
    return out2d.reshape(B, C4, out_len)

# TODO(synk): the roll-with-stride im2col and per-k accumulating-matmul variants
# from the review were left out to keep lowering risk low; they only trim
# masked-store traffic on an already overhead-bound kernel.


# ------------------------------ parameter init -------------------------------
def init_conv_params(key, cout, cin, k):
    # PyTorch default Conv1d init: U(-1/sqrt(fan_in), 1/sqrt(fan_in))
    kw, kb = jax.random.split(key)
    bound = 1.0 / float(cin * k) ** 0.5
    w = jax.random.uniform(kw, (cout, cin, k), jnp.float32, -bound, bound)
    b = jax.random.uniform(kb, (cout,), jnp.float32, -bound, bound)
    return w, b


def make_params(key, out_features=64):
    keys = jax.random.split(key, 5)
    p = {}
    p["w1"], p["b1"] = init_conv_params(keys[0], out_features // 4, 1, 25)
    p["w2"], p["b2"] = init_conv_params(keys[1], out_features // 2, out_features // 4, 25)
    p["w3"], p["b3"] = init_conv_params(keys[2], out_features, out_features // 2, 25)
    p["wf1"], p["bf1"] = init_conv_params(keys[3], out_features, out_features // 4, 1)
    p["wf2"], p["bf2"] = init_conv_params(keys[4], out_features, out_features // 2, 1)
    return p


# ------------------------------ pure-JAX reference ---------------------------
def _ref_conv(x, w, b, dilation, padding, relu):
    y = lax.conv_general_dilated(
        x, w, window_strides=(1,), padding=[(padding, padding)],
        rhs_dilation=(dilation,), dimension_numbers=("NCH", "OIH", "NCH"))
    y = y + b[None, :, None]
    return jnp.maximum(y, 0.0) if relu else y


def conv1dnet_reference(x, p):
    out1 = _ref_conv(x, p["w1"], p["b1"], 1, 12, True)
    out1_ = _ref_conv(out1, p["wf1"], p["bf1"], 1, 0, False)
    out2 = _ref_conv(out1, p["w2"], p["b2"], 2, 24, True)
    out2_ = _ref_conv(out2, p["wf2"], p["bf2"], 1, 0, False)
    out3 = _ref_conv(out2, p["w3"], p["b3"], 3, 36, True)
    out = jnp.concatenate([out1_, out2_, out3], axis=2)
    return out[:, :, ::20]


if __name__ == "__main__":
    key = jax.random.PRNGKey(0)
    kp, kx = jax.random.split(key)

    B, L = 2, 40                       # input: (batch=2, channels=1, length=40)
    params = make_params(kp, out_features=64)
    x = jax.random.normal(kx, (B, 1, L), jnp.float32)

    fp = prepare_params(params)        # one-time weight prep (hoisted)

    out = jax.block_until_ready(conv1dnet_forward(x, fp))
    assert out.shape == (B, 64, (3 * L + 19) // 20), out.shape

    ref = jax.block_until_ready(conv1dnet_reference(x, params))
    assert jnp.allclose(out, ref, atol=1e-3, rtol=1e-3), "mismatch vs reference"

    print("KERNEL_OK")
</pallas_src>

<mosaic_0001>
module attributes {stable_mosaic.version = 11 : i64} {
  func.func @_conv1dnet_kernel(%arg0: i32, %arg1: memref<1x80xf32, #tpu.memory_space<vmem>>, %arg2: memref<80x12xf32, #tpu.memory_space<vmem>>, %arg3: memref<80x12xf32, #tpu.memory_space<vmem>>, %arg4: memref<80x12xf32, #tpu.memory_space<vmem>>, %arg5: memref<16x25xf32, #tpu.memory_space<vmem>>, %arg6: memref<16x1xf32, #tpu.memory_space<vmem>>, %arg7: memref<64x16xf32, #tpu.memory_space<vmem>>, %arg8: memref<64x1xf32, #tpu.memory_space<vmem>>, %arg9: memref<32x400xf32, #tpu.memory_space<vmem>>, %arg10: memref<32x1xf32, #tpu.memory_space<vmem>>, %arg11: memref<64x32xf32, #tpu.memory_space<vmem>>, %arg12: memref<64x1xf32, #tpu.memory_space<vmem>>, %arg13: memref<64x800xf32, #tpu.memory_space<vmem>>, %arg14: memref<64x1xf32, #tpu.memory_space<vmem>>, %arg15: memref<128x6xf32, #tpu.memory_space<vmem>>, %arg16: memref<1x128xf32, #tpu.memory_space<vmem>>, %arg17: memref<25x80xf32, #tpu.memory_space<vmem>>, %arg18: memref<16x176xf32, #tpu.memory_space<vmem>>, %arg19: memref<400x80xf32, #tpu.memory_space<vmem>>, %arg20: memref<32x224xf32, #tpu.memory_space<vmem>>, %arg21: memref<800x80xf32, #tpu.memory_space<vmem>>) attributes {dimension_semantics = [#tpu.dimension_semantics<arbitrary>], iteration_bounds = array<i64: 1>, scalar_prefetch = 0 : i64, scratch_operands = 6 : i64, tpu.core_type = #tpu.core_type<tc>, window_params = [{pipeline_mode = #tpu.pipeline_mode<synchronous>, transform_indices = @transform_0, window_bounds = array<i64: 1, 80>}, {pipeline_mode = #tpu.pipeline_mode<synchronous>, transform_indices = @transform_1, window_bounds = array<i64: 80, 12>}, {pipeline_mode = #tpu.pipeline_mode<synchronous>, transform_indices = @transform_2, window_bounds = array<i64: 80, 12>}, {pipeline_mode = #tpu.pipeline_mode<synchronous>, transform_indices = @transform_3, window_bounds = array<i64: 80, 12>}, {pipeline_mode = #tpu.pipeline_mode<synchronous>, transform_indices = @transform_4, window_bounds = array<i64: 16, 25>}, {pipeline_mode = #tpu.pipeline_mode<synchronous>, transform_indices = @transform_5, window_bounds = array<i64: 16, 1>}, {pipeline_mode = #tpu.pipeline_mode<synchronous>, transform_indices = @transform_6, window_bounds = array<i64: 64, 16>}, {pipeline_mode = #tpu.pipeline_mode<synchronous>, transform_indices = @transform_7, window_bounds = array<i64: 64, 1>}, {pipeline_mode = #tpu.pipeline_mode<synchronous>, transform_indices = @transform_8, window_bounds = array<i64: 32, 400>}, {pipeline_mode = #tpu.pipeline_mode<synchronous>, transform_indices = @transform_9, window_bounds = array<i64: 32, 1>}, {pipeline_mode = #tpu.pipeline_mode<synchronous>, transform_indices = @transform_10, window_bounds = array<i64: 64, 32>}, {pipeline_mode = #tpu.pipeline_mode<synchronous>, transform_indices = @transform_11, window_bounds = array<i64: 64, 1>}, {pipeline_mode = #tpu.pipeline_mode<synchronous>, transform_indices = @transform_12, window_bounds = array<i64: 64, 800>}, {pipeline_mode = #tpu.pipeline_mode<synchronous>, transform_indices = @transform_13, window_bounds = array<i64: 64, 1>}, {pipeline_mode = #tpu.pipeline_mode<synchronous>, transform_indices = @transform_14, window_bounds = array<i64: 128, 6>}]} {
    %cst = arith.constant 0.000000e+00 : f32
    %0 = vector.broadcast %cst : f32 to vector<1x128xf32>
    %c0 = arith.constant 0 : index
    %c0_0 = arith.constant 0 : index
    %1 = vector.load %arg16[%c0, %c0_0] : memref<1x128xf32, #tpu.memory_space<vmem>>, vector<1x128xf32>
    tpu.vector_store %arg16[%c0, %c0_0], %0 {strides = array<i32>} : memref<1x128xf32, #tpu.memory_space<vmem>>, vector<1x128xf32>,
    %c0_1 = arith.constant 0 : index
    %c0_2 = arith.constant 0 : index
    %2 = vector.load %arg1[%c0_1, %c0_2] : memref<1x80xf32, #tpu.memory_space<vmem>>, vector<1x40xf32>
    %c0_3 = arith.constant 0 : index
    %c12 = arith.constant 12 : index
    %3 = vector.load %arg16[%c0_3, %c12] : memref<1x128xf32, #tpu.memory_space<vmem>>, vector<1x40xf32>
    tpu.vector_store %arg16[%c0_3, %c12], %2 {strides = array<i32>} : memref<1x128xf32, #tpu.memory_space<vmem>>, vector<1x40xf32>,
    %c0_4 = arith.constant 0 : index
    %c40 = arith.constant 40 : index
    %4 = vector.load %arg1[%c0_4, %c40] : memref<1x80xf32, #tpu.memory_space<vmem>>, vector<1x40xf32>
    %c0_5 = arith.constant 0 : index
    %c76 = arith.constant 76 : index
    %5 = vector.load %arg16[%c0_5, %c76] : memref<1x128xf32, #tpu.memory_space<vmem>>, vector<1x40xf32>
    tpu.vector_store %arg16[%c0_5, %c76], %4 {strides = array<i32>} : memref<1x128xf32, #tpu.memory_space<vmem>>, vector<1x40xf32>,
    %c0_6 = arith.constant 0 : index
    %c0_7 = arith.constant 0 : index
    %6 = vector.load %arg16[%c0_6, %c0_7] : memref<1x128xf32, #tpu.memory_space<vmem>>, vector<1x128xf32>
    %7 = vector.extract_strided_slice %6 {offsets = [0, 0], sizes = [1, 40], strides = [1, 1]} : vector<1x128xf32> to vector<1x40xf32>
    %c0_8 = arith.constant 0 : index
    %c0_9 = arith.constant 0 : index
    %8 = vector.load %arg17[%c0_8, %c0_9] : memref<25x80xf32, #tpu.memory_space<vmem>>, vector<1x40xf32>
    tpu.vector_store %arg17[%c0_8, %c0_9], %7 {strides = array<i32>} : memref<25x80xf32, #tpu.memory_space<vmem>>, vector<1x40xf32>,
    %9 = vector.extract_strided_slice %6 {offsets = [0, 64], sizes = [1, 40], strides = [1, 1]} : vector<1x128xf32> to vector<1x40xf32>
    %c0_10 = arith.constant 0 : index
    %c40_11 = arith.constant 40 : index
    %10 = vector.load %arg17[%c0_10, %c40_11] : memref<25x80xf32, #tpu.memory_space<vmem>>, vector<1x40xf32>
    tpu.vector_store %arg17[%c0_10, %c40_11], %9 {strides = array<i32>} : memref<25x80xf32, #tpu.memory_space<vmem>>, vector<1x40xf32>,
    %11 = vector.extract_strided_slice %6 {offsets = [0, 1], sizes = [1, 40], strides = [1, 1]} : vector<1x128xf32> to vector<1x40xf32>
    %c1 = arith.constant 1 : index
    %c0_12 = arith.constant 0 : index
    %12 = vector.load %arg17[%c1, %c0_12] : memref<25x80xf32, #tpu.memory_space<vmem>>, vector<1x40xf32>
    tpu.vector_store %arg17[%c1, %c0_12], %11 {strides = array<i32>} : memref<25x80xf32, #tpu.memory_space<vmem>>, vector<1x40xf32>,
    %13 = vector.extract_strided_slice %6 {offsets = [0, 65], sizes = [1, 40], strides = [1, 1]} : vector<1x128xf32> to vector<1x40xf32>
    %c1_13 = arith.constant 1 : index
    %c40_14 = arith.constant 40 : index
    %14 = vector.load %arg17[%c1_13, %c40_14] : memref<25x80xf32, #tpu.memory_space<vmem>>, vector<1x40xf32>
    tpu.vector_store %arg17[%c1_13, %c40_14], %13 {strides = array<i32>} : memref<25x80xf32, #tpu.memory_space<vmem>>, vector<1x40xf32>,
    %15 = vector.extract_strided_slice %6 {offsets = [0, 2], sizes = [1, 40], strides = [1, 1]} : vector<1x128xf32> to vector<1x40xf32>
    %c2 = arith.constant 2 : index
    %c0_15 = arith.constant 0 : index
    %16 = vector.load %arg17[%c2, %c0_15] : memref<25x80xf32, #tpu.memory_space<vmem>>, vector<1x40xf32>
    tpu.vector_store %arg17[%c2, %c0_15], %15 {strides = array<i32>} : memref<25x80xf32, #tpu.memory_space<vmem>>, vector<1x40xf32>,
    %17 = vector.extract_strided_slice %6 {offsets = [0, 66], sizes = [1, 40], strides = [1, 1]} : vector<1x128xf32> to vector<1x40xf32>
    %c2_16 = arith.constant 2 : index
    %c40_17 = arith.constant 40 : index
    %18 = vector.load %arg17[%c2_16, %c40_17] : memref<25x80xf32, #tpu.memory_space<vmem>>, vector<1x40xf32>
    tpu.vector_store %arg17[%c2_16, %c40_17], %17 {strides = array<i32>} : memref<25x80xf32, #tpu.memory_space<vmem>>, vector<1x40xf32>,
    %19 = vector.extract_strided_slice %6 {offsets = [0, 3], sizes = [1, 40], strides = [1, 1]} : vector<1x128xf32> to vector<1x40xf32>
    %c3 = arith.constant 3 : index
    %c0_18 = arith.constant 0 : index
    %20 = vector.load %arg17[%c3, %c0_18] : memref<25x80xf32, #tpu.memory_space<vmem>>, vector<1x40xf32>
    tpu.vector_store %arg17[%c3, %c0_18], %19 {strides = array<i32>} : memref<25x80xf32, #tpu.memory_space<vmem>>, vector<1x40xf32>,
    %21 = vector.extract_strided_slice %6 {offsets = [0, 67], sizes = [1, 40], strides = [1, 1]} : vector<1x128xf32> to vector<1x40xf32>
    %c3_19 = arith.constant 3 : index
    %c40_20 = arith.constant 40 : index
    %22 = vector.load %arg17[%c3_19, %c40_20] : memref<25x80xf32, #tpu.memory_space<vmem>>, vector<1x40xf32>
    tpu.vector_store %arg17[%c3_19, %c40_20], %21 {strides = array<i32>} : memref<25x80xf32, #tpu.memory_space<vmem>>, vector<1x40xf32>,
    %23 = vector.extract_strided_slice %6 {offsets = [0, 4], sizes = [1, 40], strides = [1, 1]} : vector<1x128xf32> to vector<1x40xf32>
    %c4 = arith.constant 4 : index
    %c0_21 = arith.constant 0 : index
    %24 = vector.load %arg17[%c4, %c0_21] : memref<25x80xf32, #tpu.memory_space<vmem>>, vector<1x40xf32>
    tpu.vector_store %arg17[%c4, %c0_21], %23 {strides = array<i32>} : memref<25x80xf32, #tpu.memory_space<vmem>>, vector<1x40xf32>,
    %25 = vector.extract_strided_slice %6 {offsets = [0, 68], sizes = [1, 40], strides = [1, 1]} : vector<1x128xf32> to vector<1x40xf32>
    %c4_22 = arith.constant 4 : index
    %c40_23 = arith.constant 40 : index
    %26 = vector.load %arg17[%c4_22, %c40_23] : memref<25x80xf32, #tpu.memory_space<vmem>>, vector<1x40xf32>
    tpu.vector_store %arg17[%c4_22, %c40_23], %25 {strides = array<i32>} : memref<25x80xf32, #tpu.memory_space<vmem>>, vector<1x40xf32>,
    %27 = vector.extract_strided_slice %6 {offsets = [0, 5], sizes = [1, 40], strides = [1, 1]} : vector<1x128xf32> to vector<1x40xf32>
    %c5 = arith.constant 5 : index
    %c0_24 = arith.constant 0 : index
    %28 = vector.load %arg17[%c5, %c0_24] : memref<25x80xf32, #tpu.memory_space<vmem>>, vector<1x40xf32>
    tpu.vector_store %arg17[%c5, %c0_24], %27 {strides = array<i32>} : memref<25x80xf32, #tpu.memory_space<vmem>>, vector<1x40xf32>,
    %29 = vector.extract_strided_slice %6 {offsets = [0, 69], sizes = [1, 40], strides = [1, 1]} : vector<1x128xf32> to vector<1x40xf32>
    %c5_25 = arith.constant 5 : index
    %c40_26 = arith.constant 40 : index
    %30 = vector.load %arg17[%c5_25, %c40_26] : memref<25x80xf32, #tpu.memory_space<vmem>>, vector<1x40xf32>
    tpu.vector_store %arg17[%c5_25, %c40_26], %29 {strides = array<i32>} : memref<25x80xf32, #tpu.memory_space<vmem>>, vector<1x40xf32>,
    %31 = vector.extract_strided_slice %6 {offsets = [0, 6], sizes = [1, 40], strides = [1, 1]} : vector<1x128xf32> to vector<1x40xf32>
    %c6 = arith.constant 6 : index
    %c0_27 = arith.constant 0 : index
    %32 = vector.load %arg17[%c6, %c0_27] : memref<25x80xf32, #tpu.memory_space<vmem>>, vector<1x40xf32>
    tpu.vector_store %arg17[%c6, %c0_27], %31 {strides = array<i32>} : memref<25x80xf32, #tpu.memory_space<vmem>>, vector<1x40xf32>,
    %33 = vector.extract_strided_slice %6 {offsets = [0, 70], sizes = [1, 40], strides = [1, 1]} : vector<1x128xf32> to vector<1x40xf32>
    %c6_28 = arith.constant 6 : index
    %c40_29 = arith.constant 40 : index
    %34 = vector.load %arg17[%c6_28, %c40_29] : memref<25x80xf32, #tpu.memory_space<vmem>>, vector<1x40xf32>
    tpu.vector_store %arg17[%c6_28, %c40_29], %33 {strides = array<i32>} : memref<25x80xf32, #tpu.memory_space<vmem>>, vector<1x40xf32>,
    %35 = vector.extract_strided_slice %6 {offsets = [0, 7], sizes = [1, 40], strides = [1, 1]} : vector<1x128xf32> to vector<1x40xf32>
    %c7 = arith.constant 7 : index
    %c0_30 = arith.constant 0 : index
    %36 = vector.load %arg17[%c7, %c0_30] : memref<25x80xf32, #tpu.memory_space<vmem>>, vector<1x40xf32>
    tpu.vector_store %arg17[%c7, %c0_30], %35 {strides = array<i32>} : memref<25x80xf32, #tpu.memory_space<vmem>>, vector<1x40xf32>,
    %37 = vector.extract_strided_slice %6 {offsets = [0, 71], sizes = [1, 40], strides = [1, 1]} : vector<1x128xf32> to vector<1x40xf32>
    %c7_31 = arith.constant 7 : index
    %c40_32 = arith.constant 40 : index
    %38 = vector.load %arg17[%c7_31, %c40_32] : memref<25x80xf32, #tpu.memory_space<vmem>>, vector<1x40xf32>
    tpu.vector_store %arg17[%c7_31, %c40_32], %37 {strides = array<i32>} : memref<25x80xf32, #tpu.memory_space<vmem>>, vector<1x40xf32>,
    %39 = vector.extract_strided_slice %6 {offsets = [0, 8], sizes = [1, 40], strides = [1, 1]} : vector<1x128xf32> to vector<1x40xf32>
    %c8 = arith.constant 8 : index
    %c0_33 = arith.constant 0 : index
    %40 = vector.load %arg17[%c8, %c0_33] : memref<25x80xf32, #tpu.memory_space<vmem>>, vector<1x40xf32>
    tpu.vector_store %arg17[%c8, %c0_33], %39 {strides = array<i32>} : memref<25x80xf32, #tpu.memory_space<vmem>>, vector<1x40xf32>,
    %41 = vector.extract_strided_slice %6 {offsets = [0, 72], sizes = [1, 40], strides = [1, 1]} : vector<1x128xf32> to vector<1x40xf32>
    %c8_34 = arith.constant 8 : index
    %c40_35 = arith.constant 40 : index
    %42 = vector.load %arg17[%c8_34, %c40_35] : memref<25x80xf32, #tpu.memory_space<vmem>>, vector<1x40xf32>
    tpu.vector_store %arg17[%c8_34, %c40_35], %41 {strides = array<i32>} : memref<25x80xf32, #tpu.memory_space<vmem>>, vector<1x40xf32>,
    %43 = vector.extract_strided_slice %6 {offsets = [0, 9], sizes = [1, 40], strides = [1, 1]} : vector<1x128xf32> to vector<1x40xf32>
    %c9 = arith.constant 9 : index
    %c0_36 = arith.constant 0 : index
    %44 = vector.load %arg17[%c9, %c0_36] : memref<25x80xf32, #tpu.memory_space<vmem>>, vector<1x40xf32>
    tpu.vector_store %arg17[%c9, %c0_36], %43 {strides = array<i32>} : memref<25x80xf32, #tpu.memory_space<vmem>>, vector<1x40xf32>,
    %45 = vector.extract_strided_slice %6 {offsets = [0, 73], sizes = [1, 40], strides = [1, 1]} : vector<1x128xf32> to vector<1x40xf32>
    %c9_37 = arith.constant 9 : index
    %c40_38 = arith.constant 40 : index
    %46 = vector.load %arg17[%c9_37, %c40_38] : memref<25x80xf32, #tpu.memory_space<vmem>>, vector<1x40xf32>
    tpu.vector_store %arg17[%c9_37, %c40_38], %45 {strides = array<i32>} : memref<25x80xf32, #tpu.memory_space<vmem>>, vector<1x40xf32>,
    %47 = vector.extract_strided_slice %6 {offsets = [0, 10], sizes = [1, 40], strides = [1, 1]} : vector<1x128xf32> to vector<1x40xf32>
    %c10 = arith.constant 10 : index
    %c0_39 = arith.constant 0 : index
    %48 = vector.load %arg17[%c10, %c0_39] : memref<25x80xf32, #tpu.memory_space<vmem>>, vector<1x40xf32>
    tpu.vector_store %arg17[%c10, %c0_39], %47 {strides = array<i32>} : memref<25x80xf32, #tpu.memory_space<vmem>>, vector<1x40xf32>,
    %49 = vector.extract_strided_slice %6 {offsets = [0, 74], sizes = [1, 40], strides = [1, 1]} : vector<1x128xf32> to vector<1x40xf32>
    %c10_40 = arith.constant 10 : index
    %c40_41 = arith.constant 40 : index
    %50 = vector.load %arg17[%c10_40, %c40_41] : memref<25x80xf32, #tpu.memory_space<vmem>>, vector<1x40xf32>
    tpu.vector_store %arg17[%c10_40, %c40_41], %49 {strides = array<i32>} : memref<25x80xf32, #tpu.memory_space<vmem>>, vector<1x40xf32>,
    %51 = vector.extract_strided_slice %6 {offsets = [0, 11], sizes = [1, 40], strides = [1, 1]} : vector<1x128xf32> to vector<1x40xf32>
    %c11 = arith.constant 11 : index
    %c0_42 = arith.constant 0 : index
    %52 = vector.load %arg17[%c11, %c0_42] : memref<25x80xf32, #tpu.memory_space<vmem>>, vector<1x40xf32>
    tpu.vector_store %arg17[%c11, %c0_42], %51 {strides = array<i32>} : memref<25x80xf32, #tpu.memory_space<vmem>>, vector<1x40xf32>,
    %53 = vector.extract_strided_slice %6 {offsets = [0, 75], sizes = [1, 40], strides = [1, 1]} : vector<1x128xf32> to vector<1x40xf32>
    %c11_43 = arith.constant 11 : index
    %c40_44 = arith.constant 40 : index
    %54 = vector.load %arg17[%c11_43, %c40_44] : memref<25x80xf32, #tpu.memory_space<vmem>>, vector<1x40xf32>
    tpu.vector_store %arg17[%c11_43, %c40_44], %53 {strides = array<i32>} : memref<25x80xf32, #tpu.memory_space<vmem>>, vector<1x40xf32>,
    %55 = vector.extract_strided_slice %6 {offsets = [0, 12], sizes = [1, 40], strides = [1, 1]} : vector<1x128xf32> to vector<1x40xf32>
    %c12_45 = arith.constant 12 : index
    %c0_46 = arith.constant 0 : index
    %56 = vector.load %arg17[%c12_45, %c0_46] : memref<25x80xf32, #tpu.memory_space<vmem>>, vector<1x40xf32>
    tpu.vector_store %arg17[%c12_45, %c0_46], %55 {strides = array<i32>} : memref<25x80xf32, #tpu.memory_space<vmem>>, vector<1x40xf32>,
    %57 = vector.extract_strided_slice %6 {offsets = [0, 76], sizes = [1, 40], strides = [1, 1]} : vector<1x128xf32> to vector<1x40xf32>
    %c12_47 = arith.constant 12 : index
    %c40_48 = arith.constant 40 : index
    %58 = vector.load %arg17[%c12_47, %c40_48] : memref<25x80xf32, #tpu.memory_space<vmem>>, vector<1x40xf32>
    tpu.vector_store %arg17[%c12_47, %c40_48], %57 {strides = array<i32>} : memref<25x80xf32, #tpu.memory_space<vmem>>, vector<1x40xf32>,
    %59 = vector.extract_strided_slice %6 {offsets = [0, 13], sizes = [1, 40], strides = [1, 1]} : vector<1x128xf32> to vector<1x40xf32>
    %c13 = arith.constant 13 : index
    %c0_49 = arith.constant 0 : index
    %60 = vector.load %arg17[%c13, %c0_49] : memref<25x80xf32, #tpu.memory_space<vmem>>, vector<1x40xf32>
    tpu.vector_store %arg17[%c13, %c0_49], %59 {strides = array<i32>} : memref<25x80xf32, #tpu.memory_space<vmem>>, vector<1x40xf32>,
    %61 = vector.extract_strided_slice %6 {offsets = [0, 77], sizes = [1, 40], strides = [1, 1]} : vector<1x128xf32> to vector<1x40xf32>
    %c13_50 = arith.constant 13 : index
    %c40_51 = arith.constant 40 : index
    %62 = vector.load %arg17[%c13_50, %c40_51] : memref<25x80xf32, #tpu.memory_space<vmem>>, vector<1x40xf32>
    tpu.vector_store %arg17[%c13_50, %c40_51], %61 {strides = array<i32>} : memref<25x80xf32, #tpu.memory_space<vmem>>, vector<1x40xf32>,
    %63 = vector.extract_strided_slice %6 {offsets = [0, 14], sizes = [1, 40], strides = [1, 1]} : vector<1x128xf32> to vector<1x40xf32>
    %c14 = arith.constant 14 : index
    %c0_52 = arith.constant 0 : index
    %64 = vector.load %arg17[%c14, %c0_52] : memref<25x80xf32, #tpu.memory_space<vmem>>, vector<1x40xf32>
    tpu.vector_store %arg17[%c14, %c0_52], %63 {strides = array<i32>} : memref<25x80xf32, #tpu.memory_space<vmem>>, vector<1x40xf32>,
    %65 = vector.extract_strided_slice %6 {offsets = [0, 78], sizes = [1, 40], strides = [1, 1]} : vector<1x128xf32> to vector<1x40xf32>
    %c14_53 = arith.constant 14 : index
    %c40_54 = arith.constant 40 : index
    %66 = vector.load %arg17[%c14_53, %c40_54] : memref<25x80xf32, #tpu.memory_space<vmem>>, vector<1x40xf32>
    tpu.vector_store %arg17[%c14_53, %c40_54], %65 {strides = array<i32>} : memref<25x80xf32, #tpu.memory_space<vmem>>, vector<1x40xf32>,
    %67 = vector.extract_strided_slice %6 {offsets = [0, 15], sizes = [1, 40], strides = [1, 1]} : vector<1x128xf32> to vector<1x40xf32>
    %c15 = arith.constant 15 : index
    %c0_55 = arith.constant 0 : index
    %68 = vector.load %arg17[%c15, %c0_55] : memref<25x80xf32, #tpu.memory_space<vmem>>, vector<1x40xf32>
    tpu.vector_store %arg17[%c15, %c0_55], %67 {strides = array<i32>} : memref<25x80xf32, #tpu.memory_space<vmem>>, vector<1x40xf32>,
    %69 = vector.extract_strided_slice %6 {offsets = [0, 79], sizes = [1, 40], strides = [1, 1]} : vector<1x128xf32> to vector<1x40xf32>
    %c15_56 = arith.constant 15 : index
    %c40_57 = arith.constant 40 : index
    %70 = vector.load %arg17[%c15_56, %c40_57] : memref<25x80xf32, #tpu.memory_space<vmem>>, vector<1x40xf32>
    tpu.vector_store %arg17[%c15_56, %c40_57], %69 {strides = array<i32>} : memref<25x80xf32, #tpu.memory_space<vmem>>, vector<1x40xf32>,
    %71 = vector.extract_strided_slice %6 {offsets = [0, 16], sizes = [1, 40], strides = [1, 1]} : vector<1x128xf32> to vector<1x40xf32>
    %c16 = arith.constant 16 : index
    %c0_58 = arith.constant 0 : index
    %72 = vector.load %arg17[%c16, %c0_58] : memref<25x80xf32, #tpu.memory_space<vmem>>, vector<1x40xf32>
    tpu.vector_store %arg17[%c16, %c0_58], %71 {strides = array<i32>} : memref<25x80xf32, #tpu.memory_space<vmem>>, vector<1x40xf32>,
    %73 = vector.extract_strided_slice %6 {offsets = [0, 80], sizes = [1, 40], strides = [1, 1]} : vector<1x128xf32> to vector<1x40xf32>
    %c16_59 = arith.constant 16 : index
    %c40_60 = arith.constant 40 : index
    %74 = vector.load %arg17[%c16_59, %c40_60] : memref<25x80xf32, #tpu.memory_space<vmem>>, vector<1x40xf32>
    tpu.vector_store %arg17[%c16_59, %c40_60], %73 {strides = array<i32>} : memref<25x80xf32, #tpu.memory_space<vmem>>, vector<1x40xf32>,
    %75 = vector.extract_strided_slice %6 {offsets = [0, 17], sizes = [1, 40], strides = [1, 1]} : vector<1x128xf32> to vector<1x40xf32>
    %c17 = arith.constant 17 : index
    %c0_61 = arith.constant 0 : index
    %76 = vector.load %arg17[%c17, %c0_61] : memref<25x80xf32, #tpu.memory_space<vmem>>, vector<1x40xf32>
    tpu.vector_store %arg17[%c17, %c0_61], %75 {strides = array<i32>} : memref<25x80xf32, #tpu.memory_space<vmem>>, vector<1x40xf32>,
    %77 = vector.extract_strided_slice %6 {offsets = [0, 81], sizes = [1, 40], strides = [1, 1]} : vector<1x128xf32> to vector<1x40xf32>
    %c17_62 = arith.constant 17 : index
    %c40_63 = arith.constant 40 : index
    %78 = vector.load %arg17[%c17_62, %c40_63] : memref<25x80xf32, #tpu.memory_space<vmem>>, vector<1x40xf32>
    tpu.vector_store %arg17[%c17_62, %c40_63], %77 {strides = array<i32>} : memref<25x80xf32, #tpu.memory_space<vmem>>, vector<1x40xf32>,
    %79 = vector.extract_strided_slice %6 {offsets = [0, 18], sizes = [1, 40], strides = [1, 1]} : vector<1x128xf32> to vector<1x40xf32>
    %c18 = arith.constant 18 : index
    %c0_64 = arith.constant 0 : index
    %80 = vector.load %arg17[%c18, %c0_64] : memref<25x80xf32, #tpu.memory_space<vmem>>, vector<1x40xf32>
    tpu.vector_store %arg17[%c18, %c0_64], %79 {strides = array<i32>} : memref<25x80xf32, #tpu.memory_space<vmem>>, vector<1x40xf32>,
    %81 = vector.extract_strided_slice %6 {offsets = [0, 82], sizes = [1, 40], strides = [1, 1]} : vector<1x128xf32> to vector<1x40xf32>
    %c18_65 = arith.constant 18 : index
    %c40_66 = arith.constant 40 : index
    %82 = vector.load %arg17[%c18_65, %c40_66] : memref<25x80xf32, #tpu.memory_space<vmem>>, vector<1x40xf32>
    tpu.vector_store %arg17[%c18_65, %c40_66], %81 {strides = array<i32>} : memref<25x80xf32, #tpu.memory_space<vmem>>, vector<1x40xf32>,
    %83 = vector.extract_strided_slice %6 {offsets = [0, 19], sizes = [1, 40], strides = [1, 1]} : vector<1x128xf32> to vector<1x40xf32>
    %c19 = arith.constant 19 : index
    %c0_67 = arith.constant 0 : index
    %84 = vector.load %arg17[%c19, %c0_67] : memref<25x80xf32, #tpu.memory_space<vmem>>, vector<1x40xf32>
    tpu.vector_store %arg17[%c19, %c0_67], %83 {strides = array<i32>} : memref<25x80xf32, #tpu.memory_space<vmem>>, vector<1x40xf32>,
    %85 = vector.extract_strided_slice %6 {offsets = [0, 83], sizes = [1, 40], strides = [1, 1]} : vector<1x128xf32> to vector<1x40xf32>
    %c19_68 = arith.constant 19 : index
    %c40_69 = arith.constant 40 : index
    %86 = vector.load %arg17[%c19_68, %c40_69] : memref<25x80xf32, #tpu.memory_space<vmem>>, vector<1x40xf32>
    tpu.vector_store %arg17[%c19_68, %c40_69], %85 {strides = array<i32>} : memref<25x80xf32, #tpu.memory_space<vmem>>, vector<1x40xf32>,
    %87 = vector.extract_strided_slice %6 {offsets = [0, 20], sizes = [1, 40], strides = [1, 1]} : vector<1x128xf32> to vector<1x40xf32>
    %c20 = arith.constant 20 : index
    %c0_70 = arith.constant 0 : index
    %88 = vector.load %arg17[%c20, %c0_70] : memref<25x80xf32, #tpu.memory_space<vmem>>, vector<1x40xf32>
    tpu.vector_store %arg17[%c20, %c0_70], %87 {strides = array<i32>} : memref<25x80xf32, #tpu.memory_space<vmem>>, vector<1x40xf32>,
    %89 = vector.extract_strided_slice %6 {offsets = [0, 84], sizes = [1, 40], strides = [1, 1]} : vector<1x128xf32> to vector<1x40xf32>
    %c20_71 = arith.constant 20 : index
    %c40_72 = arith.constant 40 : index
    %90 = vector.load %arg17[%c20_71, %c40_72] : memref<25x80xf32, #tpu.memory_space<vmem>>, vector<1x40xf32>
    tpu.vector_store %arg17[%c20_71, %c40_72], %89 {strides = array<i32>} : memref<25x80xf32, #tpu.memory_space<vmem>>, vector<1x40xf32>,
    %91 = vector.extract_strided_slice %6 {offsets = [0, 21], sizes = [1, 40], strides = [1, 1]} : vector<1x128xf32> to vector<1x40xf32>
    %c21 = arith.constant 21 : index
    %c0_73 = arith.constant 0 : index
    %92 = vector.load %arg17[%c21, %c0_73] : memref<25x80xf32, #tpu.memory_space<vmem>>, vector<1x40xf32>
    tpu.vector_store %arg17[%c21, %c0_73], %91 {strides = array<i32>} : memref<25x80xf32, #tpu.memory_space<vmem>>, vector<1x40xf32>,
    %93 = vector.extract_strided_slice %6 {offsets = [0, 85], sizes = [1, 40], strides = [1, 1]} : vector<1x128xf32> to vector<1x40xf32>
    %c21_74 = arith.constant 21 : index
    %c40_75 = arith.constant 40 : index
    %94 = vector.load %arg17[%c21_74, %c40_75] : memref<25x80xf32, #tpu.memory_space<vmem>>, vector<1x40xf32>
    tpu.vector_store %arg17[%c21_74, %c40_75], %93 {strides = array<i32>} : memref<25x80xf32, #tpu.memory_space<vmem>>, vector<1x40xf32>,
    %95 = vector.extract_strided_slice %6 {offsets = [0, 22], sizes = [1, 40], strides = [1, 1]} : vector<1x128xf32> to vector<1x40xf32>
    %c22 = arith.constant 22 : index
    %c0_76 = arith.constant 0 : index
    %96 = vector.load %arg17[%c22, %c0_76] : memref<25x80xf32, #tpu.memory_space<vmem>>, vector<1x40xf32>
    tpu.vector_store %arg17[%c22, %c0_76], %95 {strides = array<i32>} : memref<25x80xf32, #tpu.memory_space<vmem>>, vector<1x40xf32>,
    %97 = vector.extract_strided_slice %6 {offsets = [0, 86], sizes = [1, 40], strides = [1, 1]} : vector<1x128xf32> to vector<1x40xf32>
    %c22_77 = arith.constant 22 : index
    %c40_78 = arith.constant 40 : index
    %98 = vector.load %arg17[%c22_77, %c40_78] : memref<25x80xf32, #tpu.memory_space<vmem>>, vector<1x40xf32>
    tpu.vector_store %arg17[%c22_77, %c40_78], %97 {strides = array<i32>} : memref<25x80xf32, #tpu.memory_space<vmem>>, vector<1x40xf32>,
    %99 = vector.extract_strided_slice %6 {offsets = [0, 23], sizes = [1, 40], strides = [1, 1]} : vector<1x128xf32> to vector<1x40xf32>
    %c23 = arith.constant 23 : index
    %c0_79 = arith.constant 0 : index
    %100 = vector.load %arg17[%c23, %c0_79] : memref<25x80xf32, #tpu.memory_space<vmem>>, vector<1x40xf32>
    tpu.vector_store %arg17[%c23, %c0_79], %99 {strides = array<i32>} : memref<25x80xf32, #tpu.memory_space<vmem>>, vector<1x40xf32>,
    %101 = vector.extract_strided_slice %6 {offsets = [0, 87], sizes = [1, 40], strides = [1, 1]} : vector<1x128xf32> to vector<1x40xf32>
    %c23_80 = arith.constant 23 : index
    %c40_81 = arith.constant 40 : index
    %102 = vector.load %arg17[%c23_80, %c40_81] : memref<25x80xf32, #tpu.memory_space<vmem>>, vector<1x40xf32>
    tpu.vector_store %arg17[%c23_80, %c40_81], %101 {strides = array<i32>} : memref<25x80xf32, #tpu.memory_space<vmem>>, vector<1x40xf32>,
    %103 = vector.extract_strided_slice %6 {offsets = [0, 24], sizes = [1, 40], strides = [1, 1]} : vector<1x128xf32> to vector<1x40xf32>
    %c24 = arith.constant 24 : index
    %c0_82 = arith.constant 0 : index
    %104 = vector.load %arg17[%c24, %c0_82] : memref<25x80xf32, #tpu.memory_space<vmem>>, vector<1x40xf32>
    tpu.vector_store %arg17[%c24, %c0_82], %103 {strides = array<i32>} : memref<25x80xf32, #tpu.memory_space<vmem>>, vector<1x40xf32>,
    %105 = vector.extract_strided_slice %6 {offsets = [0, 88], sizes = [1, 40], strides = [1, 1]} : vector<1x128xf32> to vector<1x40xf32>
    %c24_83 = arith.constant 24 : index
    %c40_84 = arith.constant 40 : index
    %106 = vector.load %arg17[%c24_83, %c40_84] : memref<25x80xf32, #tpu.memory_space<vmem>>, vector<1x40xf32>
    tpu.vector_store %arg17[%c24_83, %c40_84], %105 {strides = array<i32>} : memref<25x80xf32, #tpu.memory_space<vmem>>, vector<1x40xf32>,
    %c0_85 = arith.constant 0 : index
    %c0_86 = arith.constant 0 : index
    %107 = vector.load %arg5[%c0_85, %c0_86] : memref<16x25xf32, #tpu.memory_space<vmem>>, vector<16x25xf32>
    %c0_87 = arith.constant 0 : index
    %c0_88 = arith.constant 0 : index
    %108 = vector.load %arg17[%c0_87, %c0_88] : memref<25x80xf32, #tpu.memory_space<vmem>>, vector<25x80xf32>
    %cst_89 = arith.constant dense<0.000000e+00> : vector<16x80xf32>
    %109 = tpu.matmul %107, %108, %cst_89 {dimension_numbers = #tpu.dot_dimension_numbers<[1], [0], [0], [1], [0, 0, 1, 1], [], []>} : vector<16x25xf32>, vector<25x80xf32>, vector<16x80xf32> -> vector<16x80xf32>
    %c0_90 = arith.constant 0 : index
    %c0_91 = arith.constant 0 : index
    %110 = vector.load %arg6[%c0_90, %c0_91] : memref<16x1xf32, #tpu.memory_space<vmem>>, vector<16x1xf32>
    %111 = vector.broadcast %110 : vector<16x1xf32> to vector<16x80xf32>
    %112 = arith.addf %109, %111 : vector<16x80xf32>
    %cst_92 = arith.constant 0.000000e+00 : f32
    %113 = vector.broadcast %cst_92 : f32 to vector<16x80xf32>
    %114 = arith.maximumf %112, %113 : vector<16x80xf32>
    %c0_93 = arith.constant 0 : index
    %c0_94 = arith.constant 0 : index
    %115 = vector.load %arg7[%c0_93, %c0_94] : memref<64x16xf32, #tpu.memory_space<vmem>>, vector<64x16xf32>
    %cst_95 = arith.constant dense<0.000000e+00> : vector<64x80xf32>
    %116 = tpu.matmul %115, %114, %cst_95 {dimension_numbers = #tpu.dot_dimension_numbers<[1], [0], [0], [1], [0, 0, 1, 1], [], []>} : vector<64x16xf32>, vector<16x80xf32>, vector<64x80xf32> -> vector<64x80xf32>
    %c0_96 = arith.constant 0 : index
    %c0_97 = arith.constant 0 : index
    %117 = vector.load %arg8[%c0_96, %c0_97] : memref<64x1xf32, #tpu.memory_space<vmem>>, vector<64x1xf32>
    %118 = vector.broadcast %117 : vector<64x1xf32> to vector<64x80xf32>
    %119 = arith.addf %116, %118 : vector<64x80xf32>
    %cst_98 = arith.constant 0.000000e+00 : f32
    %120 = vector.broadcast %cst_98 : f32 to vector<16x176xf32>
    %c0_99 = arith.constant 0 : index
    %c0_100 = arith.constant 0 : index
    %121 = vector.load %arg18[%c0_99, %c0_100] : memref<16x176xf32, #tpu.memory_space<vmem>>, vector<16x176xf32>
    tpu.vector_store %arg18[%c0_99, %c0_100], %120 {strides = array<i32>} : memref<16x176xf32, #tpu.memory_space<vmem>>, vector<16x176xf32>,
    %122 = vector.extract_strided_slice %114 {offsets = [0, 0], sizes = [16, 40], strides = [1, 1]} : vector<16x80xf32> to vector<16x40xf32>
    %c0_101 = arith.constant 0 : index
    %c24_102 = arith.constant 24 : index
    %123 = vector.load %arg18[%c0_101, %c24_102] : memref<16x176xf32, #tpu.memory_space<vmem>>, vector<16x40xf32>
    tpu.vector_store %arg18[%c0_101, %c24_102], %122 {strides = array<i32>} : memref<16x176xf32, #tpu.memory_space<vmem>>, vector<16x40xf32>,
    %124 = vector.extract_strided_slice %114 {offsets = [0, 40], sizes = [16, 40], strides = [1, 1]} : vector<16x80xf32> to vector<16x40xf32>
    %c0_103 = arith.constant 0 : index
    %c112 = arith.constant 112 : index
    %125 = vector.load %arg18[%c0_103, %c112] : memref<16x176xf32, #tpu.memory_space<vmem>>, vector<16x40xf32>
    tpu.vector_store %arg18[%c0_103, %c112], %124 {strides = array<i32>} : memref<16x176xf32, #tpu.memory_space<vmem>>, vector<16x40xf32>,
    %c0_104 = arith.constant 0 : index
    %c0_105 = arith.constant 0 : index
    %126 = vector.load %arg18[%c0_104, %c0_105] : memref<16x176xf32, #tpu.memory_space<vmem>>, vector<16x176xf32>
    %127 = vector.extract_strided_slice %126 {offsets = [0, 0], sizes = [16, 40], strides = [1, 1]} : vector<16x176xf32> to vector<16x40xf32>
    %c0_106 = arith.constant 0 : index
    %c0_107 = arith.constant 0 : index
    %128 = vector.load %arg19[%c0_106, %c0_107] : memref<400x80xf32, #tpu.memory_space<vmem>>, vector<16x40xf32>
    tpu.vector_store %arg19[%c0_106, %c0_107], %127 {strides = array<i32>} : memref<400x80xf32, #tpu.memory_space<vmem>>, vector<16x40xf32>,
    %129 = vector.extract_strided_slice %126 {offsets = [0, 88], sizes = [16, 40], strides = [1, 1]} : vector<16x176xf32> to vector<16x40xf32>
    %c0_108 = arith.constant 0 : index
    %c40_109 = arith.constant 40 : index
    %130 = vector.load %arg19[%c0_108, %c40_109] : memref<400x80xf32, #tpu.memory_space<vmem>>, vector<16x40xf32>
    tpu.vector_store %arg19[%c0_108, %c40_109], %129 {strides = array<i32>} : memref<400x80xf32, #tpu.memory_space<vmem>>, vector<16x40xf32>,
    %131 = vector.extract_strided_slice %126 {offsets = [0, 2], sizes = [16, 40], strides = [1, 1]} : vector<16x176xf32> to vector<16x40xf32>
    %c16_110 = arith.constant 16 : index
    %c0_111 = arith.constant 0 : index
    %132 = vector.load %arg19[%c16_110, %c0_111] : memref<400x80xf32, #tpu.memory_space<vmem>>, vector<16x40xf32>
    tpu.vector_store %arg19[%c16_110, %c0_111], %131 {strides = array<i32>} : memref<400x80xf32, #tpu.memory_space<vmem>>, vector<16x40xf32>,
    %133 = vector.extract_strided_slice %126 {offsets = [0, 90], sizes = [16, 40], strides = [1, 1]} : vector<16x176xf32> to vector<16x40xf32>
    %c16_112 = arith.constant 16 : index
    %c40_113 = arith.constant 40 : index
    %134 = vector.load %arg19[%c16_112, %c40_113] : memref<400x80xf32, #tpu.memory_space<vmem>>, vector<16x40xf32>
    tpu.vector_store %arg19[%c16_112, %c40_113], %133 {strides = array<i32>} : memref<400x80xf32, #tpu.memory_space<vmem>>, vector<16x40xf32>,
    %135 = vector.extract_strided_slice %126 {offsets = [0, 4], sizes = [16, 40], strides = [1, 1]} : vector<16x176xf32> to vector<16x40xf32>
    %c32 = arith.constant 32 : index
    %c0_114 = arith.constant 0 : index
    %136 = vector.load %arg19[%c32, %c0_114] : memref<400x80xf32, #tpu.memory_space<vmem>>, vector<16x40xf32>
    tpu.vector_store %arg19[%c32, %c0_114], %135 {strides = array<i32>} : memref<400x80xf32, #tpu.memory_space<vmem>>, vector<16x40xf32>,
    %137 = vector.extract_strided_slice %126 {offsets = [0, 92], sizes = [16, 40], strides = [1, 1]} : vector<16x176xf32> to vector<16x40xf32>
    %c32_115 = arith.constant 32 : index
    %c40_116 = arith.constant 40 : index
    %138 = vector.load %arg19[%c32_115, %c40_116] : memref<400x80xf32, #tpu.memory_space<vmem>>, vector<16x40xf32>
    tpu.vector_store %arg19[%c32_115, %c40_116], %137 {strides = array<i32>} : memref<400x80xf32, #tpu.memory_space<vmem>>, vector<16x40xf32>,
    %139 = vector.extract_strided_slice %126 {offsets = [0, 6], sizes = [16, 40], strides = [1, 1]} : vector<16x176xf32> to vector<16x40xf32>
    %c48 = arith.constant 48 : index
    %c0_117 = arith.constant 0 : index
    %140 = vector.load %arg19[%c48, %c0_117] : memref<400x80xf32, #tpu.memory_space<vmem>>, vector<16x40xf32>
    tpu.vector_store %arg19[%c48, %c0_117], %139 {strides = array<i32>} : memref<400x80xf32, #tpu.memory_space<vmem>>, vector<16x40xf32>,
    %141 = vector.extract_strided_slice %126 {offsets = [0, 94], sizes = [16, 40], strides = [1, 1]} : vector<16x176xf32> to vector<16x40xf32>
    %c48_118 = arith.constant 48 : index
    %c40_119 = arith.constant 40 : index
    %142 = vector.load %arg19[%c48_118, %c40_119] : memref<400x80xf32, #tpu.memory_space<vmem>>, vector<16x40xf32>
    tpu.vector_store %arg19[%c48_118, %c40_119], %141 {strides = array<i32>} : memref<400x80xf32, #tpu.memory_space<vmem>>, vector<16x40xf32>,
    %143 = vector.extract_strided_slice %126 {offsets = [0, 8], sizes = [16, 40], strides = [1, 1]} : vector<16x176xf32> to vector<16x40xf32>
    %c64 = arith.constant 64 : index
    %c0_120 = arith.constant 0 : index
    %144 = vector.load %arg19[%c64, %c0_120] : memref<400x80xf32, #tpu.memory_space<vmem>>, vector<16x40xf32>
    tpu.vector_store %arg19[%c64, %c0_120], %143 {strides = array<i32>} : memref<400x80xf32, #tpu.memory_space<vmem>>, vector<16x40xf32>,
    %145 = vector.extract_strided_slice %126 {offsets = [0, 96], sizes = [16, 40], strides = [1, 1]} : vector<16x176xf32> to vector<16x40xf32>
    %c64_121 = arith.constant 64 : index
    %c40_122 = arith.constant 40 : index
    %146 = vector.load %arg19[%c64_121, %c40_122] : memref<400x80xf32, #tpu.memory_space<vmem>>, vector<16x40xf32>
    tpu.vector_store %arg19[%c64_121, %c40_122], %145 {strides = array<i32>} : memref<400x80xf32, #tpu.memory_space<vmem>>, vector<16x40xf32>,
    %147 = vector.extract_strided_slice %126 {offsets = [0, 10], sizes = [16, 40], strides = [1, 1]} : vector<16x176xf32> to vector<16x40xf32>
    %c80 = arith.constant 80 : index
    %c0_123 = arith.constant 0 : index
    %148 = vector.load %arg19[%c80, %c0_123] : memref<400x80xf32, #tpu.memory_space<vmem>>, vector<16x40xf32>
    tpu.vector_store %arg19[%c80, %c0_123], %147 {strides = array<i32>} : memref<400x80xf32, #tpu.memory_space<vmem>>, vector<16x40xf32>,
    %149 = vector.extract_strided_slice %126 {offsets = [0, 98], sizes = [16, 40], strides = [1, 1]} : vector<16x176xf32> to vector<16x40xf32>
    %c80_124 = arith.constant 80 : index
    %c40_125 = arith.constant 40 : index
    %150 = vector.load %arg19[%c80_124, %c40_125] : memref<400x80xf32, #tpu.memory_space<vmem>>, vector<16x40xf32>
    tpu.vector_store %arg19[%c80_124, %c40_125], %149 {strides = array<i32>} : memref<400x80xf32, #tpu.memory_space<vmem>>, vector<16x40xf32>,
    %151 = vector.extract_strided_slice %126 {offsets = [0, 12], sizes = [16, 40], strides = [1, 1]} : vector<16x176xf32> to vector<16x40xf32>
    %c96 = arith.constant 96 : index
    %c0_126 = arith.constant 0 : index
    %152 = vector.load %arg19[%c96, %c0_126] : memref<400x80xf32, #tpu.memory_space<vmem>>, vector<16x40xf32>
    tpu.vector_store %arg19[%c96, %c0_126], %151 {strides = array<i32>} : memref<400x80xf32, #tpu.memory_space<vmem>>, vector<16x40xf32>,
    %153 = vector.extract_strided_slice %126 {offsets = [0, 100], sizes = [16, 40], strides = [1, 1]} : vector<16x176xf32> to vector<16x40xf32>
    %c96_127 = arith.constant 96 : index
    %c40_128 = arith.constant 40 : index
    %154 = vector.load %arg19[%c96_127, %c40_128] : memref<400x80xf32, #tpu.memory_space<vmem>>, vector<16x40xf32>
    tpu.vector_store %arg19[%c96_127, %c40_128], %153 {strides = array<i32>} : memref<400x80xf32, #tpu.memory_space<vmem>>, vector<16x40xf32>,
    %155 = vector.extract_strided_slice %126 {offsets = [0, 14], sizes = [16, 40], strides = [1, 1]} : vector<16x176xf32> to vector<16x40xf32>
    %c112_129 = arith.constant 112 : index
    %c0_130 = arith.constant 0 : index
    %156 = vector.load %arg19[%c112_129, %c0_130] : memref<400x80xf32, #tpu.memory_space<vmem>>, vector<16x40xf32>
    tpu.vector_store %arg19[%c112_129, %c0_130], %155 {strides = array<i32>} : memref<400x80xf32, #tpu.memory_space<vmem>>, vector<16x40xf32>,
    %157 = vector.extract_strided_slice %126 {offsets = [0, 102], sizes = [16, 40], strides = [1, 1]} : vector<16x176xf32> to vector<16x40xf32>
    %c112_131 = arith.constant 112 : index
    %c40_132 = arith.constant 40 : index
    %158 = vector.load %arg19[%c112_131, %c40_132] : memref<400x80xf32, #tpu.memory_space<vmem>>, vector<16x40xf32>
    tpu.vector_store %arg19[%c112_131, %c40_132], %157 {strides = array<i32>} : memref<400x80xf32, #tpu.memory_space<vmem>>, vector<16x40xf32>,
    %159 = vector.extract_strided_slice %126 {offsets = [0, 16], sizes = [16, 40], strides = [1, 1]} : vector<16x176xf32> to vector<16x40xf32>
    %c128 = arith.constant 128 : index
    %c0_133 = arith.constant 0 : index
    %160 = vector.load %arg19[%c128, %c0_133] : memref<400x80xf32, #tpu.memory_space<vmem>>, vector<16x40xf32>
    tpu.vector_store %arg19[%c128, %c0_133], %159 {strides = array<i32>} : memref<400x80xf32, #tpu.memory_space<vmem>>, vector<16x40xf32>,
    %161 = vector.extract_strided_slice %126 {offsets = [0, 104], sizes = [16, 40], strides = [1, 1]} : vector<16x176xf32> to vector<16x40xf32>
    %c128_134 = arith.constant 128 : index
    %c40_135 = arith.constant 40 : index
    %162 = vector.load %arg19[%c128_134, %c40_135] : memref<400x80xf32, #tpu.memory_space<vmem>>, vector<16x40xf32>
    tpu.vector_store %arg19[%c128_134, %c40_135], %161 {strides = array<i32>} : memref<400x80xf32, #tpu.memory_space<vmem>>, vector<16x40xf32>,
    %163 = vector.extract_strided_slice %126 {offsets = [0, 18], sizes = [16, 40], strides = [1, 1]} : vector<16x176xf32> to vector<16x40xf32>
    %c144 = arith.constant 144 : index
    %c0_136 = arith.constant 0 : index
    %164 = vector.load %arg19[%c144, %c0_136] : memref<400x80xf32, #tpu.memory_space<vmem>>, vector<16x40xf32>
    tpu.vector_store %arg19[%c144, %c0_136], %163 {strides = array<i32>} : memref<400x80xf32, #tpu.memory_space<vmem>>, vector<16x40xf32>,
    %165 = vector.extract_strided_slice %126 {offsets = [0, 106], sizes = [16, 40], strides = [1, 1]} : vector<16x176xf32> to vector<16x40xf32>
    %c144_137 = arith.constant 144 : index
    %c40_138 = arith.constant 40 : index
    %166 = vector.load %arg19[%c144_137, %c40_138] : memref<400x80xf32, #tpu.memory_space<vmem>>, vector<16x40xf32>
    tpu.vector_store %arg19[%c144_137, %c40_138], %165 {strides = array<i32>} : memref<400x80xf32, #tpu.memory_space<vmem>>, vector<16x40xf32>,
    %167 = vector.extract_strided_slice %126 {offsets = [0, 20], sizes = [16, 40], strides = [1, 1]} : vector<16x176xf32> to vector<16x40xf32>
    %c160 = arith.constant 160 : index
    %c0_139 = arith.constant 0 : index
    %168 = vector.load %arg19[%c160, %c0_139] : memref<400x80xf32, #tpu.memory_space<vmem>>, vector<16x40xf32>
    tpu.vector_store %arg19[%c160, %c0_139], %167 {strides = array<i32>} : memref<400x80xf32, #tpu.memory_space<vmem>>, vector<16x40xf32>,
    %169 = vector.extract_strided_slice %126 {offsets = [0, 108], sizes = [16, 40], strides = [1, 1]} : vector<16x176xf32> to vector<16x40xf32>
    %c160_140 = arith.constant 160 : index
    %c40_141 = arith.constant 40 : index
    %170 = vector.load %arg19[%c160_140, %c40_141] : memref<400x80xf32, #tpu.memory_space<vmem>>, vector<16x40xf32>
    tpu.vector_store %arg19[%c160_140, %c40_141], %169 {strides = array<i32>} : memref<400x80xf32, #tpu.memory_space<vmem>>, vector<16x40xf32>,
    %171 = vector.extract_strided_slice %126 {offsets = [0, 22], sizes = [16, 40], strides = [1, 1]} : vector<16x176xf32> to vector<16x40xf32>
    %c176 = arith.constant 176 : index
    %c0_142 = arith.constant 0 : index
    %172 = vector.load %arg19[%c176, %c0_142] : memref<400x80xf32, #tpu.memory_space<vmem>>, vector<16x40xf32>
    tpu.vector_store %arg19[%c176, %c0_142], %171 {strides = array<i32>} : memref<400x80xf32, #tpu.memory_space<vmem>>, vector<16x40xf32>,
    %173 = vector.extract_strided_slice %126 {offsets = [0, 110], sizes = [16, 40], strides = [1, 1]} : vector<16x176xf32> to vector<16x40xf32>
    %c176_143 = arith.constant 176 : index
    %c40_144 = arith.constant 40 : index
    %174 = vector.load %arg19[%c176_143, %c40_144] : memref<400x80xf32, #tpu.memory_space<vmem>>, vector<16x40xf32>
    tpu.vector_store %arg19[%c176_143, %c40_144], %173 {strides = array<i32>} : memref<400x80xf32, #tpu.memory_space<vmem>>, vector<16x40xf32>,
    %175 = vector.extract_strided_slice %126 {offsets = [0, 24], sizes = [16, 40], strides = [1, 1]} : vector<16x176xf32> to vector<16x40xf32>
    %c192 = arith.constant 192 : index
    %c0_145 = arith.constant 0 : index
    %176 = vector.load %arg19[%c192, %c0_145] : memref<400x80xf32, #tpu.memory_space<vmem>>, vector<16x40xf32>
    tpu.vector_store %arg19[%c192, %c0_145], %175 {strides = array<i32>} : memref<400x80xf32, #tpu.memory_space<vmem>>, vector<16x40xf32>,
    %177 = vector.extract_strided_slice %126 {offsets = [0, 112], sizes = [16, 40], strides = [1, 1]} : vector<16x176xf32> to vector<16x40xf32>
    %c192_146 = arith.constant 192 : index
    %c40_147 = arith.constant 40 : index
    %178 = vector.load %arg19[%c192_146, %c40_147] : memref<400x80xf32, #tpu.memory_space<vmem>>, vector<16x40xf32>
    tpu.vector_store %arg19[%c192_146, %c40_147], %177 {strides = array<i32>} : memref<400x80xf32, #tpu.memory_space<vmem>>, vector<16x40xf32>,
    %179 = vector.extract_strided_slice %126 {offsets = [0, 26], sizes = [16, 40], strides = [1, 1]} : vector<16x176xf32> to vector<16x40xf32>
    %c208 = arith.constant 208 : index
    %c0_148 = arith.constant 0 : index
    %180 = vector.load %arg19[%c208, %c0_148] : memref<400x80xf32, #tpu.memory_space<vmem>>, vector<16x40xf32>
    tpu.vector_store %arg19[%c208, %c0_148], %179 {strides = array<i32>} : memref<400x80xf32, #tpu.memory_space<vmem>>, vector<16x40xf32>,
    %181 = vector.extract_strided_slice %126 {offsets = [0, 114], sizes = [16, 40], strides = [1, 1]} : vector<16x176xf32> to vector<16x40xf32>
    %c208_149 = arith.constant 208 : index
    %c40_150 = arith.constant 40 : index
    %182 = vector.load %arg19[%c208_149, %c40_150] : memref<400x80xf32, #tpu.memory_space<vmem>>, vector<16x40xf32>
    tpu.vector_store %arg19[%c208_149, %c40_150], %181 {strides = array<i32>} : memref<400x80xf32, #tpu.memory_space<vmem>>, vector<16x40xf32>,
    %183 = vector.extract_strided_slice %126 {offsets = [0, 28], sizes = [16, 40], strides = [1, 1]} : vector<16x176xf32> to vector<16x40xf32>
    %c224 = arith.constant 224 : index
    %c0_151 = arith.constant 0 : index
    %184 = vector.load %arg19[%c224, %c0_151] : memref<400x80xf32, #tpu.memory_space<vmem>>, vector<16x40xf32>
    tpu.vector_store %arg19[%c224, %c0_151], %183 {strides = array<i32>} : memref<400x80xf32, #tpu.memory_space<vmem>>, vector<16x40xf32>,
    %185 = vector.extract_strided_slice %126 {offsets = [0, 116], sizes = [16, 40], strides = [1, 1]} : vector<16x176xf32> to vector<16x40xf32>
    %c224_152 = arith.constant 224 : index
    %c40_153 = arith.constant 40 : index
    %186 = vector.load %arg19[%c224_152, %c40_153] : memref<400x80xf32, #tpu.memory_space<vmem>>, vector<16x40xf32>
    tpu.vector_store %arg19[%c224_152, %c40_153], %185 {strides = array<i32>} : memref<400x80xf32, #tpu.memory_space<vmem>>, vector<16x40xf32>,
    %187 = vector.extract_strided_slice %126 {offsets = [0, 30], sizes = [16, 40], strides = [1, 1]} : vector<16x176xf32> to vector<16x40xf32>
    %c240 = arith.constant 240 : index
    %c0_154 = arith.constant 0 : index
    %188 = vector.load %arg19[%c240, %c0_154] : memref<400x80xf32, #tpu.memory_space<vmem>>, vector<16x40xf32>
    tpu.vector_store %arg19[%c240, %c0_154], %187 {strides = array<i32>} : memref<400x80xf32, #tpu.memory_space<vmem>>, vector<16x40xf32>,
    %189 = vector.extract_strided_slice %126 {offsets = [0, 118], sizes = [16, 40], strides = [1, 1]} : vector<16x176xf32> to vector<16x40xf32>
    %c240_155 = arith.constant 240 : index
    %c40_156 = arith.constant 40 : index
    %190 = vector.load %arg19[%c240_155, %c40_156] : memref<400x80xf32, #tpu.memory_space<vmem>>, vector<16x40xf32>
    tpu.vector_store %arg19[%c240_155, %c40_156], %189 {strides = array<i32>} : memref<400x80xf32, #tpu.memory_space<vmem>>, vector<16x40xf32>,
    %191 = vector.extract_strided_slice %126 {offsets = [0, 32], sizes = [16, 40], strides = [1, 1]} : vector<16x176xf32> to vector<16x40xf32>
    %c256 = arith.constant 256 : index
    %c0_157 = arith.constant 0 : index
    %192 = vector.load %arg19[%c256, %c0_157] : memref<400x80xf32, #tpu.memory_space<vmem>>, vector<16x40xf32>
    tpu.vector_store %arg19[%c256, %c0_157], %191 {strides = array<i32>} : memref<400x80xf32, #tpu.memory_space<vmem>>, vector<16x40xf32>,
    %193 = vector.extract_strided_slice %126 {offsets = [0, 120], sizes = [16, 40], strides = [1, 1]} : vector<16x176xf32> to vector<16x40xf32>
    %c256_158 = arith.constant 256 : index
    %c40_159 = arith.constant 40 : index
    %194 = vector.load %arg19[%c256_158, %c40_159] : memref<400x80xf32, #tpu.memory_space<vmem>>, vector<16x40xf32>
    tpu.vector_store %arg19[%c256_158, %c40_159], %193 {strides = array<i32>} : memref<400x80xf32, #tpu.memory_space<vmem>>, vector<16x40xf32>,
    %195 = vector.extract_strided_slice %126 {offsets = [0, 34], sizes = [16, 40], strides = [1, 1]} : vector<16x176xf32> to vector<16x40xf32>
    %c272 = arith.constant 272 : index
    %c0_160 = arith.constant 0 : index
    %196 = vector.load %arg19[%c272, %c0_160] : memref<400x80xf32, #tpu.memory_space<vmem>>, vector<16x40xf32>
    tpu.vector_store %arg19[%c272, %c0_160], %195 {strides = array<i32>} : memref<400x80xf32, #tpu.memory_space<vmem>>, vector<16x40xf32>,
    %197 = vector.extract_strided_slice %126 {offsets = [0, 122], sizes = [16, 40], strides = [1, 1]} : vector<16x176xf32> to vector<16x40xf32>
    %c272_161 = arith.constant 272 : index
    %c40_162 = arith.constant 40 : index
    %198 = vector.load %arg19[%c272_161, %c40_162] : memref<400x80xf32, #tpu.memory_space<vmem>>, vector<16x40xf32>
    tpu.vector_store %arg19[%c272_161, %c40_162], %197 {strides = array<i32>} : memref<400x80xf32, #tpu.memory_space<vmem>>, vector<16x40xf32>,
    %199 = vector.extract_strided_slice %126 {offsets = [0, 36], sizes = [16, 40], strides = [1, 1]} : vector<16x176xf32> to vector<16x40xf32>
    %c288 = arith.constant 288 : index
    %c0_163 = arith.constant 0 : index
    %200 = vector.load %arg19[%c288, %c0_163] : memref<400x80xf32, #tpu.memory_space<vmem>>, vector<16x40xf32>
    tpu.vector_store %arg19[%c288, %c0_163], %199 {strides = array<i32>} : memref<400x80xf32, #tpu.memory_space<vmem>>, vector<16x40xf32>,
    %201 = vector.extract_strided_slice %126 {offsets = [0, 124], sizes = [16, 40], strides = [1, 1]} : vector<16x176xf32> to vector<16x40xf32>
    %c288_164 = arith.constant 288 : index
    %c40_165 = arith.constant 40 : index
    %202 = vector.load %arg19[%c288_164, %c40_165] : memref<400x80xf32, #tpu.memory_space<vmem>>, vector<16x40xf32>
    tpu.vector_store %arg19[%c288_164, %c40_165], %201 {strides = array<i32>} : memref<400x80xf32, #tpu.memory_space<vmem>>, vector<16x40xf32>,
    %203 = vector.extract_strided_slice %126 {offsets = [0, 38], sizes = [16, 40], strides = [1, 1]} : vector<16x176xf32> to vector<16x40xf32>
    %c304 = arith.constant 304 : index
    %c0_166 = arith.constant 0 : index
    %204 = vector.load %arg19[%c304, %c0_166] : memref<400x80xf32, #tpu.memory_space<vmem>>, vector<16x40xf32>
    tpu.vector_store %arg19[%c304, %c0_166], %203 {strides = array<i32>} : memref<400x80xf32, #tpu.memory_space<vmem>>, vector<16x40xf32>,
    %205 = vector.extract_strided_slice %126 {offsets = [0, 126], sizes = [16, 40], strides = [1, 1]} : vector<16x176xf32> to vector<16x40xf32>
    %c304_167 = arith.constant 304 : index
    %c40_168 = arith.constant 40 : index
    %206 = vector.load %arg19[%c304_167, %c40_168] : memref<400x80xf32, #tpu.memory_space<vmem>>, vector<16x40xf32>
    tpu.vector_store %arg19[%c304_167, %c40_168], %205 {strides = array<i32>} : memref<400x80xf32, #tpu.memory_space<vmem>>, vector<16x40xf32>,
    %207 = vector.extract_strided_slice %126 {offsets = [0, 40], sizes = [16, 40], strides = [1, 1]} : vector<16x176xf32> to vector<16x40xf32>
    %c320 = arith.constant 320 : index
    %c0_169 = arith.constant 0 : index
    %208 = vector.load %arg19[%c320, %c0_169] : memref<400x80xf32, #tpu.memory_space<vmem>>, vector<16x40xf32>
    tpu.vector_store %arg19[%c320, %c0_169], %207 {strides = array<i32>} : memref<400x80xf32, #tpu.memory_space<vmem>>, vector<16x40xf32>,
    %209 = vector.extract_strided_slice %126 {offsets = [0, 128], sizes = [16, 40], strides = [1, 1]} : vector<16x176xf32> to vector<16x40xf32>
    %c320_170 = arith.constant 320 : index
    %c40_171 = arith.constant 40 : index
    %210 = vector.load %arg19[%c320_170, %c40_171] : memref<400x80xf32, #tpu.memory_space<vmem>>, vector<16x40xf32>
    tpu.vector_store %arg19[%c320_170, %c40_171], %209 {strides = array<i32>} : memref<400x80xf32, #tpu.memory_space<vmem>>, vector<16x40xf32>,
    %211 = vector.extract_strided_slice %126 {offsets = [0, 42], sizes = [16, 40], strides = [1, 1]} : vector<16x176xf32> to vector<16x40xf32>
    %c336 = arith.constant 336 : index
    %c0_172 = arith.constant 0 : index
    %212 = vector.load %arg19[%c336, %c0_172] : memref<400x80xf32, #tpu.memory_space<vmem>>, vector<16x40xf32>
    tpu.vector_store %arg19[%c336, %c0_172], %211 {strides = array<i32>} : memref<400x80xf32, #tpu.memory_space<vmem>>, vector<16x40xf32>,
    %213 = vector.extract_strided_slice %126 {offsets = [0, 130], sizes = [16, 40], strides = [1, 1]} : vector<16x176xf32> to vector<16x40xf32>
    %c336_173 = arith.constant 336 : index
    %c40_174 = arith.constant 40 : index
    %214 = vector.load %arg19[%c336_173, %c40_174] : memref<400x80xf32, #tpu.memory_space<vmem>>, vector<16x40xf32>
    tpu.vector_store %arg19[%c336_173, %c40_174], %213 {strides = array<i32>} : memref<400x80xf32, #tpu.memory_space<vmem>>, vector<16x40xf32>,
    %215 = vector.extract_strided_slice %126 {offsets = [0, 44], sizes = [16, 40], strides = [1, 1]} : vector<16x176xf32> to vector<16x40xf32>
    %c352 = arith.constant 352 : index
    %c0_175 = arith.constant 0 : index
    %216 = vector.load %arg19[%c352, %c0_175] : memref<400x80xf32, #tpu.memory_space<vmem>>, vector<16x40xf32>
    tpu.vector_store %arg19[%c352, %c0_175], %215 {strides = array<i32>} : memref<400x80xf32, #tpu.memory_space<vmem>>, vector<16x40xf32>,
    %217 = vector.extract_strided_slice %126 {offsets = [0, 132], sizes = [16, 40], strides = [1, 1]} : vector<16x176xf32> to vector<16x40xf32>
    %c352_176 = arith.constant 352 : index
    %c40_177 = arith.constant 40 : index
    %218 = vector.load %arg19[%c352_176, %c40_177] : memref<400x80xf32, #tpu.memory_space<vmem>>, vector<16x40xf32>
    tpu.vector_store %arg19[%c352_176, %c40_177], %217 {strides = array<i32>} : memref<400x80xf32, #tpu.memory_space<vmem>>, vector<16x40xf32>,
    %219 = vector.extract_strided_slice %126 {offsets = [0, 46], sizes = [16, 40], strides = [1, 1]} : vector<16x176xf32> to vector<16x40xf32>
    %c368 = arith.constant 368 : index
    %c0_178 = arith.constant 0 : index
    %220 = vector.load %arg19[%c368, %c0_178] : memref<400x80xf32, #tpu.memory_space<vmem>>, vector<16x40xf32>
    tpu.vector_store %arg19[%c368, %c0_178], %219 {strides = array<i32>} : memref<400x80xf32, #tpu.memory_space<vmem>>, vector<16x40xf32>,
    %221 = vector.extract_strided_slice %126 {offsets = [0, 134], sizes = [16, 40], strides = [1, 1]} : vector<16x176xf32> to vector<16x40xf32>
    %c368_179 = arith.constant 368 : index
    %c40_180 = arith.constant 40 : index
    %222 = vector.load %arg19[%c368_179, %c40_180] : memref<400x80xf32, #tpu.memory_space<vmem>>, vector<16x40xf32>
    tpu.vector_store %arg19[%c368_179, %c40_180], %221 {strides = array<i32>} : memref<400x80xf32, #tpu.memory_space<vmem>>, vector<16x40xf32>,
    %223 = vector.extract_strided_slice %126 {offsets = [0, 48], sizes = [16, 40], strides = [1, 1]} : vector<16x176xf32> to vector<16x40xf32>
    %c384 = arith.constant 384 : index
    %c0_181 = arith.constant 0 : index
    %224 = vector.load %arg19[%c384, %c0_181] : memref<400x80xf32, #tpu.memory_space<vmem>>, vector<16x40xf32>
    tpu.vector_store %arg19[%c384, %c0_181], %223 {strides = array<i32>} : memref<400x80xf32, #tpu.memory_space<vmem>>, vector<16x40xf32>,
    %225 = vector.extract_strided_slice %126 {offsets = [0, 136], sizes = [16, 40], strides = [1, 1]} : vector<16x176xf32> to vector<16x40xf32>
    %c384_182 = arith.constant 384 : index
    %c40_183 = arith.constant 40 : index
    %226 = vector.load %arg19[%c384_182, %c40_183] : memref<400x80xf32, #tpu.memory_space<vmem>>, vector<16x40xf32>
    tpu.vector_store %arg19[%c384_182, %c40_183], %225 {strides = array<i32>} : memref<400x80xf32, #tpu.memory_space<vmem>>, vector<16x40xf32>,
    %c0_184 = arith.constant 0 : index
    %c0_185 = arith.constant 0 : index
    %227 = vector.load %arg9[%c0_184, %c0_185] : memref<32x400xf32, #tpu.memory_space<vmem>>, vector<32x400xf32>
    %c0_186 = arith.constant 0 : index
    %c0_187 = arith.constant 0 : index
    %228 = vector.load %arg19[%c0_186, %c0_187] : memref<400x80xf32, #tpu.memory_space<vmem>>, vector<400x80xf32>
    %cst_188 = arith.constant dense<0.000000e+00> : vector<32x80xf32>
    %229 = tpu.matmul %227, %228, %cst_188 {dimension_numbers = #tpu.dot_dimension_numbers<[1], [0], [0], [1], [0, 0, 1, 1], [], []>} : vector<32x400xf32>, vector<400x80xf32>, vector<32x80xf32> -> vector<32x80xf32>
    %c0_189 = arith.constant 0 : index
    %c0_190 = arith.constant 0 : index
    %230 = vector.load %arg10[%c0_189, %c0_190] : memref<32x1xf32, #tpu.memory_space<vmem>>, vector<32x1xf32>
    %231 = vector.broadcast %230 : vector<32x1xf32> to vector<32x80xf32>
    %232 = arith.addf %229, %231 : vector<32x80xf32>
    %cst_191 = arith.constant 0.000000e+00 : f32
    %233 = vector.broadcast %cst_191 : f32 to vector<32x80xf32>
    %234 = arith.maximumf %232, %233 : vector<32x80xf32>
    %c0_192 = arith.constant 0 : index
    %c0_193 = arith.constant 0 : index
    %235 = vector.load %arg11[%c0_192, %c0_193] : memref<64x32xf32, #tpu.memory_space<vmem>>, vector<64x32xf32>
    %cst_194 = arith.constant dense<0.000000e+00> : vector<64x80xf32>
    %236 = tpu.matmul %235, %234, %cst_194 {dimension_numbers = #tpu.dot_dimension_numbers<[1], [0], [0], [1], [0, 0, 1, 1], [], []>} : vector<64x32xf32>, vector<32x80xf32>, vector<64x80xf32> -> vector<64x80xf32>
    %c0_195 = arith.constant 0 : index
    %c0_196 = arith.constant 0 : index
    %237 = vector.load %arg12[%c0_195, %c0_196] : memref<64x1xf32, #tpu.memory_space<vmem>>, vector<64x1xf32>
    %238 = vector.broadcast %237 : vector<64x1xf32> to vector<64x80xf32>
    %239 = arith.addf %236, %238 : vector<64x80xf32>
    %cst_197 = arith.constant 0.000000e+00 : f32
    %240 = vector.broadcast %cst_197 : f32 to vector<32x224xf32>
    %c0_198 = arith.constant 0 : index
    %c0_199 = arith.constant 0 : index
    %241 = vector.load %arg20[%c0_198, %c0_199] : memref<32x224xf32, #tpu.memory_space<vmem>>, vector<32x224xf32>
    tpu.vector_store %arg20[%c0_198, %c0_199], %240 {strides = array<i32>} : memref<32x224xf32, #tpu.memory_space<vmem>>, vector<32x224xf32>,
    %242 = vector.extract_strided_slice %234 {offsets = [0, 0], sizes = [32, 40], strides = [1, 1]} : vector<32x80xf32> to vector<32x40xf32>
    %c0_200 = arith.constant 0 : index
    %c36 = arith.constant 36 : index
    %243 = vector.load %arg20[%c0_200, %c36] : memref<32x224xf32, #tpu.memory_space<vmem>>, vector<32x40xf32>
    tpu.vector_store %arg20[%c0_200, %c36], %242 {strides = array<i32>} : memref<32x224xf32, #tpu.memory_space<vmem>>, vector<32x40xf32>,
    %244 = vector.extract_strided_slice %234 {offsets = [0, 40], sizes = [32, 40], strides = [1, 1]} : vector<32x80xf32> to vector<32x40xf32>
    %c0_201 = arith.constant 0 : index
    %c148 = arith.constant 148 : index
    %245 = vector.load %arg20[%c0_201, %c148] : memref<32x224xf32, #tpu.memory_space<vmem>>, vector<32x40xf32>
    tpu.vector_store %arg20[%c0_201, %c148], %244 {strides = array<i32>} : memref<32x224xf32, #tpu.memory_space<vmem>>, vector<32x40xf32>,
    %c0_202 = arith.constant 0 : index
    %c0_203 = arith.constant 0 : index
    %246 = vector.load %arg20[%c0_202, %c0_203] : memref<32x224xf32, #tpu.memory_space<vmem>>, vector<32x224xf32>
    %247 = vector.extract_strided_slice %246 {offsets = [0, 0], sizes = [32, 40], strides = [1, 1]} : vector<32x224xf32> to vector<32x40xf32>
    %c0_204 = arith.constant 0 : index
    %c0_205 = arith.constant 0 : index
    %248 = vector.load %arg21[%c0_204, %c0_205] : memref<800x80xf32, #tpu.memory_space<vmem>>, vector<32x40xf32>
    tpu.vector_store %arg21[%c0_204, %c0_205], %247 {strides = array<i32>} : memref<800x80xf32, #tpu.memory_space<vmem>>, vector<32x40xf32>,
    %249 = vector.extract_strided_slice %246 {offsets = [0, 112], sizes = [32, 40], strides = [1, 1]} : vector<32x224xf32> to vector<32x40xf32>
    %c0_206 = arith.constant 0 : index
    %c40_207 = arith.constant 40 : index
    %250 = vector.load %arg21[%c0_206, %c40_207] : memref<800x80xf32, #tpu.memory_space<vmem>>, vector<32x40xf32>
    tpu.vector_store %arg21[%c0_206, %c40_207], %249 {strides = array<i32>} : memref<800x80xf32, #tpu.memory_space<vmem>>, vector<32x40xf32>,
    %251 = vector.extract_strided_slice %246 {offsets = [0, 3], sizes = [32, 40], strides = [1, 1]} : vector<32x224xf32> to vector<32x40xf32>
    %c32_208 = arith.constant 32 : index
    %c0_209 = arith.constant 0 : index
    %252 = vector.load %arg21[%c32_208, %c0_209] : memref<800x80xf32, #tpu.memory_space<vmem>>, vector<32x40xf32>
    tpu.vector_store %arg21[%c32_208, %c0_209], %251 {strides = array<i32>} : memref<800x80xf32, #tpu.memory_space<vmem>>, vector<32x40xf32>,
    %253 = vector.extract_strided_slice %246 {offsets = [0, 115], sizes = [32, 40], strides = [1, 1]} : vector<32x224xf32> to vector<32x40xf32>
    %c32_210 = arith.constant 32 : index
    %c40_211 = arith.constant 40 : index
    %254 = vector.load %arg21[%c32_210, %c40_211] : memref<800x80xf32, #tpu.memory_space<vmem>>, vector<32x40xf32>
    tpu.vector_store %arg21[%c32_210, %c40_211], %253 {strides = array<i32>} : memref<800x80xf32, #tpu.memory_space<vmem>>, vector<32x40xf32>,
    %255 = vector.extract_strided_slice %246 {offsets = [0, 6], sizes = [32, 40], strides = [1, 1]} : vector<32x224xf32> to vector<32x40xf32>
    %c64_212 = arith.constant 64 : index
    %c0_213 = arith.constant 0 : index
    %256 = vector.load %arg21[%c64_212, %c0_213] : memref<800x80xf32, #tpu.memory_space<vmem>>, vector<32x40xf32>
    tpu.vector_store %arg21[%c64_212, %c0_213], %255 {strides = array<i32>} : memref<800x80xf32, #tpu.memory_space<vmem>>, vector<32x40xf32>,
    %257 = vector.extract_strided_slice %246 {offsets = [0, 118], sizes = [32, 40], strides = [1, 1]} : vector<32x224xf32> to vector<32x40xf32>
    %c64_214 = arith.constant 64 : index
    %c40_215 = arith.constant 40 : index
    %258 = vector.load %arg21[%c64_214, %c40_215] : memref<800x80xf32, #tpu.memory_space<vmem>>, vector<32x40xf32>
    tpu.vector_store %arg21[%c64_214, %c40_215], %257 {strides = array<i32>} : memref<800x80xf32, #tpu.memory_space<vmem>>, vector<32x40xf32>,
    %259 = vector.extract_strided_slice %246 {offsets = [0, 9], sizes = [32, 40], strides = [1, 1]} : vector<32x224xf32> to vector<32x40xf32>
    %c96_216 = arith.constant 96 : index
    %c0_217 = arith.constant 0 : index
    %260 = vector.load %arg21[%c96_216, %c0_217] : memref<800x80xf32, #tpu.memory_space<vmem>>, vector<32x40xf32>
    tpu.vector_store %arg21[%c96_216, %c0_217], %259 {strides = array<i32>} : memref<800x80xf32, #tpu.memory_space<vmem>>, vector<32x40xf32>,
    %261 = vector.extract_strided_slice %246 {offsets = [0, 121], sizes = [32, 40], strides = [1, 1]} : vector<32x224xf32> to vector<32x40xf32>
    %c96_218 = arith.constant 96 : index
    %c40_219 = arith.constant 40 : index
    %262 = vector.load %arg21[%c96_218, %c40_219] : memref<800x80xf32, #tpu.memory_space<vmem>>, vector<32x40xf32>
    tpu.vector_store %arg21[%c96_218, %c40_219], %261 {strides = array<i32>} : memref<800x80xf32, #tpu.memory_space<vmem>>, vector<32x40xf32>,
    %263 = vector.extract_strided_slice %246 {offsets = [0, 12], sizes = [32, 40], strides = [1, 1]} : vector<32x224xf32> to vector<32x40xf32>
    %c128_220 = arith.constant 128 : index
    %c0_221 = arith.constant 0 : index
    %264 = vector.load %arg21[%c128_220, %c0_221] : memref<800x80xf32, #tpu.memory_space<vmem>>, vector<32x40xf32>
    tpu.vector_store %arg21[%c128_220, %c0_221], %263 {strides = array<i32>} : memref<800x80xf32, #tpu.memory_space<vmem>>, vector<32x40xf32>,
    %265 = vector.extract_strided_slice %246 {offsets = [0, 124], sizes = [32, 40], strides = [1, 1]} : vector<32x224xf32> to vector<32x40xf32>
    %c128_222 = arith.constant 128 : index
    %c40_223 = arith.constant 40 : index
    %266 = vector.load %arg21[%c128_222, %c40_223] : memref<800x80xf32, #tpu.memory_space<vmem>>, vector<32x40xf32>
    tpu.vector_store %arg21[%c128_222, %c40_223], %265 {strides = array<i32>} : memref<800x80xf32, #tpu.memory_space<vmem>>, vector<32x40xf32>,
    %267 = vector.extract_strided_slice %246 {offsets = [0, 15], sizes = [32, 40], strides = [1, 1]} : vector<32x224xf32> to vector<32x40xf32>
    %c160_224 = arith.constant 160 : index
    %c0_225 = arith.constant 0 : index
    %268 = vector.load %arg21[%c160_224, %c0_225] : memref<800x80xf32, #tpu.memory_space<vmem>>, vector<32x40xf32>
    tpu.vector_store %arg21[%c160_224, %c0_225], %267 {strides = array<i32>} : memref<800x80xf32, #tpu.memory_space<vmem>>, vector<32x40xf32>,
    %269 = vector.extract_strided_slice %246 {offsets = [0, 127], sizes = [32, 40], strides = [1, 1]} : vector<32x224xf32> to vector<32x40xf32>
    %c160_226 = arith.constant 160 : index
    %c40_227 = arith.constant 40 : index
    %270 = vector.load %arg21[%c160_226, %c40_227] : memref<800x80xf32, #tpu.memory_space<vmem>>, vector<32x40xf32>
    tpu.vector_store %arg21[%c160_226, %c40_227], %269 {strides = array<i32>} : memref<800x80xf32, #tpu.memory_space<vmem>>, vector<32x40xf32>,
    %271 = vector.extract_strided_slice %246 {offsets = [0, 18], sizes = [32, 40], strides = [1, 1]} : vector<32x224xf32> to vector<32x40xf32>
    %c192_228 = arith.constant 192 : index
    %c0_229 = arith.constant 0 : index
    %272 = vector.load %arg21[%c192_228, %c0_229] : memref<800x80xf32, #tpu.memory_space<vmem>>, vector<32x40xf32>
    tpu.vector_store %arg21[%c192_228, %c0_229], %271 {strides = array<i32>} : memref<800x80xf32, #tpu.memory_space<vmem>>, vector<32x40xf32>,
    %273 = vector.extract_strided_slice %246 {offsets = [0, 130], sizes = [32, 40], strides = [1, 1]} : vector<32x224xf32> to vector<32x40xf32>
    %c192_230 = arith.constant 192 : index
    %c40_231 = arith.constant 40 : index
    %274 = vector.load %arg21[%c192_230, %c40_231] : memref<800x80xf32, #tpu.memory_space<vmem>>, vector<32x40xf32>
    tpu.vector_store %arg21[%c192_230, %c40_231], %273 {strides = array<i32>} : memref<800x80xf32, #tpu.memory_space<vmem>>, vector<32x40xf32>,
    %275 = vector.extract_strided_slice %246 {offsets = [0, 21], sizes = [32, 40], strides = [1, 1]} : vector<32x224xf32> to vector<32x40xf32>
    %c224_232 = arith.constant 224 : index
    %c0_233 = arith.constant 0 : index
    %276 = vector.load %arg21[%c224_232, %c0_233] : memref<800x80xf32, #tpu.memory_space<vmem>>, vector<32x40xf32>
    tpu.vector_store %arg21[%c224_232, %c0_233], %275 {strides = array<i32>} : memref<800x80xf32, #tpu.memory_space<vmem>>, vector<32x40xf32>,
    %277 = vector.extract_strided_slice %246 {offsets = [0, 133], sizes = [32, 40], strides = [1, 1]} : vector<32x224xf32> to vector<32x40xf32>
    %c224_234 = arith.constant 224 : index
    %c40_235 = arith.constant 40 : index
    %278 = vector.load %arg21[%c224_234, %c40_235] : memref<800x80xf32, #tpu.memory_space<vmem>>, vector<32x40xf32>
    tpu.vector_store %arg21[%c224_234, %c40_235], %277 {strides = array<i32>} : memref<800x80xf32, #tpu.memory_space<vmem>>, vector<32x40xf32>,
    %279 = vector.extract_strided_slice %246 {offsets = [0, 24], sizes = [32, 40], strides = [1, 1]} : vector<32x224xf32> to vector<32x40xf32>
    %c256_236 = arith.constant 256 : index
    %c0_237 = arith.constant 0 : index
    %280 = vector.load %arg21[%c256_236, %c0_237] : memref<800x80xf32, #tpu.memory_space<vmem>>, vector<32x40xf32>
    tpu.vector_store %arg21[%c256_236, %c0_237], %279 {strides = array<i32>} : memref<800x80xf32, #tpu.memory_space<vmem>>, vector<32x40xf32>,
    %281 = vector.extract_strided_slice %246 {offsets = [0, 136], sizes = [32, 40], strides = [1, 1]} : vector<32x224xf32> to vector<32x40xf32>
    %c256_238 = arith.constant 256 : index
    %c40_239 = arith.constant 40 : index
    %282 = vector.load %arg21[%c256_238, %c40_239] : memref<800x80xf32, #tpu.memory_space<vmem>>, vector<32x40xf32>
    tpu.vector_store %arg21[%c256_238, %c40_239], %281 {strides = array<i32>} : memref<800x80xf32, #tpu.memory_space<vmem>>, vector<32x40xf32>,
    %283 = vector.extract_strided_slice %246 {offsets = [0, 27], sizes = [32, 40], strides = [1, 1]} : vector<32x224xf32> to vector<32x40xf32>
    %c288_240 = arith.constant 288 : index
    %c0_241 = arith.constant 0 : index
    %284 = vector.load %arg21[%c288_240, %c0_241] : memref<800x80xf32, #tpu.memory_space<vmem>>, vector<32x40xf32>
    tpu.vector_store %arg21[%c288_240, %c0_241], %283 {strides = array<i32>} : memref<800x80xf32, #tpu.memory_space<vmem>>, vector<32x40xf32>,
    %285 = vector.extract_strided_slice %246 {offsets = [0, 139], sizes = [32, 40], strides = [1, 1]} : vector<32x224xf32> to vector<32x40xf32>
    %c288_242 = arith.constant 288 : index
    %c40_243 = arith.constant 40 : index
    %286 = vector.load %arg21[%c288_242, %c40_243] : memref<800x80xf32, #tpu.memory_space<vmem>>, vector<32x40xf32>
    tpu.vector_store %arg21[%c288_242, %c40_243], %285 {strides = array<i32>} : memref<800x80xf32, #tpu.memory_space<vmem>>, vector<32x40xf32>,
    %287 = vector.extract_strided_slice %246 {offsets = [0, 30], sizes = [32, 40], strides = [1, 1]} : vector<32x224xf32> to vector<32x40xf32>
    %c320_244 = arith.constant 320 : index
    %c0_245 = arith.constant 0 : index
    %288 = vector.load %arg21[%c320_244, %c0_245] : memref<800x80xf32, #tpu.memory_space<vmem>>, vector<32x40xf32>
    tpu.vector_store %arg21[%c320_244, %c0_245], %287 {strides = array<i32>} : memref<800x80xf32, #tpu.memory_space<vmem>>, vector<32x40xf32>,
    %289 = vector.extract_strided_slice %246 {offsets = [0, 142], sizes = [32, 40], strides = [1, 1]} : vector<32x224xf32> to vector<32x40xf32>
    %c320_246 = arith.constant 320 : index
    %c40_247 = arith.constant 40 : index
    %290 = vector.load %arg21[%c320_246, %c40_247] : memref<800x80xf32, #tpu.memory_space<vmem>>, vector<32x40xf32>
    tpu.vector_store %arg21[%c320_246, %c40_247], %289 {strides = array<i32>} : memref<800x80xf32, #tpu.memory_space<vmem>>, vector<32x40xf32>,
    %291 = vector.extract_strided_slice %246 {offsets = [0, 33], sizes = [32, 40], strides = [1, 1]} : vector<32x224xf32> to vector<32x40xf32>
    %c352_248 = arith.constant 352 : index
    %c0_249 = arith.constant 0 : index
    %292 = vector.load %arg21[%c352_248, %c0_249] : memref<800x80xf32, #tpu.memory_space<vmem>>, vector<32x40xf32>
    tpu.vector_store %arg21[%c352_248, %c0_249], %291 {strides = array<i32>} : memref<800x80xf32, #tpu.memory_space<vmem>>, vector<32x40xf32>,
    %293 = vector.extract_strided_slice %246 {offsets = [0, 145], sizes = [32, 40], strides = [1, 1]} : vector<32x224xf32> to vector<32x40xf32>
    %c352_250 = arith.constant 352 : index
    %c40_251 = arith.constant 40 : index
    %294 = vector.load %arg21[%c352_250, %c40_251] : memref<800x80xf32, #tpu.memory_space<vmem>>, vector<32x40xf32>
    tpu.vector_store %arg21[%c352_250, %c40_251], %293 {strides = array<i32>} : memref<800x80xf32, #tpu.memory_space<vmem>>, vector<32x40xf32>,
    %295 = vector.extract_strided_slice %246 {offsets = [0, 36], sizes = [32, 40], strides = [1, 1]} : vector<32x224xf32> to vector<32x40xf32>
    %c384_252 = arith.constant 384 : index
    %c0_253 = arith.constant 0 : index
    %296 = vector.load %arg21[%c384_252, %c0_253] : memref<800x80xf32, #tpu.memory_space<vmem>>, vector<32x40xf32>
    tpu.vector_store %arg21[%c384_252, %c0_253], %295 {strides = array<i32>} : memref<800x80xf32, #tpu.memory_space<vmem>>, vector<32x40xf32>,
    %297 = vector.extract_strided_slice %246 {offsets = [0, 148], sizes = [32, 40], strides = [1, 1]} : vector<32x224xf32> to vector<32x40xf32>
    %c384_254 = arith.constant 384 : index
    %c40_255 = arith.constant 40 : index
    %298 = vector.load %arg21[%c384_254, %c40_255] : memref<800x80xf32, #tpu.memory_space<vmem>>, vector<32x40xf32>
    tpu.vector_store %arg21[%c384_254, %c40_255], %297 {strides = array<i32>} : memref<800x80xf32, #tpu.memory_space<vmem>>, vector<32x40xf32>,
    %299 = vector.extract_strided_slice %246 {offsets = [0, 39], sizes = [32, 40], strides = [1, 1]} : vector<32x224xf32> to vector<32x40xf32>
    %c416 = arith.constant 416 : index
    %c0_256 = arith.constant 0 : index
    %300 = vector.load %arg21[%c416, %c0_256] : memref<800x80xf32, #tpu.memory_space<vmem>>, vector<32x40xf32>
    tpu.vector_store %arg21[%c416, %c0_256], %299 {strides = array<i32>} : memref<800x80xf32, #tpu.memory_space<vmem>>, vector<32x40xf32>,
    %301 = vector.extract_strided_slice %246 {offsets = [0, 151], sizes = [32, 40], strides = [1, 1]} : vector<32x224xf32> to vector<32x40xf32>
    %c416_257 = arith.constant 416 : index
    %c40_258 = arith.constant 40 : index
    %302 = vector.load %arg21[%c416_257, %c40_258] : memref<800x80xf32, #tpu.memory_space<vmem>>, vector<32x40xf32>
    tpu.vector_store %arg21[%c416_257, %c40_258], %301 {strides = array<i32>} : memref<800x80xf32, #tpu.memory_space<vmem>>, vector<32x40xf32>,
    %303 = vector.extract_strided_slice %246 {offsets = [0, 42], sizes = [32, 40], strides = [1, 1]} : vector<32x224xf32> to vector<32x40xf32>
    %c448 = arith.constant 448 : index
    %c0_259 = arith.constant 0 : index
    %304 = vector.load %arg21[%c448, %c0_259] : memref<800x80xf32, #tpu.memory_space<vmem>>, vector<32x40xf32>
    tpu.vector_store %arg21[%c448, %c0_259], %303 {strides = array<i32>} : memref<800x80xf32, #tpu.memory_space<vmem>>, vector<32x40xf32>,
    %305 = vector.extract_strided_slice %246 {offsets = [0, 154], sizes = [32, 40], strides = [1, 1]} : vector<32x224xf32> to vector<32x40xf32>
    %c448_260 = arith.constant 448 : index
    %c40_261 = arith.constant 40 : index
    %306 = vector.load %arg21[%c448_260, %c40_261] : memref<800x80xf32, #tpu.memory_space<vmem>>, vector<32x40xf32>
    tpu.vector_store %arg21[%c448_260, %c40_261], %305 {strides = array<i32>} : memref<800x80xf32, #tpu.memory_space<vmem>>, vector<32x40xf32>,
    %307 = vector.extract_strided_slice %246 {offsets = [0, 45], sizes = [32, 40], strides = [1, 1]} : vector<32x224xf32> to vector<32x40xf32>
    %c480 = arith.constant 480 : index
    %c0_262 = arith.constant 0 : index
    %308 = vector.load %arg21[%c480, %c0_262] : memref<800x80xf32, #tpu.memory_space<vmem>>, vector<32x40xf32>
    tpu.vector_store %arg21[%c480, %c0_262], %307 {strides = array<i32>} : memref<800x80xf32, #tpu.memory_space<vmem>>, vector<32x40xf32>,
    %309 = vector.extract_strided_slice %246 {offsets = [0, 157], sizes = [32, 40], strides = [1, 1]} : vector<32x224xf32> to vector<32x40xf32>
    %c480_263 = arith.constant 480 : index
    %c40_264 = arith.constant 40 : index
    %310 = vector.load %arg21[%c480_263, %c40_264] : memref<800x80xf32, #tpu.memory_space<vmem>>, vector<32x40xf32>
    tpu.vector_store %arg21[%c480_263, %c40_264], %309 {strides = array<i32>} : memref<800x80xf32, #tpu.memory_space<vmem>>, vector<32x40xf32>,
    %311 = vector.extract_strided_slice %246 {offsets = [0, 48], sizes = [32, 40], strides = [1, 1]} : vector<32x224xf32> to vector<32x40xf32>
    %c512 = arith.constant 512 : index
    %c0_265 = arith.constant 0 : index
    %312 = vector.load %arg21[%c512, %c0_265] : memref<800x80xf32, #tpu.memory_space<vmem>>, vector<32x40xf32>
    tpu.vector_store %arg21[%c512, %c0_265], %311 {strides = array<i32>} : memref<800x80xf32, #tpu.memory_space<vmem>>, vector<32x40xf32>,
    %313 = vector.extract_strided_slice %246 {offsets = [0, 160], sizes = [32, 40], strides = [1, 1]} : vector<32x224xf32> to vector<32x40xf32>
    %c512_266 = arith.constant 512 : index
    %c40_267 = arith.constant 40 : index
    %314 = vector.load %arg21[%c512_266, %c40_267] : memref<800x80xf32, #tpu.memory_space<vmem>>, vector<32x40xf32>
    tpu.vector_store %arg21[%c512_266, %c40_267], %313 {strides = array<i32>} : memref<800x80xf32, #tpu.memory_space<vmem>>, vector<32x40xf32>,
    %315 = vector.extract_strided_slice %246 {offsets = [0, 51], sizes = [32, 40], strides = [1, 1]} : vector<32x224xf32> to vector<32x40xf32>
    %c544 = arith.constant 544 : index
    %c0_268 = arith.constant 0 : index
    %316 = vector.load %arg21[%c544, %c0_268] : memref<800x80xf32, #tpu.memory_space<vmem>>, vector<32x40xf32>
    tpu.vector_store %arg21[%c544, %c0_268], %315 {strides = array<i32>} : memref<800x80xf32, #tpu.memory_space<vmem>>, vector<32x40xf32>,
    %317 = vector.extract_strided_slice %246 {offsets = [0, 163], sizes = [32, 40], strides = [1, 1]} : vector<32x224xf32> to vector<32x40xf32>
    %c544_269 = arith.constant 544 : index
    %c40_270 = arith.constant 40 : index
    %318 = vector.load %arg21[%c544_269, %c40_270] : memref<800x80xf32, #tpu.memory_space<vmem>>, vector<32x40xf32>
    tpu.vector_store %arg21[%c544_269, %c40_270], %317 {strides = array<i32>} : memref<800x80xf32, #tpu.memory_space<vmem>>, vector<32x40xf32>,
    %319 = vector.extract_strided_slice %246 {offsets = [0, 54], sizes = [32, 40], strides = [1, 1]} : vector<32x224xf32> to vector<32x40xf32>
    %c576 = arith.constant 576 : index
    %c0_271 = arith.constant 0 : index
    %320 = vector.load %arg21[%c576, %c0_271] : memref<800x80xf32, #tpu.memory_space<vmem>>, vector<32x40xf32>
    tpu.vector_store %arg21[%c576, %c0_271], %319 {strides = array<i32>} : memref<800x80xf32, #tpu.memory_space<vmem>>, vector<32x40xf32>,
    %321 = vector.extract_strided_slice %246 {offsets = [0, 166], sizes = [32, 40], strides = [1, 1]} : vector<32x224xf32> to vector<32x40xf32>
    %c576_272 = arith.constant 576 : index
    %c40_273 = arith.constant 40 : index
    %322 = vector.load %arg21[%c576_272, %c40_273] : memref<800x80xf32, #tpu.memory_space<vmem>>, vector<32x40xf32>
    tpu.vector_store %arg21[%c576_272, %c40_273], %321 {strides = array<i32>} : memref<800x80xf32, #tpu.memory_space<vmem>>, vector<32x40xf32>,
    %323 = vector.extract_strided_slice %246 {offsets = [0, 57], sizes = [32, 40], strides = [1, 1]} : vector<32x224xf32> to vector<32x40xf32>
    %c608 = arith.constant 608 : index
    %c0_274 = arith.constant 0 : index
    %324 = vector.load %arg21[%c608, %c0_274] : memref<800x80xf32, #tpu.memory_space<vmem>>, vector<32x40xf32>
    tpu.vector_store %arg21[%c608, %c0_274], %323 {strides = array<i32>} : memref<800x80xf32, #tpu.memory_space<vmem>>, vector<32x40xf32>,
    %325 = vector.extract_strided_slice %246 {offsets = [0, 169], sizes = [32, 40], strides = [1, 1]} : vector<32x224xf32> to vector<32x40xf32>
    %c608_275 = arith.constant 608 : index
    %c40_276 = arith.constant 40 : index
    %326 = vector.load %arg21[%c608_275, %c40_276] : memref<800x80xf32, #tpu.memory_space<vmem>>, vector<32x40xf32>
    tpu.vector_store %arg21[%c608_275, %c40_276], %325 {strides = array<i32>} : memref<800x80xf32, #tpu.memory_space<vmem>>, vector<32x40xf32>,
    %327 = vector.extract_strided_slice %246 {offsets = [0, 60], sizes = [32, 40], strides = [1, 1]} : vector<32x224xf32> to vector<32x40xf32>
    %c640 = arith.constant 640 : index
    %c0_277 = arith.constant 0 : index
    %328 = vector.load %arg21[%c640, %c0_277] : memref<800x80xf32, #tpu.memory_space<vmem>>, vector<32x40xf32>
    tpu.vector_store %arg21[%c640, %c0_277], %327 {strides = array<i32>} : memref<800x80xf32, #tpu.memory_space<vmem>>, vector<32x40xf32>,
    %329 = vector.extract_strided_slice %246 {offsets = [0, 172], sizes = [32, 40], strides = [1, 1]} : vector<32x224xf32> to vector<32x40xf32>
    %c640_278 = arith.constant 640 : index
    %c40_279 = arith.constant 40 : index
    %330 = vector.load %arg21[%c640_278, %c40_279] : memref<800x80xf32, #tpu.memory_space<vmem>>, vector<32x40xf32>
    tpu.vector_store %arg21[%c640_278, %c40_279], %329 {strides = array<i32>} : memref<800x80xf32, #tpu.memory_space<vmem>>, vector<32x40xf32>,
    %331 = vector.extract_strided_slice %246 {offsets = [0, 63], sizes = [32, 40], strides = [1, 1]} : vector<32x224xf32> to vector<32x40xf32>
    %c672 = arith.constant 672 : index
    %c0_280 = arith.constant 0 : index
    %332 = vector.load %arg21[%c672, %c0_280] : memref<800x80xf32, #tpu.memory_space<vmem>>, vector<32x40xf32>
    tpu.vector_store %arg21[%c672, %c0_280], %331 {strides = array<i32>} : memref<800x80xf32, #tpu.memory_space<vmem>>, vector<32x40xf32>,
    %333 = vector.extract_strided_slice %246 {offsets = [0, 175], sizes = [32, 40], strides = [1, 1]} : vector<32x224xf32> to vector<32x40xf32>
    %c672_281 = arith.constant 672 : index
    %c40_282 = arith.constant 40 : index
    %334 = vector.load %arg21[%c672_281, %c40_282] : memref<800x80xf32, #tpu.memory_space<vmem>>, vector<32x40xf32>
    tpu.vector_store %arg21[%c672_281, %c40_282], %333 {strides = array<i32>} : memref<800x80xf32, #tpu.memory_space<vmem>>, vector<32x40xf32>,
    %335 = vector.extract_strided_slice %246 {offsets = [0, 66], sizes = [32, 40], strides = [1, 1]} : vector<32x224xf32> to vector<32x40xf32>
    %c704 = arith.constant 704 : index
    %c0_283 = arith.constant 0 : index
    %336 = vector.load %arg21[%c704, %c0_283] : memref<800x80xf32, #tpu.memory_space<vmem>>, vector<32x40xf32>
    tpu.vector_store %arg21[%c704, %c0_283], %335 {strides = array<i32>} : memref<800x80xf32, #tpu.memory_space<vmem>>, vector<32x40xf32>,
    %337 = vector.extract_strided_slice %246 {offsets = [0, 178], sizes = [32, 40], strides = [1, 1]} : vector<32x224xf32> to vector<32x40xf32>
    %c704_284 = arith.constant 704 : index
    %c40_285 = arith.constant 40 : index
    %338 = vector.load %arg21[%c704_284, %c40_285] : memref<800x80xf32, #tpu.memory_space<vmem>>, vector<32x40xf32>
    tpu.vector_store %arg21[%c704_284, %c40_285], %337 {strides = array<i32>} : memref<800x80xf32, #tpu.memory_space<vmem>>, vector<32x40xf32>,
    %339 = vector.extract_strided_slice %246 {offsets = [0, 69], sizes = [32, 40], strides = [1, 1]} : vector<32x224xf32> to vector<32x40xf32>
    %c736 = arith.constant 736 : index
    %c0_286 = arith.constant 0 : index
    %340 = vector.load %arg21[%c736, %c0_286] : memref<800x80xf32, #tpu.memory_space<vmem>>, vector<32x40xf32>
    tpu.vector_store %arg21[%c736, %c0_286], %339 {strides = array<i32>} : memref<800x80xf32, #tpu.memory_space<vmem>>, vector<32x40xf32>,
    %341 = vector.extract_strided_slice %246 {offsets = [0, 181], sizes = [32, 40], strides = [1, 1]} : vector<32x224xf32> to vector<32x40xf32>
    %c736_287 = arith.constant 736 : index
    %c40_288 = arith.constant 40 : index
    %342 = vector.load %arg21[%c736_287, %c40_288] : memref<800x80xf32, #tpu.memory_space<vmem>>, vector<32x40xf32>
    tpu.vector_store %arg21[%c736_287, %c40_288], %341 {strides = array<i32>} : memref<800x80xf32, #tpu.memory_space<vmem>>, vector<32x40xf32>,
    %343 = vector.extract_strided_slice %246 {offsets = [0, 72], sizes = [32, 40], strides = [1, 1]} : vector<32x224xf32> to vector<32x40xf32>
    %c768 = arith.constant 768 : index
    %c0_289 = arith.constant 0 : index
    %344 = vector.load %arg21[%c768, %c0_289] : memref<800x80xf32, #tpu.memory_space<vmem>>, vector<32x40xf32>
    tpu.vector_store %arg21[%c768, %c0_289], %343 {strides = array<i32>} : memref<800x80xf32, #tpu.memory_space<vmem>>, vector<32x40xf32>,
    %345 = vector.extract_strided_slice %246 {offsets = [0, 184], sizes = [32, 40], strides = [1, 1]} : vector<32x224xf32> to vector<32x40xf32>
    %c768_290 = arith.constant 768 : index
    %c40_291 = arith.constant 40 : index
    %346 = vector.load %arg21[%c768_290, %c40_291] : memref<800x80xf32, #tpu.memory_space<vmem>>, vector<32x40xf32>
    tpu.vector_store %arg21[%c768_290, %c40_291], %345 {strides = array<i32>} : memref<800x80xf32, #tpu.memory_space<vmem>>, vector<32x40xf32>,
    %c0_292 = arith.constant 0 : index
    %c0_293 = arith.constant 0 : index
    %347 = vector.load %arg13[%c0_292, %c0_293] : memref<64x800xf32, #tpu.memory_space<vmem>>, vector<64x800xf32>
    %c0_294 = arith.constant 0 : index
    %c0_295 = arith.constant 0 : index
    %348 = vector.load %arg21[%c0_294, %c0_295] : memref<800x80xf32, #tpu.memory_space<vmem>>, vector<800x80xf32>
    %cst_296 = arith.constant dense<0.000000e+00> : vector<64x80xf32>
    %349 = tpu.matmul %347, %348, %cst_296 {dimension_numbers = #tpu.dot_dimension_numbers<[1], [0], [0], [1], [0, 0, 1, 1], [], []>} : vector<64x800xf32>, vector<800x80xf32>, vector<64x80xf32> -> vector<64x80xf32>
    %c0_297 = arith.constant 0 : index
    %c0_298 = arith.constant 0 : index
    %350 = vector.load %arg14[%c0_297, %c0_298] : memref<64x1xf32, #tpu.memory_space<vmem>>, vector<64x1xf32>
    %351 = vector.broadcast %350 : vector<64x1xf32> to vector<64x80xf32>
    %352 = arith.addf %349, %351 : vector<64x80xf32>
    %cst_299 = arith.constant 0.000000e+00 : f32
    %353 = vector.broadcast %cst_299 : f32 to vector<64x80xf32>
    %354 = arith.maximumf %352, %353 : vector<64x80xf32>
    %c0_300 = arith.constant 0 : index
    %c0_301 = arith.constant 0 : index
    %355 = vector.load %arg2[%c0_300, %c0_301] : memref<80x12xf32, #tpu.memory_space<vmem>>, vector<80x12xf32>
    %cst_302 = arith.constant dense<0.000000e+00> : vector<64x12xf32>
    %356 = tpu.matmul %119, %355, %cst_302 {dimension_numbers = #tpu.dot_dimension_numbers<[1], [0], [0], [1], [0, 0, 1, 1], [], []>} : vector<64x80xf32>, vector<80x12xf32>, vector<64x12xf32> -> vector<64x12xf32>
    %c0_303 = arith.constant 0 : index
    %c0_304 = arith.constant 0 : index
    %357 = vector.load %arg3[%c0_303, %c0_304] : memref<80x12xf32, #tpu.memory_space<vmem>>, vector<80x12xf32>
    %cst_305 = arith.constant dense<0.000000e+00> : vector<64x12xf32>
    %358 = tpu.matmul %239, %357, %cst_305 {dimension_numbers = #tpu.dot_dimension_numbers<[1], [0], [0], [1], [0, 0, 1, 1], [], []>} : vector<64x80xf32>, vector<80x12xf32>, vector<64x12xf32> -> vector<64x12xf32>
    %359 = arith.addf %356, %358 : vector<64x12xf32>
    %c0_306 = arith.constant 0 : index
    %c0_307 = arith.constant 0 : index
    %360 = vector.load %arg4[%c0_306, %c0_307] : memref<80x12xf32, #tpu.memory_space<vmem>>, vector<80x12xf32>
    %cst_308 = arith.constant dense<0.000000e+00> : vector<64x12xf32>
    %361 = tpu.matmul %354, %360, %cst_308 {dimension_numbers = #tpu.dot_dimension_numbers<[1], [0], [0], [1], [0, 0, 1, 1], [], []>} : vector<64x80xf32>, vector<80x12xf32>, vector<64x12xf32> -> vector<64x12xf32>
    %362 = arith.addf %359, %361 : vector<64x12xf32>
    %363 = vector.extract_strided_slice %362 {offsets = [0, 0], sizes = [64, 6], strides = [1, 1]} : vector<64x12xf32> to vector<64x6xf32>
    %c0_309 = arith.constant 0 : index
    %c0_310 = arith.constant 0 : index
    %364 = vector.load %arg15[%c0_309, %c0_310] : memref<128x6xf32, #tpu.memory_space<vmem>>, vector<64x6xf32>
    tpu.vector_store %arg15[%c0_309, %c0_310], %363 {strides = array<i32>} : memref<128x6xf32, #tpu.memory_space<vmem>>, vector<64x6xf32>,
    %365 = vector.extract_strided_slice %362 {offsets = [0, 6], sizes = [64, 6], strides = [1, 1]} : vector<64x12xf32> to vector<64x6xf32>
    %c64_311 = arith.constant 64 : index
    %c0_312 = arith.constant 0 : index
    %366 = vector.load %arg15[%c64_311, %c0_312] : memref<128x6xf32, #tpu.memory_space<vmem>>, vector<64x6xf32>
    tpu.vector_store %arg15[%c64_311, %c0_312], %365 {strides = array<i32>} : memref<128x6xf32, #tpu.memory_space<vmem>>, vector<64x6xf32>,
    return
  }
  func.func @transform_0(%arg0: i32) -> (i32, i32) {
    %c0_i32 = arith.constant 0 : i32
    %c0_i32_0 = arith.constant 0 : i32
    %c0_i32_1 = arith.constant 0 : i32
    return %c0_i32, %c0_i32_0 : i32, i32
  }
  func.func @transform_1(%arg0: i32) -> (i32, i32) {
    %c0_i32 = arith.constant 0 : i32
    %c0_i32_0 = arith.constant 0 : i32
    %c0_i32_1 = arith.constant 0 : i32
    return %c0_i32, %c0_i32_0 : i32, i32
  }
  func.func @transform_2(%arg0: i32) -> (i32, i32) {
    %c0_i32 = arith.constant 0 : i32
    %c0_i32_0 = arith.constant 0 : i32
    %c0_i32_1 = arith.constant 0 : i32
    return %c0_i32, %c0_i32_0 : i32, i32
  }
  func.func @transform_3(%arg0: i32) -> (i32, i32) {
    %c0_i32 = arith.constant 0 : i32
    %c0_i32_0 = arith.constant 0 : i32
    %c0_i32_1 = arith.constant 0 : i32
    return %c0_i32, %c0_i32_0 : i32, i32
  }
  func.func @transform_4(%arg0: i32) -> (i32, i32) {
    %c0_i32 = arith.constant 0 : i32
    %c0_i32_0 = arith.constant 0 : i32
    %c0_i32_1 = arith.constant 0 : i32
    return %c0_i32, %c0_i32_0 : i32, i32
  }
  func.func @transform_5(%arg0: i32) -> (i32, i32) {
    %c0_i32 = arith.constant 0 : i32
    %c0_i32_0 = arith.constant 0 : i32
    %c0_i32_1 = arith.constant 0 : i32
    return %c0_i32, %c0_i32_0 : i32, i32
  }
  func.func @transform_6(%arg0: i32) -> (i32, i32) {
    %c0_i32 = arith.constant 0 : i32
    %c0_i32_0 = arith.constant 0 : i32
    %c0_i32_1 = arith.constant 0 : i32
    return %c0_i32, %c0_i32_0 : i32, i32
  }
  func.func @transform_7(%arg0: i32) -> (i32, i32) {
    %c0_i32 = arith.constant 0 : i32
    %c0_i32_0 = arith.constant 0 : i32
    %c0_i32_1 = arith.constant 0 : i32
    return %c0_i32, %c0_i32_0 : i32, i32
  }
  func.func @transform_8(%arg0: i32) -> (i32, i32) {
    %c0_i32 = arith.constant 0 : i32
    %c0_i32_0 = arith.constant 0 : i32
    %c0_i32_1 = arith.constant 0 : i32
    return %c0_i32, %c0_i32_0 : i32, i32
  }
  func.func @transform_9(%arg0: i32) -> (i32, i32) {
    %c0_i32 = arith.constant 0 : i32
    %c0_i32_0 = arith.constant 0 : i32
    %c0_i32_1 = arith.constant 0 : i32
    return %c0_i32, %c0_i32_0 : i32, i32
  }
  func.func @transform_10(%arg0: i32) -> (i32, i32) {
    %c0_i32 = arith.constant 0 : i32
    %c0_i32_0 = arith.constant 0 : i32
    %c0_i32_1 = arith.constant 0 : i32
    return %c0_i32, %c0_i32_0 : i32, i32
  }
  func.func @transform_11(%arg0: i32) -> (i32, i32) {
    %c0_i32 = arith.constant 0 : i32
    %c0_i32_0 = arith.constant 0 : i32
    %c0_i32_1 = arith.constant 0 : i32
    return %c0_i32, %c0_i32_0 : i32, i32
  }
  func.func @transform_12(%arg0: i32) -> (i32, i32) {
    %c0_i32 = arith.constant 0 : i32
    %c0_i32_0 = arith.constant 0 : i32
    %c0_i32_1 = arith.constant 0 : i32
    return %c0_i32, %c0_i32_0 : i32, i32
  }
  func.func @transform_13(%arg0: i32) -> (i32, i32) {
    %c0_i32 = arith.constant 0 : i32
    %c0_i32_0 = arith.constant 0 : i32
    %c0_i32_1 = arith.constant 0 : i32
    return %c0_i32, %c0_i32_0 : i32, i32
  }
  func.func @transform_14(%arg0: i32) -> (i32, i32) {
    %c0_i32 = arith.constant 0 : i32
    %c0_i32_0 = arith.constant 0 : i32
    %c0_i32_1 = arith.constant 0 : i32
    return %c0_i32, %c0_i32_0 : i32, i32
  }
}

</mosaic_0001>

<bundles_post_ra>
// kernel: conv1dnet_forward.1
= control target key start
LH: loop header
LB: loop body
LE: loop exit
PB: predicated region body
PF: predicated region fallthrough
CT: control target
= control target key end

     0   :  { %s5522_s0 = inlined_call_operand.vmem [shape: f32[1,80], index: 0, kind: input, shape index: {}]   ;;  %s5523_s1 = inlined_call_operand.hbm [shape: f32[80,12], index: 1, kind: input, shape index: {}]   ;;  %s5524_s2 = inlined_call_operand.vmem [shape: f32[80,12], index: 2, kind: input, shape index: {}]   ;;  %s5525_s3 = inlined_call_operand.vmem [shape: f32[80,12], index: 3, kind: input, shape index: {}]   ;;  %s5526_s4 = inlined_call_operand.vmem [shape: f32[16,25], index: 4, kind: input, shape index: {}]   ;;  %s5527_s5 = inlined_call_operand.vmem [shape: f32[16,1], index: 5, kind: input, shape index: {}]   ;;  %s5528_s6 = inlined_call_operand.vmem [shape: f32[64,16], index: 6, kind: input, shape index: {}]   ;;  %s5529_s7 = inlined_call_operand.vmem [shape: f32[64,1], index: 7, kind: input, shape index: {}]   ;;  %s5530_s8 = inlined_call_operand.vmem [shape: f32[32,400], index: 8, kind: input, shape index: {}]   ;;  %s5531_s9 = inlined_call_operand.vmem [shape: f32[32,1], index: 9, kind: input, shape index: {}]   ;;  %s5532_s10 = inlined_call_operand.vmem [shape: f32[64,32], index: 10, kind: input, shape index: {}]   ;;  %s5533_s11 = inlined_call_operand.vmem [shape: f32[64,1], index: 11, kind: input, shape index: {}]   ;;  %s5534_s12 = inlined_call_operand.hbm [shape: f32[64,800], index: 12, kind: input, shape index: {}]   ;;  %s5535_s13 = inlined_call_operand.vmem [shape: f32[64,1], index: 13, kind: input, shape index: {}]   ;;  %s5536_s14 = inlined_call_operand.vmem [shape: f32[128,6], index: 14, kind: output, shape index: {}]  }
   0x1   :  { %5657 = sst [smem:[#allocation18_spill]] %s5524_s2 }
   0x2   :  { %5658 = sst [smem:[#allocation19_spill]] %s5525_s3 }
   0x3   :  { %5659 = sst [smem:[#allocation20_spill]] %s5535_s13 }
   0x4   :  { %5660 = sst [smem:[#allocation21_spill]] %s5536_s14 }
   0x5   :  { %19 = vsyncpa [#allocation9], 0  ;;  %s27_s15 = sshll.u32 %s5523_s1, 4  ;;  %s28_s15 = int_to_ptr.hbm [resolvable:$true] %s27_s15 }
   0x6   :  { %20 = vsyncpa [#allocation11], 0  ;;  %s3330_s16 = smov [#allocation8]   ;;  %s60_s20 = sshll.u32 %s5534_s12, 4  ;;  %s61_s20 = int_to_ptr.hbm [resolvable:$true] %s60_s20 }
   0x7   :  { %s29_s17 = sshll.u32 %s3330_s16, 4  ;;  %s3331_s21 = smov 128   ;;  %s30_s17 = int_to_ptr.vmem [resolvable:$true] %s29_s17 }
   0x8   :  { %s5537_s22 = smov 8   ;;  %s3333_s23 = smov [#allocation10]  }
   0x9   :  { %35 = dma.hbm_to_vmem [thread:$0]  %s28_s15, 1280, %s30_s17, [#allocation9], %s3331_s21, %s3331_s21, %s5537_s22  }
   0xa   :  { %s62_s24 = sshll.u32 %s3333_s23, 4  ;;  %s3334_s25 = smov 896   ;;  %s63_s24 = int_to_ptr.vmem [resolvable:$true] %s62_s24 }
   0xb   :  { %s5599_s26 = smov 56  }
   0xc   :  { %68 = dma.hbm_to_vmem [thread:$0]  %s61_s20, 7168, %s63_s24, [#allocation11], %s3334_s25, %s3334_s25, %s5599_s26  }
   0xd   :  { %3326 = dma.done.wait [#allocation9], 1280  }
   0xe   :  { %3327 = vsyncadd [#allocation9], 4294966016 }
   0xf   :  { %3328 = dma.done.wait [#allocation11], 7168  }
  0x10   :  { %3329 = vsyncadd [#allocation11], 4294960128  ;;  %v3336_v0 = vmov 0.0   ;;  %v3271_v1 = vld [vmem:[%s5522_s0] ss:$0 sm:$0xff]  ;;  %s3337_s27 = smov 12  }
  0x11   :  { %79 = vst [vmem:[#allocation2] sm:$0x1] %v3336_v0  ;;  %83 = vrot.lane.b32.xlu0 %v3271_v1, %s3337_s27  ;;  %v3272_v2 = vld [vmem:[%s5522_s0] ss:$0 sm:$0xff]  ;;  %s5595_s30 = smov 36   ;;  %v3339_v3 = vmov 0  }
  0x12   :  { %471 = vst [vmem:[#allocation4] sm:$0xff] %v3336_v0  ;;  %3268 = vset.pattern.permute.xlu2 %v3339_v3  ;;  %v301_v4 = vld [vmem:[%s5527_s5] sm:$0xff]  ;;  %3270 = vset.pattern.permute.xlu1 %v3339_v3  ;;  %vm86_vm0 = vcmask 417888   ;;  %vm94_vm1 = vcmask 942688   ;;  %vm97_vm2 = vcmask 319488   ;;  %s5571_s0 = smov 102  }
  0x13   :  { %474 = vst [vmem:[#allocation4 + $0x10] sm:$0xff] %v3336_v0  ;;  %305 = vperm.xlu2 %3268, %v301_v4   ;;  %3269 = vset.pattern.permute.xlu0 %v3339_v3  ;;  %s3341_s17 = smov 103   ;;  %s5573_s18 = smov 104   ;;  %vm104_vm3 = vcmask 647488   ;;  %v358_v19 = vld [vmem:[%s5529_s7 + $0x8] sm:$0xff]  ;;  %v357_v20 = vld [vmem:[%s5529_s7] sm:$0xff] }
  0x14   :  { %1373 = vst [vmem:[#allocation6] sm:$0xff] %v3336_v0  ;;  %s5613_s19 = smov 124   ;;  %s3344_s20 = smov 126   ;;  %v360_v24 = vld [vmem:[%s5529_s7 + $0x18] sm:$0xff]  ;;  %v363_v28 = vld [vmem:[%s5529_s7 + $0x30] sm:$0xff]  ;;  %v1096_v33 = vld [vmem:[%s5531_s9 + $0x8] sm:$0xff] }
  0x15   :  { %1376 = vst [vmem:[#allocation6 + $0x10] sm:$0xff] %v3336_v0  ;;  %s5541_s21 = smov 127   ;;  %s3346_s23 = smov 99   ;;  %v359_v29 = vld [vmem:[%s5529_s7 + $0x10] sm:$0xff]  ;;  %v362_v34 = vld [vmem:[%s5529_s7 + $0x28] sm:$0xff]  ;;  %v1095_v38 = vld [vmem:[%s5531_s9] sm:$0xff] }
  0x16   :  { %1378 = vst [vmem:[#allocation6 + $0x20] sm:$0xff] %v3336_v0  ;;  %s5543_s24 = smov 101   ;;  %s5545_s25 = smov 125   ;;  %v302_v3 = vld [vmem:[%s5527_s5 + $0x8] sm:$0xff]  ;;  %v361_v4 = vld [vmem:[%s5529_s7 + $0x20] sm:$0xff]  ;;  %vm320_vm4 = vcmask 1040384  }
  0x17   :  { %1380 = vst [vmem:[#allocation6 + $0x30] sm:$0xff] %v3336_v0  ;;  %s5539_s1 = smov 121   ;;  %s3350_s12 = smov 123   ;;  %vm313_vm5 = vcmask 203776   ;;  %vm472_vm6 = vcmask 392192   ;;  %vm405_vm7 = vcmask 130048  }
  0x18   :  { %s5569_s27 = smov 100   ;;  %s5559_s28 = smov 96   ;;  %473 = vst.msk [vmem:[#allocation4 + $0x8] sm:$0xff] %vm472_vm6, %v3336_v0  ;;  %vm495_vm8 = vcmask 195584   ;;  %vm484_vm9 = vcmask 523456   ;;  %vm493_vm10 = vcmask 1048448  }
  0x19   :  { %91 = vrot.lane.b32.xlu0 %v3272_v2, %s5595_s30  ;;  %s5561_s29 = smov 98   ;;  %s5641_s15 = smov 122   ;;  %475 = vst.msk [vmem:[#allocation4 + $0x18] sm:$0xff] %vm472_vm6, %v3336_v0  ;;  %v350_v0 = vld [vmem:[%s5528_s6 + $0x8] sm:$0xff]  ;;  %vm503_vm11 = vcmask 326656   ;;  %vm514_vm12 = vcmask 654656  }
  0x1a   :  { %s5617_s16 = smov 118   ;;  %s5547_s22 = smov 95   ;;  %vm535_vm13 = vcmask 637952   ;;  %vm558_vm14 = vcmask 621568   ;;  %vm581_vm15 = vcmask 605184  }
  0x1b   :  { %s3394_s5 = smov 76   ;;  %s5707_s14 = smov 44  }
  0x1c   :  { %s5709_s3 = smov 59   ;;  %s5710_s2 = smov 53  }
  0x1d   :  { %s5711_s13 = smov 11  }
  0x6d   :  { %v3587_v9 = vpop.permute.xlu2 %305 }
  0x83   :  { %v84_v5 = vpop.permute.xlu0 %83 }
  0x84   :  { %87 = vst.msk [vmem:[#allocation2] sm:$0x1] %vm86_vm0, %v84_v5  ;;  %vm604_vm0 = vcmask 588800  }
  0x8b   :  { %v92_v6 = vpop.permute.xlu0 %91 }
  0x8c   :  { %95 = vst.msk [vmem:[#allocation2] sm:$0x1] %vm94_vm1, %v92_v6  ;;  %v364_v6 = vld [vmem:[%s5529_s7 + $0x38] sm:$0xff]  ;;  %s3388_s7 = smov 72   ;;  %vm627_vm1 = vcmask 572416  }
  0x93   :  { %v96_v7 = vld [vmem:[#allocation2] sm:$0x1] }
  0x94   :  { %v3528_v8 = vld [vmem:[#allocation2] ss:$0 sm:$0xff]  ;;  %98 = vst.msk [vmem:[#allocation3] sm:$0x1] %vm97_vm2, %v96_v7 }
  0x95   :  { %118 = vrot.lane.b32.xlu0 %v3528_v8, %s5571_s0  ;;  %110 = vrot.lane.b32.xlu2 %v3528_v8, %s3341_s17  ;;  %s3356_s17 = smov 120   ;;  %s5575_s0 = smov 83  }
  0x96   :  { %101 = vrot.lane.b32.xlu1 %v3528_v8, %s5573_s18  ;;  %s5577_s18 = smov 107  }
  0x9d   :  { %130 = vrot.lane.b32.xlu0 %v3528_v8, %s5613_s19  ;;  %114 = vrot.lane.b32.xlu2 %v3528_v8, %s3344_s20 }
  0x9e   :  { %106 = vrot.lane.b32.xlu1 %v3528_v8, %s5541_s21  ;;  %s5549_s21 = smov 115  }
  0xa5   :  { %142 = vrot.lane.b32.xlu0 %v3528_v8, %s3346_s23  ;;  %126 = vrot.lane.b32.xlu2 %v3528_v8, %s5543_s24  ;;  %s3357_s23 = smov 97   ;;  %s3362_s24 = smov 117  }
  0xa6   :  { %122 = vrot.lane.b32.xlu1 %v3528_v8, %s5545_s25  ;;  %s5555_s25 = smov 94  }
  0xad   :  { %154 = vrot.lane.b32.xlu0 %v3528_v8, %s5539_s1  ;;  %138 = vrot.lane.b32.xlu2 %v3528_v8, %s3350_s12  ;;  %s3358_s12 = smov 93   ;;  %s5551_s1 = smov 119  }
  0xae   :  { %134 = vrot.lane.b32.xlu1 %v3528_v8, %s5569_s27  ;;  %s3382_s27 = smov 81  }
  0xb5   :  { %166 = vrot.lane.b32.xlu0 %v3528_v8, %s5559_s28  ;;  %150 = vrot.lane.b32.xlu2 %v3528_v8, %s5561_s29  ;;  %s3373_s28 = smov 109   ;;  %s3374_s29 = smov 111  }
  0xb6   :  { %146 = vrot.lane.b32.xlu1 %v3528_v8, %s5641_s15 }
  0xbd   :  { %178 = vrot.lane.b32.xlu0 %v3528_v8, %s5617_s16  ;;  %162 = vrot.lane.b32.xlu2 %v3528_v8, %s3356_s17 }
  0xbe   :  { %158 = vrot.lane.b32.xlu1 %v3528_v8, %s3357_s23  ;;  %s5553_s23 = smov 90  }
  0xc5   :  { %190 = vrot.lane.b32.xlu0 %v3528_v8, %s3358_s12  ;;  %174 = vrot.lane.b32.xlu2 %v3528_v8, %s5547_s22  ;;  %s5557_s12 = smov 92   ;;  %s5625_s22 = smov 116  }
  0xc6   :  { %170 = vrot.lane.b32.xlu1 %v3528_v8, %s5551_s1  ;;  %s3369_s1 = smov 91  }
  0xcd   :  { %202 = vrot.lane.b32.xlu0 %v3528_v8, %s5549_s21  ;;  %186 = vrot.lane.b32.xlu2 %v3528_v8, %s3362_s24  ;;  %s5615_s21 = smov 112   ;;  %s3368_s24 = smov 114  }
  0xce   :  { %182 = vrot.lane.b32.xlu1 %v3528_v8, %s5555_s25  ;;  %s5563_s25 = smov 89  }
  0xd5   :  { %214 = vrot.lane.b32.xlu0 %v3528_v8, %s5553_s23  ;;  %198 = vrot.lane.b32.xlu2 %v3528_v8, %s5557_s12  ;;  %s3370_s23 = smov 87   ;;  %s5565_s12 = smov 113  }
  0xd6   :  { %194 = vrot.lane.b32.xlu1 %v3528_v8, %s5625_s22 }
  0xdd   :  { %226 = vrot.lane.b32.xlu0 %v3528_v8, %s5615_s21  ;;  %210 = vrot.lane.b32.xlu2 %v3528_v8, %s3368_s24 }
  0xde   :  { %206 = vrot.lane.b32.xlu1 %v3528_v8, %s3369_s1  ;;  %s5567_s1 = smov 88  }
  0xe5   :  { %238 = vrot.lane.b32.xlu0 %v3528_v8, %s3370_s23  ;;  %222 = vrot.lane.b32.xlu2 %v3528_v8, %s5563_s25  ;;  %s3376_s23 = smov 84   ;;  %s5587_s25 = smov 86  }
  0xe6   :  { %218 = vrot.lane.b32.xlu1 %v3528_v8, %s5565_s12  ;;  %s5585_s12 = smov 110  }
  0xed   :  { %250 = vrot.lane.b32.xlu0 %v3528_v8, %s3373_s28  ;;  %234 = vrot.lane.b32.xlu2 %v3528_v8, %s3374_s29  ;;  %s5579_s28 = smov 106   ;;  %s5581_s29 = smov 108  }
  0xee   :  { %230 = vrot.lane.b32.xlu1 %v3528_v8, %s5567_s1  ;;  %s3381_s1 = smov 85  }
  0xef   :  { %v111_v10 = vpop.permute.xlu2 %110 }
  0xf5   :  { %262 = vrot.lane.b32.xlu0 %v3528_v8, %s3376_s23  ;;  %246 = vrot.lane.b32.xlu2 %v3528_v8, %s5587_s25 }
  0xf6   :  { %242 = vrot.lane.b32.xlu1 %v3528_v8, %s5585_s12  ;;  %s5621_s12 = smov 74  }
  0xf7   :  { %v115_v11 = vpop.permute.xlu2 %114 }
  0xf8   :  { %117 = vst.msk [vmem:[#allocation3 + $0x2] sm:$0x1] %vm97_vm2, %v115_v11  ;;  %v295_v11 = vld [vmem:[%s5526_s4] sm:$0xff] }
  0xfd   :  { %274 = vrot.lane.b32.xlu0 %v3528_v8, %s5579_s28  ;;  %258 = vrot.lane.b32.xlu2 %v3528_v8, %s5581_s29  ;;  %s3389_s28 = smov 24   ;;  %s3391_s29 = smov 78  }
  0xfe   :  { %254 = vrot.lane.b32.xlu1 %v3528_v8, %s3381_s1  ;;  %s5583_s1 = smov 82  }
  0xff   :  { %v127_v12 = vpop.permute.xlu2 %126 }
 0x105   :  { %286 = vrot.lane.b32.xlu0 %v3528_v8, %s3382_s27  ;;  %270 = vrot.lane.b32.xlu2 %v3528_v8, %s5575_s0  ;;  %s3385_s27 = smov 105   ;;  %s5589_s0 = smov 80  }
 0x106   :  { %266 = vrot.lane.b32.xlu1 %v3528_v8, %s5577_s18  ;;  %s3397_s18 = smov 70  }
 0x107   :  { %v119_v13 = vpop.permute.xlu0 %118  ;;  %v139_v14 = vpop.permute.xlu2 %138 }
 0x108   :  { %121 = vst.msk [vmem:[#allocation3 + $0x2] sm:$0x1] %vm104_vm3, %v119_v13  ;;  %v102_v15 = vpop.permute.xlu1 %101  ;;  %v296_v13 = vld [vmem:[%s5526_s4 + $0x8] sm:$0xff]  ;;  %s5611_s4 = smov 68  }
 0x109   :  { %141 = vst.msk [vmem:[#allocation3 + $0x5] sm:$0x1] %vm97_vm2, %v139_v14 }
 0x10a   :  { %105 = vst.msk [vmem:[#allocation3] sm:$0x1] %vm104_vm3, %v102_v15 }
 0x10b   :  { %290 = vst.msk [vmem:[#allocation3 + $0x18] sm:$0x1] %vm97_vm2, %v102_v15 }
 0x10d   :  { %282 = vrot.lane.b32.xlu2 %v3528_v8, %s3385_s27  ;;  %310 = vperm.xlu0 %3269, %v302_v3   ;;  %s5609_s27 = smov 38  }
 0x10e   :  { %278 = vrot.lane.b32.xlu1 %v3528_v8, %s5583_s1  ;;  %s5591_s1 = smov 34  }
 0x10f   :  { %v131_v16 = vpop.permute.xlu0 %130  ;;  %v151_v17 = vpop.permute.xlu2 %150 }
 0x110   :  { %133 = vst.msk [vmem:[#allocation3 + $0x4] sm:$0x1] %vm97_vm2, %v131_v16  ;;  %v107_v18 = vpop.permute.xlu1 %106 }
 0x111   :  { %109 = vst.msk [vmem:[#allocation3 + $0x1] sm:$0x1] %vm97_vm2, %v107_v18 }
 0x112   :  { %113 = vst.msk [vmem:[#allocation3 + $0x1] sm:$0x1] %vm104_vm3, %v111_v10 }
 0x115   :  { %372 = vperm.xlu2 %3268, %v358_v19   ;;  %387 = vperm.xlu0 %3269, %v361_v4  }
 0x116   :  { %367 = vperm.xlu1 %3270, %v357_v20  }
 0x117   :  { %v143_v21 = vpop.permute.xlu0 %142  ;;  %v163_v22 = vpop.permute.xlu2 %162 }
 0x118   :  { %145 = vst.msk [vmem:[#allocation3 + $0x5] sm:$0x1] %vm104_vm3, %v143_v21  ;;  %v123_v23 = vpop.permute.xlu1 %122  ;;  %v353_v21 = vld [vmem:[%s5528_s6 + $0x20] sm:$0xff] }
 0x119   :  { %165 = vst.msk [vmem:[#allocation3 + $0x8] sm:$0x1] %vm97_vm2, %v163_v22  ;;  %v354_v22 = vld [vmem:[%s5528_s6 + $0x28] sm:$0xff] }
 0x11a   :  { %125 = vst.msk [vmem:[#allocation3 + $0x3] sm:$0x1] %vm97_vm2, %v123_v23  ;;  %v351_v23 = vld [vmem:[%s5528_s6 + $0x10] sm:$0xff] }
 0x11b   :  { %129 = vst.msk [vmem:[#allocation3 + $0x3] sm:$0x1] %vm104_vm3, %v127_v12 }
 0x11d   :  { %382 = vperm.xlu2 %3268, %v360_v24   ;;  %402 = vperm.xlu0 %3269, %v364_v6   ;;  %v355_v24 = vld [vmem:[%s5528_s6 + $0x30] sm:$0xff] }
 0x11e   :  { %291 = vrot.lane.b32.xlu1 %v3528_v8, %s5589_s0 }
 0x11f   :  { %v155_v25 = vpop.permute.xlu0 %154  ;;  %v175_v26 = vpop.permute.xlu2 %174 }
 0x120   :  { %157 = vst.msk [vmem:[#allocation3 + $0x7] sm:$0x1] %vm97_vm2, %v155_v25  ;;  %v135_v27 = vpop.permute.xlu1 %134  ;;  %v352_v25 = vld [vmem:[%s5528_s6 + $0x18] sm:$0xff] }
 0x121   :  { %137 = vst.msk [vmem:[#allocation3 + $0x4] sm:$0x1] %vm104_vm3, %v135_v27 }
 0x125   :  { %397 = vperm.xlu2 %3268, %v363_v28  }
 0x126   :  { %377 = vperm.xlu1 %3270, %v359_v29  }
 0x127   :  { %v167_v30 = vpop.permute.xlu0 %166  ;;  %v187_v31 = vpop.permute.xlu2 %186 }
 0x128   :  { %169 = vst.msk [vmem:[#allocation3 + $0x8] sm:$0x1] %vm104_vm3, %v167_v30  ;;  %v147_v32 = vpop.permute.xlu1 %146 }
 0x129   :  { %189 = vst.msk [vmem:[#allocation3 + $0xb] sm:$0x1] %vm97_vm2, %v187_v31 }
 0x12a   :  { %149 = vst.msk [vmem:[#allocation3 + $0x6] sm:$0x1] %vm97_vm2, %v147_v32 }
 0x12b   :  { %153 = vst.msk [vmem:[#allocation3 + $0x6] sm:$0x1] %vm104_vm3, %v151_v17 }
 0x12d   :  { %1106 = vperm.xlu2 %3268, %v1096_v33  }
 0x12e   :  { %392 = vperm.xlu1 %3270, %v362_v34  }
 0x12f   :  { %v179_v35 = vpop.permute.xlu0 %178  ;;  %v199_v36 = vpop.permute.xlu2 %198 }
 0x130   :  { %181 = vst.msk [vmem:[#allocation3 + $0xa] sm:$0x1] %vm97_vm2, %v179_v35  ;;  %v159_v37 = vpop.permute.xlu1 %158 }
 0x131   :  { %161 = vst.msk [vmem:[#allocation3 + $0x7] sm:$0x1] %vm104_vm3, %v159_v37 }
 0x136   :  { %1101 = vperm.xlu1 %3270, %v1095_v38  }
 0x137   :  { %v191_v39 = vpop.permute.xlu0 %190  ;;  %v211_v40 = vpop.permute.xlu2 %210 }
 0x138   :  { %193 = vst.msk [vmem:[#allocation3 + $0xb] sm:$0x1] %vm104_vm3, %v191_v39  ;;  %v171_v41 = vpop.permute.xlu1 %170  ;;  %v297_v12 = vld [vmem:[#allocation3] sm:$0xff] }
 0x139   :  { %213 = vst.msk [vmem:[#allocation3 + $0xe] sm:$0x1] %vm97_vm2, %v211_v40 }
 0x13a   :  { %173 = vst.msk [vmem:[#allocation3 + $0x9] sm:$0x1] %vm97_vm2, %v171_v41 }
 0x13b   :  { %177 = vst.msk [vmem:[#allocation3 + $0x9] sm:$0x1] %vm104_vm3, %v175_v26  ;;  %v356_v26 = vld [vmem:[%s5528_s6 + $0x38] sm:$0xff] }
 0x13f   :  { %v203_v42 = vpop.permute.xlu0 %202  ;;  %v223_v43 = vpop.permute.xlu2 %222 }
 0x140   :  { %205 = vst.msk [vmem:[#allocation3 + $0xd] sm:$0x1] %vm97_vm2, %v203_v42  ;;  %v183_v44 = vpop.permute.xlu1 %182 }
 0x141   :  { %185 = vst.msk [vmem:[#allocation3 + $0xa] sm:$0x1] %vm104_vm3, %v183_v44 }
 0x147   :  { %v215_v45 = vpop.permute.xlu0 %214  ;;  %v235_v46 = vpop.permute.xlu2 %234 }
 0x148   :  { %217 = vst.msk [vmem:[#allocation3 + $0xe] sm:$0x1] %vm104_vm3, %v215_v45  ;;  %v195_v47 = vpop.permute.xlu1 %194 }
 0x149   :  { %237 = vst.msk [vmem:[#allocation3 + $0x11] sm:$0x1] %vm97_vm2, %v235_v46 }
 0x14a   :  { %197 = vst.msk [vmem:[#allocation3 + $0xc] sm:$0x1] %vm97_vm2, %v195_v47 }
 0x14b   :  { %201 = vst.msk [vmem:[#allocation3 + $0xc] sm:$0x1] %vm104_vm3, %v199_v36 }
 0x14f   :  { %v227_v48 = vpop.permute.xlu0 %226  ;;  %v247_v49 = vpop.permute.xlu2 %246 }
 0x150   :  { %229 = vst.msk [vmem:[#allocation3 + $0x10] sm:$0x1] %vm97_vm2, %v227_v48  ;;  %v207_v50 = vpop.permute.xlu1 %206 }
 0x151   :  { %209 = vst.msk [vmem:[#allocation3 + $0xd] sm:$0x1] %vm104_vm3, %v207_v50 }
 0x157   :  { %v239_v51 = vpop.permute.xlu0 %238  ;;  %v259_v52 = vpop.permute.xlu2 %258 }
 0x158   :  { %241 = vst.msk [vmem:[#allocation3 + $0x11] sm:$0x1] %vm104_vm3, %v239_v51  ;;  %v219_v53 = vpop.permute.xlu1 %218 }
 0x159   :  { %261 = vst.msk [vmem:[#allocation3 + $0x14] sm:$0x1] %vm97_vm2, %v259_v52 }
 0x15a   :  { %221 = vst.msk [vmem:[#allocation3 + $0xf] sm:$0x1] %vm97_vm2, %v219_v53 }
 0x15b   :  { %225 = vst.msk [vmem:[#allocation3 + $0xf] sm:$0x1] %vm104_vm3, %v223_v43 }
 0x15f   :  { %v251_v54 = vpop.permute.xlu0 %250  ;;  %v271_v55 = vpop.permute.xlu2 %270 }
 0x160   :  { %253 = vst.msk [vmem:[#allocation3 + $0x13] sm:$0x1] %vm97_vm2, %v251_v54  ;;  %v231_v56 = vpop.permute.xlu1 %230 }
 0x161   :  { %233 = vst.msk [vmem:[#allocation3 + $0x10] sm:$0x1] %vm104_vm3, %v231_v56 }
 0x162   :  { %v298_v10 = vld [vmem:[#allocation3 + $0x8] sm:$0xff] }
 0x167   :  { %v263_v57 = vpop.permute.xlu0 %262  ;;  %v283_v58 = vpop.permute.xlu2 %282 }
 0x168   :  { %265 = vst.msk [vmem:[#allocation3 + $0x14] sm:$0x1] %vm104_vm3, %v263_v57  ;;  %v243_v59 = vpop.permute.xlu1 %242 }
 0x169   :  { %285 = vst.msk [vmem:[#allocation3 + $0x17] sm:$0x1] %vm97_vm2, %v283_v58 }
 0x16a   :  { %245 = vst.msk [vmem:[#allocation3 + $0x12] sm:$0x1] %vm97_vm2, %v243_v59 }
 0x16b   :  { %249 = vst.msk [vmem:[#allocation3 + $0x12] sm:$0x1] %vm104_vm3, %v247_v49 }
 0x16f   :  { %v275_v60 = vpop.permute.xlu0 %274  ;;  %v3745_v27 = vpop.permute.xlu2 %372 }
 0x170   :  { %277 = vst.msk [vmem:[#allocation3 + $0x16] sm:$0x1] %vm97_vm2, %v275_v60  ;;  %v255_v61 = vpop.permute.xlu1 %254 }
 0x171   :  { %257 = vst.msk [vmem:[#allocation3 + $0x13] sm:$0x1] %vm104_vm3, %v255_v61 }
 0x177   :  { %v287_v62 = vpop.permute.xlu0 %286  ;;  %v3747_v28 = vpop.permute.xlu2 %382 }
 0x178   :  { %289 = vst.msk [vmem:[#allocation3 + $0x17] sm:$0x1] %vm104_vm3, %v287_v62  ;;  %v267_v63 = vpop.permute.xlu1 %266 }
 0x179   :  { %269 = vst.msk [vmem:[#allocation3 + $0x15] sm:$0x1] %vm97_vm2, %v267_v63  ;;  %vm650_vm2 = vcmask 556032  }
 0x17a   :  { %273 = vst.msk [vmem:[#allocation3 + $0x15] sm:$0x1] %vm104_vm3, %v271_v55 }
 0x17f   :  { %v311_v17 = vpop.permute.xlu0 %310  ;;  %v3751_v30 = vpop.permute.xlu2 %397 }
 0x180   :  { %v279_v1 = vpop.permute.xlu1 %278  ;;  %5661 = vst [vmem:[#allocation14_spill] sm:$0xff] %v3751_v30 }
 0x181   :  { %281 = vst.msk [vmem:[#allocation3 + $0x16] sm:$0x1] %vm104_vm3, %v279_v1 }
 0x187   :  { %v3755_v32 = vpop.permute.xlu0 %387  ;;  %v3757_v33 = vpop.permute.xlu2 %1106 }
 0x188   :  { %v3688_v2 = vpop.permute.xlu1 %367  ;;  %v299_v8 = vld [vmem:[#allocation3 + $0x10] sm:$0xff]  ;;  %5663 = vst [vmem:[#allocation16_spill] sm:$0xff] %v3755_v32 }
 0x18f   :  { %v3761_v35 = vpop.permute.xlu0 %402 }
 0x190   :  { %v292_v5 = vpop.permute.xlu1 %291  ;;  %5664 = vst [vmem:[#allocation17_spill] sm:$0xff] %v3761_v35 }
 0x191   :  { %294 = vst.msk [vmem:[#allocation3 + $0x18] sm:$0x1] %vm104_vm3, %v292_v5  ;;  %vm673_vm3 = vcmask 539648  }
 0x198   :  { %v300_v7 = vld [vmem:[#allocation3 + $0x18] sm:$0x1]  ;;  %v3749_v29 = vpop.permute.xlu1 %377 }
 0x199   :  { %3103 = vmatpush.msk.msra.mxu2 %vm320_vm4, %v300_v7  ;;  %vm696_vm4 = vcmask 523264  }
 0x19b   :  { %337 = vmatpush.msra.mxu2 %v299_v8 }
 0x19d   :  { %338 = vmatpush.msra.mxu2 %v298_v10 }
 0x19f   :  { %339 = vmatpush.msra.mxu2 %v297_v12 }
 0x1a0   :  { %3104 = vmatmul.msk.f32.vlgmr.msra.gmra.mxu2 %vm313_vm5, %v295_v11  ;;  %v3753_v31 = vpop.permute.xlu1 %392 }
 0x1a1   :  { %5662 = vst [vmem:[#allocation15_spill] sm:$0xff] %v3753_v31 }
 0x1a8   :  { %3105 = vmatmul.msk.f32.gmra.mxu2 %vm313_vm5, %v296_v13  ;;  %v3759_v34 = vpop.permute.xlu1 %1101  ;;  %vm719_vm5 = vcmask 506880  }
 0x223   :  { %v341_v14 = vpop.f32.mrf.mxu2 }
 0x224   :  { %v342_v15 = vadd.f32 %v341_v14, %v3587_v9  ;;  %v349_v9 = vld [vmem:[%s5528_s6] sm:$0xff]  ;;  %s5594_s6 = smov 40  }
 0x226   :  { %v347_v16 = vmax.f32 %v342_v15, 0.0 }
 0x228   :  { %487 = vrot.lane.b32.xlu0 %v347_v16, %s3388_s7  ;;  %478 = vrot.lane.b32.xlu1 %v347_v16, %s3389_s28 }
 0x22b   :  { %v344_v18 = vpop.f32.mrf.mxu2 }
 0x22c   :  { %v345_v19 = vadd.f32 %v344_v18, %v311_v17 }
 0x22e   :  { %v348_v20 = vmax.f32 %v345_v19, 0.0 }
 0x230   :  { %444 = vmatpush.msra.mxu1 %v348_v20  ;;  %3158 = vmatpush.msrb.mxu2 %v348_v20 }
 0x231   :  { %489 = vrot.lane.b32.xlu1 %v348_v20, %s3388_s7  ;;  %480 = vrot.lane.b32.xlu2 %v348_v20, %s3389_s28  ;;  %s5592_s28 = smov 32  }
 0x232   :  { %445 = vmatpush.msra.mxu1 %v347_v16  ;;  %3159 = vmatpush.msrb.mxu2 %v347_v16 }
 0x233   :  { %3106 = vmatmul.msk.f32.vlgmr.msra.gmra.mxu1 %vm405_vm7, %v349_v9  ;;  %3110 = vmatmul.msk.f32.vlgmr.msrb.gmra.mxu2 %vm405_vm7, %v353_v21 }
 0x23b   :  { %3107 = vmatmul.msk.f32.gmra.mxu1 %vm405_vm7, %v350_v0  ;;  %3111 = vmatmul.msk.f32.gmra.mxu2 %vm405_vm7, %v354_v22 }
 0x243   :  { %3108 = vmatmul.msk.f32.gmra.mxu1 %vm405_vm7, %v351_v23  ;;  %3112 = vmatmul.msk.f32.gmra.mxu2 %vm405_vm7, %v355_v24 }
 0x24b   :  { %3109 = vmatmul.msk.f32.gmra.mxu1 %vm405_vm7, %v352_v25  ;;  %3113 = vmatmul.msk.f32.gmra.mxu2 %vm405_vm7, %v356_v26 }
 0x28b   :  { %v481_v36 = vpop.permute.xlu2 %480 }
 0x28c   :  { %486 = vst.msk [vmem:[#allocation4 + $0x10] sm:$0xff] %vm484_vm9, %v481_v36 }
 0x29a   :  { %v488_v37 = vpop.permute.xlu0 %487  ;;  %v479_v38 = vpop.permute.xlu1 %478 }
 0x29b   :  { %496 = vst.msk [vmem:[#allocation4 + $0x8] sm:$0xff] %vm495_vm8, %v488_v37 }
 0x29c   :  { %485 = vst.msk [vmem:[#allocation4] sm:$0xff] %vm484_vm9, %v479_v38  ;;  %vm765_vm9 = vcmask 474112  }
 0x29d   :  { %494 = vst.msk [vmem:[#allocation4] sm:$0xff] %vm493_vm10, %v488_v37 }
 0x2a2   :  { %v3764_v39 = vld [vmem:[#allocation4 + $0x8] sm:$0xff] }
 0x2a3   :  { %995 = vrot.lane.b32.xlu2 %v3764_v39, %s5595_s30  ;;  %963 = vrot.lane.b32.xlu0 %v3764_v39, %s5594_s6  ;;  %v490_v40 = vpop.permute.xlu1 %489  ;;  %s3403_s6 = smov 58   ;;  %s5601_s30 = smov 54  }
 0x2a4   :  { %v3770_v41 = vld [vmem:[#allocation4] sm:$0xff]  ;;  %529 = vrot.lane.b32.xlu1 %v3764_v39, %s3391_s29  ;;  %497 = vst.msk [vmem:[#allocation4 + $0x10] sm:$0xff] %vm493_vm10, %v490_v40  ;;  %vm788_vm10 = vcmask 457728  }
 0x2a5   :  { %498 = vst.msk [vmem:[#allocation4 + $0x18] sm:$0xff] %vm495_vm8, %v490_v40  ;;  %vm742_vm8 = vcmask 490496  }
 0x2a6   :  { %504 = vst.msk [vmem:[#allocation5] sm:$0xff] %vm503_vm11, %v3770_v41 }
 0x2ab   :  { %1021 = vrot.lane.b32.xlu2 %v3764_v39, %s5592_s28  ;;  %1011 = vrot.lane.b32.xlu0 %v3764_v39, %s5591_s1  ;;  %v3781_v42 = vld [vmem:[#allocation4 + $0x10] sm:$0xff]  ;;  %s5619_s1 = smov 62   ;;  %s5597_s28 = smov 60  }
 0x2ac   :  { %552 = vrot.lane.b32.xlu1 %v3764_v39, %s3394_s5  ;;  %505 = vst.msk [vmem:[#allocation5 + $0x8] sm:$0xff] %vm503_vm11, %v3781_v42  ;;  %v3799_v43 = vld [vmem:[#allocation4 + $0x18] sm:$0xff] }
 0x2b3   :  { %527 = vrot.lane.b32.xlu0 %v3770_v41, %s3391_s29  ;;  %508 = vrot.lane.b32.xlu2 %v3770_v41, %s5589_s0  ;;  %s3400_s0 = smov 64  }
 0x2b4   :  { %575 = vrot.lane.b32.xlu1 %v3764_v39, %s5621_s12 }
 0x2bb   :  { %550 = vrot.lane.b32.xlu0 %v3770_v41, %s3394_s5  ;;  %971 = vrot.lane.b32.xlu2 %v3770_v41, %s5587_s25  ;;  %s3399_s25 = smov 66  }
 0x2bc   :  { %598 = vrot.lane.b32.xlu1 %v3764_v39, %s3388_s7 }
 0x2c3   :  { %573 = vrot.lane.b32.xlu0 %v3770_v41, %s5621_s12  ;;  %981 = vrot.lane.b32.xlu2 %v3799_v43, %s5609_s27 }
 0x2c4   :  { %621 = vrot.lane.b32.xlu1 %v3764_v39, %s3397_s18 }
 0x2cb   :  { %596 = vrot.lane.b32.xlu0 %v3770_v41, %s3388_s7  ;;  %519 = vrot.lane.b32.xlu2 %v3781_v42, %s3344_s20 }
 0x2cc   :  { %644 = vrot.lane.b32.xlu1 %v3764_v39, %s5611_s4 }
 0x2d3   :  { %619 = vrot.lane.b32.xlu0 %v3770_v41, %s3397_s18  ;;  %531 = vrot.lane.b32.xlu2 %v3781_v42, %s3391_s29 }
 0x2d4   :  { %667 = vrot.lane.b32.xlu1 %v3764_v39, %s3399_s25 }
 0x2db   :  { %642 = vrot.lane.b32.xlu0 %v3770_v41, %s5611_s4  ;;  %544 = vrot.lane.b32.xlu2 %v3781_v42, %s5613_s19 }
 0x2dc   :  { %690 = vrot.lane.b32.xlu1 %v3764_v39, %s3400_s0 }
 0x2e3   :  { %665 = vrot.lane.b32.xlu0 %v3770_v41, %s3399_s25  ;;  %554 = vrot.lane.b32.xlu2 %v3781_v42, %s3394_s5 }
 0x2e4   :  { %713 = vrot.lane.b32.xlu1 %v3764_v39, %s5619_s1 }
 0x2eb   :  { %688 = vrot.lane.b32.xlu0 %v3770_v41, %s3400_s0  ;;  %567 = vrot.lane.b32.xlu2 %v3781_v42, %s5641_s15 }
 0x2ec   :  { %736 = vrot.lane.b32.xlu1 %v3764_v39, %s5597_s28 }
 0x2f3   :  { %711 = vrot.lane.b32.xlu0 %v3770_v41, %s5619_s1  ;;  %577 = vrot.lane.b32.xlu2 %v3781_v42, %s5621_s12 }
 0x2f4   :  { %759 = vrot.lane.b32.xlu1 %v3764_v39, %s3403_s6 }
 0x2fb   :  { %734 = vrot.lane.b32.xlu0 %v3770_v41, %s5597_s28  ;;  %590 = vrot.lane.b32.xlu2 %v3781_v42, %s3356_s17  ;;  %s5603_s28 = smov 52  }
 0x2fc   :  { %782 = vrot.lane.b32.xlu1 %v3764_v39, %s5599_s26 }
 0x2fd   :  { %v3849_v44 = vpop.permute.xlu2 %995 }
 0x303   :  { %757 = vrot.lane.b32.xlu0 %v3770_v41, %s3403_s6  ;;  %600 = vrot.lane.b32.xlu2 %v3781_v42, %s3388_s7 }
 0x304   :  { %805 = vrot.lane.b32.xlu1 %v3764_v39, %s5601_s30 }
 0x305   :  { %v1022_v45 = vpop.permute.xlu2 %1021 }
 0x30b   :  { %780 = vrot.lane.b32.xlu0 %v3770_v41, %s5599_s26  ;;  %613 = vrot.lane.b32.xlu2 %v3781_v42, %s5617_s16  ;;  %s5605_s26 = smov 50  }
 0x30c   :  { %828 = vrot.lane.b32.xlu1 %v3764_v39, %s5603_s28 }
 0x30d   :  { %v509_v46 = vpop.permute.xlu2 %508 }
 0x30e   :  { %515 = vst.msk [vmem:[#allocation5] sm:$0xff] %vm514_vm12, %v509_v46 }
 0x30f   :  { %1019 = vst.msk [vmem:[#allocation5 + $0x180] sm:$0xff] %vm503_vm11, %v509_v46 }
 0x310   :  { %1027 = vst.msk [vmem:[#allocation5 + $0x180] sm:$0xff] %vm514_vm12, %v1022_v45 }
 0x313   :  { %803 = vrot.lane.b32.xlu0 %v3770_v41, %s5601_s30  ;;  %623 = vrot.lane.b32.xlu2 %v3781_v42, %s3397_s18  ;;  %s5607_s30 = smov 48  }
 0x314   :  { %851 = vrot.lane.b32.xlu1 %v3764_v39, %s5605_s26 }
 0x315   :  { %v3872_v47 = vpop.permute.xlu0 %963  ;;  %v972_v48 = vpop.permute.xlu2 %971 }
 0x316   :  { %977 = vst.msk [vmem:[#allocation5 + $0x150] sm:$0xff] %vm503_vm11, %v972_v48  ;;  %v3875_v49 = vpop.permute.xlu1 %529 }
 0x31b   :  { %826 = vrot.lane.b32.xlu0 %v3770_v41, %s5603_s28  ;;  %636 = vrot.lane.b32.xlu2 %v3781_v42, %s5625_s22  ;;  %s3408_s28 = smov 46  }
 0x31c   :  { %874 = vrot.lane.b32.xlu1 %v3764_v39, %s5607_s30 }
 0x31d   :  { %v3883_v50 = vpop.permute.xlu0 %1011  ;;  %v3885_v51 = vpop.permute.xlu2 %981 }
 0x31e   :  { %v3887_v52 = vpop.permute.xlu1 %552 }
 0x323   :  { %849 = vrot.lane.b32.xlu0 %v3770_v41, %s5605_s26  ;;  %646 = vrot.lane.b32.xlu2 %v3781_v42, %s5611_s4  ;;  %s5643_s26 = smov 44  }
 0x324   :  { %896 = vrot.lane.b32.xlu1 %v3764_v39, %s3408_s28 }
 0x325   :  { %v3895_v53 = vpop.permute.xlu0 %527  ;;  %v520_v54 = vpop.permute.xlu2 %519 }
 0x326   :  { %524 = vst.msk [vmem:[#allocation5 + $0x18] sm:$0xff] %vm503_vm11, %v520_v54  ;;  %v3898_v55 = vpop.permute.xlu1 %575 }
 0x32b   :  { %872 = vrot.lane.b32.xlu0 %v3770_v41, %s5607_s30  ;;  %659 = vrot.lane.b32.xlu2 %v3781_v42, %s3368_s24  ;;  %s3410_s30 = smov 42  }
 0x32c   :  { %919 = vrot.lane.b32.xlu1 %v3764_v39, %s5643_s26 }
 0x32d   :  { %v3906_v56 = vpop.permute.xlu0 %550  ;;  %v3908_v57 = vpop.permute.xlu2 %531 }
 0x32e   :  { %v3910_v58 = vpop.permute.xlu1 %598 }
 0x333   :  { %894 = vrot.lane.b32.xlu0 %v3770_v41, %s3408_s28  ;;  %669 = vrot.lane.b32.xlu2 %v3781_v42, %s3399_s25 }
 0x334   :  { %942 = vrot.lane.b32.xlu1 %v3764_v39, %s3410_s30 }
 0x335   :  { %v3918_v59 = vpop.permute.xlu0 %573  ;;  %v545_v60 = vpop.permute.xlu2 %544 }
 0x336   :  { %549 = vst.msk [vmem:[#allocation5 + $0x28] sm:$0xff] %vm503_vm11, %v545_v60  ;;  %v3921_v61 = vpop.permute.xlu1 %621 }
 0x33b   :  { %917 = vrot.lane.b32.xlu0 %v3770_v41, %s5643_s26  ;;  %682 = vrot.lane.b32.xlu2 %v3781_v42, %s5615_s21 }
 0x33c   :  { %979 = vrot.lane.b32.xlu1 %v3764_v39, %s5609_s27  ;;  %s5665_s27 = smov 110  }
 0x33d   :  { %v3929_v62 = vpop.permute.xlu0 %596  ;;  %v3931_v63 = vpop.permute.xlu2 %554 }
 0x33e   :  { %v3933_v1 = vpop.permute.xlu1 %644 }
 0x343   :  { %940 = vrot.lane.b32.xlu0 %v3770_v41, %s3410_s30  ;;  %692 = vrot.lane.b32.xlu2 %v3781_v42, %s3400_s0 }
 0x344   :  { %517 = vrot.lane.b32.xlu1 %v3770_v41, %s3344_s20  ;;  %s5666_s20 = smov 108  }
 0x345   :  { %v3941_v3 = vpop.permute.xlu0 %619  ;;  %v568_v4 = vpop.permute.xlu2 %567 }
 0x346   :  { %572 = vst.msk [vmem:[#allocation5 + $0x38] sm:$0xff] %vm503_vm11, %v568_v4  ;;  %v3944_v5 = vpop.permute.xlu1 %667 }
 0x34b   :  { %987 = vrot.lane.b32.xlu0 %v3770_v41, %s3376_s23  ;;  %705 = vrot.lane.b32.xlu2 %v3781_v42, %s5665_s27 }
 0x34c   :  { %542 = vrot.lane.b32.xlu1 %v3770_v41, %s5613_s19  ;;  %s5633_s19 = smov 41  }
 0x34d   :  { %v3952_v6 = vpop.permute.xlu0 %642  ;;  %v3954_v7 = vpop.permute.xlu2 %577 }
 0x34e   :  { %v3956_v8 = vpop.permute.xlu1 %690 }
 0x353   :  { %533 = vrot.lane.b32.xlu0 %v3799_v43, %s3391_s29  ;;  %715 = vrot.lane.b32.xlu2 %v3781_v42, %s5619_s1  ;;  %s5667_s29 = smov 60  }
 0x354   :  { %565 = vrot.lane.b32.xlu1 %v3770_v41, %s5641_s15 }
 0x355   :  { %v3964_v10 = vpop.permute.xlu0 %665  ;;  %v591_v11 = vpop.permute.xlu2 %590 }
 0x356   :  { %595 = vst.msk [vmem:[#allocation5 + $0x48] sm:$0xff] %vm503_vm11, %v591_v11  ;;  %v3967_v12 = vpop.permute.xlu1 %713 }
 0x35b   :  { %556 = vrot.lane.b32.xlu0 %v3799_v43, %s3394_s5  ;;  %728 = vrot.lane.b32.xlu2 %v3781_v42, %s5666_s20  ;;  %s5671_s5 = smov 102  }
 0x35c   :  { %588 = vrot.lane.b32.xlu1 %v3770_v41, %s3356_s17  ;;  %s5668_s17 = smov 106  }
 0x35d   :  { %v3975_v13 = vpop.permute.xlu0 %688  ;;  %v3977_v14 = vpop.permute.xlu2 %600 }
 0x35e   :  { %v3979_v15 = vpop.permute.xlu1 %736 }
 0x363   :  { %579 = vrot.lane.b32.xlu0 %v3799_v43, %s5621_s12  ;;  %738 = vrot.lane.b32.xlu2 %v3781_v42, %s5667_s29  ;;  %s5697_s12 = smov 115  }
 0x364   :  { %611 = vrot.lane.b32.xlu1 %v3770_v41, %s5617_s16  ;;  %s5629_s16 = smov 26  }
 0x365   :  { %v3987_v16 = vpop.permute.xlu0 %711  ;;  %v614_v17 = vpop.permute.xlu2 %613 }
 0x366   :  { %618 = vst.msk [vmem:[#allocation5 + $0x58] sm:$0xff] %vm503_vm11, %v614_v17  ;;  %v3990_v18 = vpop.permute.xlu1 %759 }
 0x36b   :  { %602 = vrot.lane.b32.xlu0 %v3799_v43, %s3388_s7  ;;  %751 = vrot.lane.b32.xlu2 %v3781_v42, %s5668_s17  ;;  %s5669_s7 = smov 104  }
 0x36c   :  { %634 = vrot.lane.b32.xlu1 %v3770_v41, %s5625_s22 }
 0x36d   :  { %v3998_v19 = vpop.permute.xlu0 %734  ;;  %v4000_v20 = vpop.permute.xlu2 %623 }
 0x36e   :  { %v4002_v9 = vpop.permute.xlu1 %782 }
 0x373   :  { %625 = vrot.lane.b32.xlu0 %v3799_v43, %s3397_s18  ;;  %761 = vrot.lane.b32.xlu2 %v3781_v42, %s3403_s6  ;;  %s5674_s18 = smov 52  }
 0x374   :  { %657 = vrot.lane.b32.xlu1 %v3770_v41, %s3368_s24  ;;  %s5670_s24 = smov 56  }
 0x375   :  { %v4010_v21 = vpop.permute.xlu0 %757  ;;  %v637_v0 = vpop.permute.xlu2 %636 }
 0x376   :  { %641 = vst.msk [vmem:[#allocation5 + $0x68] sm:$0xff] %vm503_vm11, %v637_v0  ;;  %v4013_v22 = vpop.permute.xlu1 %805 }
 0x37b   :  { %648 = vrot.lane.b32.xlu0 %v3799_v43, %s5611_s4  ;;  %774 = vrot.lane.b32.xlu2 %v3781_v42, %s5669_s7  ;;  %s5692_s4 = smov 95  }
 0x37c   :  { %680 = vrot.lane.b32.xlu1 %v3770_v41, %s5615_s21  ;;  %s5691_s21 = smov 119  }
 0x37d   :  { %v4021_v23 = vpop.permute.xlu0 %780  ;;  %v4023_v24 = vpop.permute.xlu2 %646 }
 0x37e   :  { %v4025_v25 = vpop.permute.xlu1 %828 }
 0x383   :  { %671 = vrot.lane.b32.xlu0 %v3799_v43, %s3399_s25  ;;  %784 = vrot.lane.b32.xlu2 %v3781_v42, %s5670_s24  ;;  %s5672_s25 = smov 54  }
 0x384   :  { %703 = vrot.lane.b32.xlu1 %v3770_v41, %s5665_s27 }
 0x385   :  { %v4033_v26 = vpop.permute.xlu0 %803  ;;  %v660_v36 = vpop.permute.xlu2 %659 }
 0x386   :  { %664 = vst.msk [vmem:[#allocation5 + $0x78] sm:$0xff] %vm503_vm11, %v660_v36  ;;  %v4036_v37 = vpop.permute.xlu1 %851 }
 0x38b   :  { %694 = vrot.lane.b32.xlu0 %v3799_v43, %s3400_s0  ;;  %797 = vrot.lane.b32.xlu2 %v3781_v42, %s5671_s5  ;;  %s5673_s0 = smov 100  }
 0x38c   :  { %726 = vrot.lane.b32.xlu1 %v3770_v41, %s5666_s20 }
 0x38d   :  { %v4044_v38 = vpop.permute.xlu0 %826  ;;  %v4046_v39 = vpop.permute.xlu2 %669 }
 0x38e   :  { %v4048_v40 = vpop.permute.xlu1 %874 }
 0x393   :  { %717 = vrot.lane.b32.xlu0 %v3799_v43, %s5619_s1  ;;  %807 = vrot.lane.b32.xlu2 %v3781_v42, %s5672_s25  ;;  %s5631_s1 = smov 23  }
 0x394   :  { %749 = vrot.lane.b32.xlu1 %v3770_v41, %s5668_s17  ;;  %s5677_s17 = smov 96  }
 0x395   :  { %v4056_v45 = vpop.permute.xlu0 %849  ;;  %v683_v46 = vpop.permute.xlu2 %682 }
 0x396   :  { %687 = vst.msk [vmem:[#allocation5 + $0x88] sm:$0xff] %vm503_vm11, %v683_v46  ;;  %v4059_v48 = vpop.permute.xlu1 %896 }
 0x39b   :  { %740 = vrot.lane.b32.xlu0 %v3799_v43, %s5667_s29  ;;  %820 = vrot.lane.b32.xlu2 %v3781_v42, %s5673_s0  ;;  %s5675_s29 = smov 98  }
 0x39c   :  { %772 = vrot.lane.b32.xlu1 %v3770_v41, %s5669_s7 }
 0x39d   :  { %v4067_v54 = vpop.permute.xlu0 %872  ;;  %v4069_v60 = vpop.permute.xlu2 %692 }
 0x39e   :  { %v4071_v4 = vpop.permute.xlu1 %919 }
 0x3a3   :  { %763 = vrot.lane.b32.xlu0 %v3799_v43, %s3403_s6  ;;  %830 = vrot.lane.b32.xlu2 %v3781_v42, %s5674_s18  ;;  %s5676_s6 = smov 50  }
 0x3a4   :  { %795 = vrot.lane.b32.xlu1 %v3770_v41, %s5671_s5  ;;  %s5678_s5 = smov 48  }
 0x3a5   :  { %v4079_v11 = vpop.permute.xlu0 %894  ;;  %v706_v17 = vpop.permute.xlu2 %705 }
 0x3a6   :  { %710 = vst.msk [vmem:[#allocation5 + $0x98] sm:$0xff] %vm503_vm11, %v706_v17  ;;  %v4082_v0 = vpop.permute.xlu1 %942 }
 0x3ab   :  { %786 = vrot.lane.b32.xlu0 %v3799_v43, %s5670_s24  ;;  %843 = vrot.lane.b32.xlu2 %v3781_v42, %s5675_s29 }
 0x3ac   :  { %818 = vrot.lane.b32.xlu1 %v3770_v41, %s5673_s0  ;;  %s5680_s0 = smov 92  }
 0x3ad   :  { %v4090_v36 = vpop.permute.xlu0 %917  ;;  %v4092_v46 = vpop.permute.xlu2 %715 }
 0x3ae   :  { %v980_v35 = vpop.permute.xlu1 %979 }
 0x3af   :  { %985 = vst.msk [vmem:[#allocation5 + $0x150] sm:$0xff] %vm514_vm12, %v980_v35  ;;  %v536_v35 = vsel %vm535_vm13, %v3895_v53, %v3875_v49 }
 0x3b3   :  { %809 = vrot.lane.b32.xlu0 %v3799_v43, %s5672_s25  ;;  %853 = vrot.lane.b32.xlu2 %v3781_v42, %s5676_s6  ;;  %s5679_s25 = smov 94  }
 0x3b4   :  { %841 = vrot.lane.b32.xlu1 %v3770_v41, %s5675_s29 }
 0x3b5   :  { %v4101_v17 = vpop.permute.xlu0 %940  ;;  %v729_v30 = vpop.permute.xlu2 %728 }
 0x3b6   :  { %733 = vst.msk [vmem:[#allocation5 + $0xa8] sm:$0xff] %vm503_vm11, %v729_v30  ;;  %v518_v31 = vpop.permute.xlu1 %517 }
 0x3b7   :  { %523 = vst.msk [vmem:[#allocation5 + $0x10] sm:$0xff] %vm503_vm11, %v518_v31  ;;  %v559_v31 = vsel %vm558_vm14, %v3906_v56, %v3887_v52  ;;  %v582_v56 = vsel %vm581_vm15, %v3918_v59, %v3898_v55 }
 0x3b8   :  { %540 = vst.msk [vmem:[#allocation5 + $0x10] sm:$0xff] %vm514_vm12, %v536_v35 }
 0x3bb   :  { %832 = vrot.lane.b32.xlu0 %v3799_v43, %s5674_s18  ;;  %866 = vrot.lane.b32.xlu2 %v3781_v42, %s5677_s17  ;;  %s5681_s18 = smov 90  }
 0x3bc   :  { %864 = vrot.lane.b32.xlu1 %v3770_v41, %s5677_s17  ;;  %s5683_s17 = smov 82  }
 0x3bd   :  { %v988_v30 = vpop.permute.xlu0 %987  ;;  %v4115_v32 = vpop.permute.xlu2 %738 }
 0x3be   :  { %993 = vst.msk [vmem:[#allocation5 + $0x160] sm:$0xff] %vm503_vm11, %v988_v30  ;;  %v543_v49 = vpop.permute.xlu1 %542 }
 0x3bf   :  { %1001 = vst.msk [vmem:[#allocation5 + $0x160] sm:$0xff] %vm514_vm12, %v3849_v44 }
 0x3c0   :  { %548 = vst.msk [vmem:[#allocation5 + $0x20] sm:$0xff] %vm503_vm11, %v543_v49  ;;  %v605_v49 = vsel %vm604_vm0, %v3929_v62, %v3910_v58  ;;  %v628_v62 = vsel %vm627_vm1, %v3941_v3, %v3921_v61 }
 0x3c1   :  { %563 = vst.msk [vmem:[#allocation5 + $0x20] sm:$0xff] %vm514_vm12, %v559_v31 }
 0x3c3   :  { %855 = vrot.lane.b32.xlu0 %v3799_v43, %s5676_s6  ;;  %876 = vrot.lane.b32.xlu2 %v3781_v42, %s5678_s5 }
 0x3c4   :  { %886 = vrot.lane.b32.xlu1 %v3770_v41, %s5679_s25 }
 0x3c5   :  { %v534_v53 = vpop.permute.xlu0 %533  ;;  %v752_v44 = vpop.permute.xlu2 %751 }
 0x3c6   :  { %v537_v35 = vsel %vm535_vm13, %v3908_v57, %v534_v53  ;;  %756 = vst.msk [vmem:[#allocation5 + $0xb8] sm:$0xff] %vm503_vm11, %v752_v44  ;;  %v566_v52 = vpop.permute.xlu1 %565  ;;  %vm811_vm13 = vcmask 441344  }
 0x3c7   :  { %541 = vst.msk [vmem:[#allocation5 + $0x18] sm:$0xff] %vm514_vm12, %v537_v35  ;;  %v651_v35 = vsel %vm650_vm2, %v3952_v6, %v3933_v1  ;;  %v674_v6 = vsel %vm673_vm3, %v3964_v10, %v3944_v5 }
 0x3c8   :  { %571 = vst.msk [vmem:[#allocation5 + $0x30] sm:$0xff] %vm503_vm11, %v566_v52 }
 0x3c9   :  { %586 = vst.msk [vmem:[#allocation5 + $0x30] sm:$0xff] %vm514_vm12, %v582_v56 }
 0x3cb   :  { %878 = vrot.lane.b32.xlu0 %v3799_v43, %s5678_s5  ;;  %888 = vrot.lane.b32.xlu2 %v3781_v42, %s5679_s25  ;;  %s5684_s5 = smov 36   ;;  %s5685_s25 = smov 40  }
 0x3cc   :  { %909 = vrot.lane.b32.xlu1 %v3770_v41, %s5680_s0 }
 0x3cd   :  { %v557_v57 = vpop.permute.xlu0 %556  ;;  %v4146_v30 = vpop.permute.xlu2 %761 }
 0x3ce   :  { %v560_v55 = vsel %vm558_vm14, %v3931_v63, %v557_v57  ;;  %v589_v59 = vpop.permute.xlu1 %588  ;;  %v697_v57 = vsel %vm696_vm4, %v3975_v13, %v3956_v8  ;;  %v720_v13 = vsel %vm719_vm5, %v3987_v16, %v3967_v12  ;;  %vm834_vm14 = vcmask 424960  }
 0x3cf   :  { %564 = vst.msk [vmem:[#allocation5 + $0x28] sm:$0xff] %vm514_vm12, %v560_v55 }
 0x3d0   :  { %594 = vst.msk [vmem:[#allocation5 + $0x40] sm:$0xff] %vm503_vm11, %v589_v59 }
 0x3d1   :  { %609 = vst.msk [vmem:[#allocation5 + $0x40] sm:$0xff] %vm514_vm12, %v605_v49 }
 0x3d3   :  { %900 = vrot.lane.b32.xlu0 %v3799_v43, %s3408_s28  ;;  %898 = vrot.lane.b32.xlu2 %v3781_v42, %s3408_s28  ;;  %s5682_s28 = smov 88  }
 0x3d4   :  { %932 = vrot.lane.b32.xlu1 %v3770_v41, %s5681_s18 }
 0x3d5   :  { %v580_v63 = vpop.permute.xlu0 %579  ;;  %v775_v31 = vpop.permute.xlu2 %774 }
 0x3d6   :  { %v583_v53 = vsel %vm581_vm15, %v3954_v7, %v580_v63  ;;  %779 = vst.msk [vmem:[#allocation5 + $0xc8] sm:$0xff] %vm503_vm11, %v775_v31  ;;  %v612_v58 = vpop.permute.xlu1 %611  ;;  %v743_v63 = vsel %vm742_vm8, %v3998_v19, %v3979_v15  ;;  %vm857_vm15 = vcmask 408576  }
 0x3d7   :  { %587 = vst.msk [vmem:[#allocation5 + $0x38] sm:$0xff] %vm514_vm12, %v583_v53  ;;  %v1098_v53 = vld [vmem:[%s5531_s9 + $0x18] sm:$0xff] }
 0x3d8   :  { %617 = vst.msk [vmem:[#allocation5 + $0x50] sm:$0xff] %vm503_vm11, %v612_v58 }
 0x3d9   :  { %632 = vst.msk [vmem:[#allocation5 + $0x50] sm:$0xff] %vm514_vm12, %v628_v62 }
 0x3db   :  { %923 = vrot.lane.b32.xlu0 %v3799_v43, %s5643_s26  ;;  %911 = vrot.lane.b32.xlu2 %v3781_v42, %s5680_s0  ;;  %s5713_s0 = smov 14  }
 0x3dc   :  { %955 = vrot.lane.b32.xlu1 %v3770_v41, %s5682_s28 }
 0x3dd   :  { %v603_v7 = vpop.permute.xlu0 %602  ;;  %v4177_v44 = vpop.permute.xlu2 %784 }
 0x3de   :  { %v606_v61 = vsel %vm604_vm0, %v3977_v14, %v603_v7  ;;  %v635_v3 = vpop.permute.xlu1 %634  ;;  %vm902_vm0 = vcmask 375808  }
 0x3df   :  { %610 = vst.msk [vmem:[#allocation5 + $0x48] sm:$0xff] %vm514_vm12, %v606_v61 }
 0x3e0   :  { %640 = vst.msk [vmem:[#allocation5 + $0x60] sm:$0xff] %vm503_vm11, %v635_v3  ;;  %v1259_v3 = vld [vmem:[%s5533_s11] sm:$0xff] }
 0x3e1   :  { %655 = vst.msk [vmem:[#allocation5 + $0x60] sm:$0xff] %vm514_vm12, %v651_v35  ;;  %v1055_v35 = vld [vmem:[#allocation5 + $0x50] sm:$0xff] }
 0x3e3   :  { %946 = vrot.lane.b32.xlu0 %v3799_v43, %s3410_s30  ;;  %921 = vrot.lane.b32.xlu2 %v3781_v42, %s5643_s26 }
 0x3e4   :  { %1003 = vrot.lane.b32.xlu1 %v3770_v41, %s5683_s17 }
 0x3e5   :  { %v626_v14 = vpop.permute.xlu0 %625  ;;  %v798_v52 = vpop.permute.xlu2 %797 }
 0x3e6   :  { %v629_v56 = vsel %vm627_vm1, %v4000_v20, %v626_v14  ;;  %802 = vst.msk [vmem:[#allocation5 + $0xd8] sm:$0xff] %vm503_vm11, %v798_v52  ;;  %v658_v1 = vpop.permute.xlu1 %657  ;;  %v1261_v14 = vld [vmem:[%s5533_s11 + $0x10] sm:$0xff]  ;;  %vm925_vm1 = vcmask 359424  }
 0x3e7   :  { %633 = vst.msk [vmem:[#allocation5 + $0x58] sm:$0xff] %vm514_vm12, %v629_v56  ;;  %v1053_v56 = vld [vmem:[#allocation5 + $0x40] sm:$0xff] }
 0x3e8   :  { %663 = vst.msk [vmem:[#allocation5 + $0x70] sm:$0xff] %vm503_vm11, %v658_v1  ;;  %v1057_v58 = vld [vmem:[#allocation5 + $0x60] sm:$0xff] }
 0x3e9   :  { %678 = vst.msk [vmem:[#allocation5 + $0x70] sm:$0xff] %vm514_vm12, %v674_v6 }
 0x3eb   :  { %997 = vrot.lane.b32.xlu0 %v3799_v43, %s5684_s5  ;;  %934 = vrot.lane.b32.xlu2 %v3781_v42, %s5681_s18  ;;  %s5686_s18 = smov 32  }
 0x3ec   :  { %965 = vrot.lane.b32.xlu1 %v3799_v43, %s5685_s25  ;;  %s5687_s25 = smov 34  }
 0x3ed   :  { %v649_v41 = vpop.permute.xlu0 %648  ;;  %v4208_v20 = vpop.permute.xlu2 %807 }
 0x3ee   :  { %v652_v5 = vsel %vm650_vm2, %v4023_v24, %v649_v41  ;;  %v681_v10 = vpop.permute.xlu1 %680  ;;  %v1056_v61 = vld [vmem:[#allocation5 + $0x58] sm:$0xff]  ;;  %vm948_vm2 = vcmask 343040  }
 0x3ef   :  { %656 = vst.msk [vmem:[#allocation5 + $0x68] sm:$0xff] %vm514_vm12, %v652_v5  ;;  %v1052_v41 = vld [vmem:[#allocation5 + $0x38] sm:$0xff]  ;;  %v789_v5 = vsel %vm788_vm10, %v4021_v23, %v4002_v9  ;;  %v1050_v9 = vld [vmem:[#allocation5 + $0x28] sm:$0xff] }
 0x3f0   :  { %686 = vst.msk [vmem:[#allocation5 + $0x80] sm:$0xff] %vm503_vm11, %v681_v10  ;;  %v1059_v31 = vld [vmem:[#allocation5 + $0x70] sm:$0xff] }
 0x3f1   :  { %701 = vst.msk [vmem:[#allocation5 + $0x80] sm:$0xff] %vm514_vm12, %v697_v57  ;;  %v1262_v10 = vld [vmem:[%s5533_s11 + $0x18] sm:$0xff] }
 0x3f2   :  { %v1051_v57 = vld [vmem:[#allocation5 + $0x30] sm:$0xff] }
 0x3f3   :  { %1023 = vrot.lane.b32.xlu0 %v3799_v43, %s5686_s18  ;;  %944 = vrot.lane.b32.xlu2 %v3781_v42, %s3410_s30  ;;  %s5688_s30 = smov 80  }
 0x3f4   :  { %1013 = vrot.lane.b32.xlu1 %v3799_v43, %s5687_s25  ;;  %s5689_s25 = smov 86  }
 0x3f5   :  { %v672_v24 = vpop.permute.xlu0 %671  ;;  %v821_v55 = vpop.permute.xlu2 %820 }
 0x3f6   :  { %v675_v59 = vsel %vm673_vm3, %v4046_v39, %v672_v24  ;;  %825 = vst.msk [vmem:[#allocation5 + $0xe8] sm:$0xff] %vm503_vm11, %v821_v55  ;;  %v704_v8 = vpop.permute.xlu1 %703  ;;  %v1264_v24 = vld [vmem:[%s5533_s11 + $0x28] sm:$0xff]  ;;  %vm1415_vm3 = vcmask 490656  }
 0x3f7   :  { %679 = vst.msk [vmem:[#allocation5 + $0x78] sm:$0xff] %vm514_vm12, %v675_v59  ;;  %v1049_v59 = vld [vmem:[#allocation5 + $0x20] sm:$0xff] }
 0x3f8   :  { %709 = vst.msk [vmem:[#allocation5 + $0x90] sm:$0xff] %vm503_vm11, %v704_v8 }
 0x3f9   :  { %724 = vst.msk [vmem:[#allocation5 + $0x90] sm:$0xff] %vm514_vm12, %v720_v13 }
 0x3fb   :  { %957 = vrot.lane.b32.xlu2 %v3781_v42, %s5682_s28  ;;  %510 = vrot.lane.b32.xlu0 %v3781_v42, %s5688_s30  ;;  %s5696_s28 = smov 38   ;;  %s5712_s30 = smov 47  }
 0x3fc   :  { %989 = vrot.lane.b32.xlu1 %v3781_v42, %s3376_s23  ;;  %s5695_s23 = smov 107  }
 0x3fd   :  { %v695_v43 = vpop.permute.xlu0 %694  ;;  %v4239_v39 = vpop.permute.xlu2 %830 }
 0x3fe   :  { %v698_v12 = vsel %vm696_vm4, %v4069_v60, %v695_v43  ;;  %v727_v16 = vpop.permute.xlu1 %726  ;;  %v1060_v49 = vld [vmem:[#allocation5 + $0x78] sm:$0xff]  ;;  %v1058_v60 = vld [vmem:[#allocation5 + $0x68] sm:$0xff]  ;;  %vm1398_vm4 = vcmask 621856  }
 0x3ff   :  { %702 = vst.msk [vmem:[#allocation5 + $0x88] sm:$0xff] %vm514_vm12, %v698_v12  ;;  %1131 = vmatpush.msra.mxu2 %v1060_v49  ;;  %v1048_v43 = vld [vmem:[#allocation5 + $0x18] sm:$0xff]  ;;  %v812_v12 = vsel %vm811_vm13, %v4033_v26, %v4013_v22  ;;  %v1047_v49 = vld [vmem:[#allocation5 + $0x10] sm:$0xff] }
 0x400   :  { %732 = vst.msk [vmem:[#allocation5 + $0xa0] sm:$0xff] %vm503_vm11, %v727_v16  ;;  %v1265_v16 = vld [vmem:[%s5533_s11 + $0x30] sm:$0xff] }
 0x401   :  { %747 = vst.msk [vmem:[#allocation5 + $0xa0] sm:$0xff] %vm514_vm12, %v743_v63  ;;  %1132 = vmatpush.msra.mxu2 %v1059_v31 }
 0x403   :  { %1005 = vrot.lane.b32.xlu2 %v3781_v42, %s5683_s17  ;;  %973 = vrot.lane.b32.xlu0 %v3781_v42, %s5689_s25  ;;  %v766_v42 = vsel %vm765_vm9, %v4010_v21, %v3990_v18  ;;  %v1054_v18 = vld [vmem:[#allocation5 + $0x48] sm:$0xff]  ;;  %s5623_s17 = smov 35  }
 0x404   :  { %1116 = vperm.xlu1 %3270, %v1098_v53   ;;  %1133 = vmatpush.msra.mxu2 %v1058_v60  ;;  %v835_v53 = vsel %vm834_vm14, %v4044_v38, %v4025_v25  ;;  %v1266_v60 = vld [vmem:[%s5533_s11 + $0x38] sm:$0xff]  ;;  %v858_v25 = vsel %vm857_vm15, %v4056_v45, %v4036_v37 }
 0x405   :  { %v718_v15 = vpop.permute.xlu0 %717  ;;  %v844_v19 = vpop.permute.xlu2 %843 }
 0x406   :  { %v721_v62 = vsel %vm719_vm5, %v4092_v46, %v718_v15  ;;  %848 = vst.msk [vmem:[#allocation5 + $0xf8] sm:$0xff] %vm503_vm11, %v844_v19  ;;  %v750_v7 = vpop.permute.xlu1 %749  ;;  %1134 = vmatpush.msra.mxu2 %v1057_v58  ;;  %v1097_v46 = vld [vmem:[%s5531_s9 + $0x10] sm:$0xff]  ;;  %s5637_s9 = smov 59   ;;  %vm1500_vm5 = vcmask 433152  }
 0x407   :  { %725 = vst.msk [vmem:[#allocation5 + $0x98] sm:$0xff] %vm514_vm12, %v721_v62 }
 0x408   :  { %755 = vst.msk [vmem:[#allocation5 + $0xb0] sm:$0xff] %vm503_vm11, %v750_v7  ;;  %1135 = vmatpush.msra.mxu2 %v1056_v61 }
 0x409   :  { %770 = vst.msk [vmem:[#allocation5 + $0xb0] sm:$0xff] %vm514_vm12, %v766_v42 }
 0x40a   :  { %1136 = vmatpush.msra.mxu2 %v1055_v35 }
 0x40b   :  { %1269 = vperm.xlu2 %3268, %v1259_v3   ;;  %1111 = vperm.xlu0 %3269, %v1097_v46   ;;  %v903_v3 = vsel %vm902_vm0, %v4079_v11, %v4059_v48 }
 0x40c   :  { %1279 = vperm.xlu1 %3270, %v1261_v14   ;;  %1137 = vmatpush.msra.mxu2 %v1054_v18  ;;  %v926_v18 = vsel %vm925_vm1, %v4090_v36, %v4071_v4  ;;  %v949_v4 = vsel %vm948_vm2, %v4101_v17, %v4082_v0 }
 0x40d   :  { %v741_v21 = vpop.permute.xlu0 %740  ;;  %v4274_v52 = vpop.permute.xlu2 %853 }
 0x40e   :  { %v744_v1 = vsel %vm742_vm8, %v4115_v32, %v741_v21  ;;  %v773_v6 = vpop.permute.xlu1 %772  ;;  %1138 = vmatpush.msra.mxu2 %v1053_v56  ;;  %v1260_v32 = vld [vmem:[%s5533_s11 + $0x8] sm:$0xff]  ;;  %vm1589_vm8 = vcmask 384000  }
 0x40f   :  { %748 = vst.msk [vmem:[#allocation5 + $0xa8] sm:$0xff] %vm514_vm12, %v744_v1 }
 0x410   :  { %778 = vst.msk [vmem:[#allocation5 + $0xc0] sm:$0xff] %vm503_vm11, %v773_v6  ;;  %1139 = vmatpush.msra.mxu2 %v1052_v41  ;;  %v1067_v0 = vld [vmem:[#allocation5 + $0xb0] sm:$0xff] }
 0x411   :  { %793 = vst.msk [vmem:[#allocation5 + $0xc0] sm:$0xff] %vm514_vm12, %v789_v5 }
 0x412   :  { %1140 = vmatpush.msra.mxu2 %v1051_v57 }
 0x413   :  { %1284 = vperm.xlu2 %3268, %v1262_v10   ;;  %1274 = vperm.xlu0 %3269, %v1260_v32  }
 0x414   :  { %1294 = vperm.xlu1 %3270, %v1264_v24   ;;  %1141 = vmatpush.msra.mxu2 %v1050_v9 }
 0x415   :  { %v764_v23 = vpop.permute.xlu0 %763  ;;  %v867_v55 = vpop.permute.xlu2 %866 }
 0x416   :  { %v767_v8 = vsel %vm765_vm9, %v4146_v30, %v764_v23  ;;  %871 = vst.msk [vmem:[#allocation5 + $0x108] sm:$0xff] %vm503_vm11, %v867_v55  ;;  %v796_v13 = vpop.permute.xlu1 %795  ;;  %1142 = vmatpush.msra.mxu2 %v1049_v59  ;;  %v1263_v30 = vld [vmem:[%s5533_s11 + $0x20] sm:$0xff]  ;;  %v1066_v17 = vld [vmem:[#allocation5 + $0xa8] sm:$0xff]  ;;  %s5694_s11 = smov 101   ;;  %vm1678_vm9 = vcmask 334848  }
 0x417   :  { %771 = vst.msk [vmem:[#allocation5 + $0xb8] sm:$0xff] %vm514_vm12, %v767_v8  ;;  %v1065_v55 = vld [vmem:[#allocation5 + $0xa0] sm:$0xff] }
 0x418   :  { %801 = vst.msk [vmem:[#allocation5 + $0xd0] sm:$0xff] %vm503_vm11, %v796_v13  ;;  %1143 = vmatpush.msra.mxu2 %v1048_v43  ;;  %v1069_v10 = vld [vmem:[#allocation5 + $0xc0] sm:$0xff] }
 0x419   :  { %816 = vst.msk [vmem:[#allocation5 + $0xd0] sm:$0xff] %vm514_vm12, %v812_v12  ;;  %v1064_v12 = vld [vmem:[#allocation5 + $0x98] sm:$0xff] }
 0x41a   :  { %1144 = vmatpush.msra.mxu2 %v1047_v49  ;;  %v1030_v49 = vld [vmem:[%s5530_s8 + $0x8] sm:$0xff] }
 0x41b   :  { %1299 = vperm.xlu2 %3268, %v1265_v16   ;;  %1289 = vperm.xlu0 %3269, %v1263_v30   ;;  %v1063_v16 = vld [vmem:[#allocation5 + $0x90] sm:$0xff]  ;;  %v1061_v30 = vld [vmem:[#allocation5 + $0x80] sm:$0xff] }
 0x41d   :  { %v787_v63 = vpop.permute.xlu0 %786  ;;  %v877_v22 = vpop.permute.xlu2 %876 }
 0x41e   :  { %v790_v26 = vsel %vm788_vm10, %v4177_v44, %v787_v63  ;;  %v819_v31 = vpop.permute.xlu1 %818  ;;  %v1068_v23 = vld [vmem:[#allocation5 + $0xb8] sm:$0xff] }
 0x41f   :  { %794 = vst.msk [vmem:[#allocation5 + $0xc8] sm:$0xff] %vm514_vm12, %v790_v26 }
 0x420   :  { %824 = vst.msk [vmem:[#allocation5 + $0xe0] sm:$0xff] %vm503_vm11, %v819_v31  ;;  %v1071_v36 = vld [vmem:[#allocation5 + $0xd0] sm:$0xff] }
 0x421   :  { %839 = vst.msk [vmem:[#allocation5 + $0xe0] sm:$0xff] %vm514_vm12, %v835_v53 }
 0x423   :  { %1304 = vperm.xlu0 %3269, %v1266_v60   ;;  %v1038_v60 = vld [vmem:[%s5530_s8 + $0x48] sm:$0xff] }
 0x425   :  { %v810_v15 = vpop.permute.xlu0 %809  ;;  %v889_v19 = vpop.permute.xlu2 %888 }
 0x426   :  { %v813_v44 = vsel %vm811_vm13, %v4208_v20, %v810_v15  ;;  %893 = vst.msk [vmem:[#allocation5 + $0x118] sm:$0xff] %vm503_vm11, %v889_v19  ;;  %v842_v58 = vpop.permute.xlu1 %841  ;;  %v880_v20 = vsel %vm472_vm6, %v4067_v54, %v4048_v40  ;;  %v1070_v5 = vld [vmem:[#allocation5 + $0xc8] sm:$0xff] }
 0x427   :  { %817 = vst.msk [vmem:[#allocation5 + $0xd8] sm:$0xff] %vm514_vm12, %v813_v44 }
 0x428   :  { %847 = vst.msk [vmem:[#allocation5 + $0xf0] sm:$0xff] %vm503_vm11, %v842_v58  ;;  %v1073_v21 = vld [vmem:[#allocation5 + $0xe0] sm:$0xff] }
 0x429   :  { %862 = vst.msk [vmem:[#allocation5 + $0xf0] sm:$0xff] %vm514_vm12, %v858_v25  ;;  %v1042_v25 = vld [vmem:[%s5530_s8 + $0x68] sm:$0xff] }
 0x42d   :  { %v833_v38 = vpop.permute.xlu0 %832  ;;  %v899_v62 = vpop.permute.xlu2 %898 }
 0x42e   :  { %v836_v7 = vsel %vm834_vm14, %v4239_v39, %v833_v38  ;;  %v865_v61 = vpop.permute.xlu1 %864  ;;  %v1072_v41 = vld [vmem:[#allocation5 + $0xd8] sm:$0xff] }
 0x42f   :  { %840 = vst.msk [vmem:[#allocation5 + $0xe8] sm:$0xff] %vm514_vm12, %v836_v7  ;;  %v1029_v7 = vld [vmem:[%s5530_s8] sm:$0xff] }
 0x430   :  { %870 = vst.msk [vmem:[#allocation5 + $0x100] sm:$0xff] %vm503_vm11, %v865_v61  ;;  %v1075_v48 = vld [vmem:[#allocation5 + $0xf0] sm:$0xff]  ;;  %v1045_v61 = vld [vmem:[#allocation5] sm:$0xff] }
 0x431   :  { %884 = vst.msk [vmem:[#allocation5 + $0x100] sm:$0xff] %vm514_vm12, %v880_v20 }
 0x435   :  { %v856_v37 = vpop.permute.xlu0 %855  ;;  %v912_v45 = vpop.permute.xlu2 %911 }
 0x436   :  { %v859_v42 = vsel %vm857_vm15, %v4274_v52, %v856_v37  ;;  %916 = vst.msk [vmem:[#allocation5 + $0x128] sm:$0xff] %vm503_vm11, %v912_v45  ;;  %v887_v39 = vpop.permute.xlu1 %886  ;;  %v1074_v11 = vld [vmem:[#allocation5 + $0xe8] sm:$0xff]  ;;  %v1089_v45 = vld [vmem:[#allocation5 + $0x160] sm:$0xff] }
 0x437   :  { %863 = vst.msk [vmem:[#allocation5 + $0xf8] sm:$0xff] %vm514_vm12, %v859_v42  ;;  %v1093_v42 = vld [vmem:[#allocation5 + $0x180] sm:$0xff] }
 0x438   :  { %892 = vst.msk [vmem:[#allocation5 + $0x110] sm:$0xff] %vm503_vm11, %v887_v39 }
 0x439   :  { %907 = vst.msk [vmem:[#allocation5 + $0x110] sm:$0xff] %vm514_vm12, %v903_v3  ;;  %v1033_v3 = vld [vmem:[%s5530_s8 + $0x20] sm:$0xff] }
 0x43d   :  { %v879_v40 = vpop.permute.xlu0 %878  ;;  %v922_v54 = vpop.permute.xlu2 %921 }
 0x43e   :  { %v881_v46 = vsel %vm472_vm6, %v877_v22, %v879_v40  ;;  %v910_v35 = vpop.permute.xlu1 %909  ;;  %v1076_v14 = vld [vmem:[#allocation5 + $0xf8] sm:$0xff]  ;;  %v1087_v40 = vld [vmem:[#allocation5 + $0x150] sm:$0xff]  ;;  %vm1307_vm6 = vcmask 261120  }
 0x43f   :  { %885 = vst.msk [vmem:[#allocation5 + $0x108] sm:$0xff] %vm514_vm12, %v881_v46  ;;  %1160 = vmatpush.msra.mxu3 %v1076_v14 }
 0x440   :  { %915 = vst.msk [vmem:[#allocation5 + $0x120] sm:$0xff] %vm503_vm11, %v910_v35  ;;  %v1037_v35 = vld [vmem:[%s5530_s8 + $0x40] sm:$0xff] }
 0x441   :  { %930 = vst.msk [vmem:[#allocation5 + $0x120] sm:$0xff] %vm514_vm12, %v926_v18  ;;  %1161 = vmatpush.msra.mxu3 %v1075_v48 }
 0x443   :  { %1162 = vmatpush.msra.mxu3 %v1074_v11 }
 0x445   :  { %v901_v52 = vpop.permute.xlu0 %900  ;;  %v935_v56 = vpop.permute.xlu2 %934  ;;  %1163 = vmatpush.msra.mxu3 %v1073_v21  ;;  %v1041_v21 = vld [vmem:[%s5530_s8 + $0x60] sm:$0xff] }
 0x446   :  { %v904_v1 = vsel %vm902_vm0, %v899_v62, %v901_v52  ;;  %939 = vst.msk [vmem:[#allocation5 + $0x138] sm:$0xff] %vm503_vm11, %v935_v56  ;;  %v933_v6 = vpop.permute.xlu1 %932  ;;  %v1079_v52 = vld [vmem:[#allocation5 + $0x110] sm:$0xff]  ;;  %v1078_v56 = vld [vmem:[#allocation5 + $0x108] sm:$0xff] }
 0x447   :  { %908 = vst.msk [vmem:[#allocation5 + $0x118] sm:$0xff] %vm514_vm12, %v904_v1  ;;  %1164 = vmatpush.msra.mxu3 %v1072_v41  ;;  %v1031_v1 = vld [vmem:[%s5530_s8 + $0x10] sm:$0xff]  ;;  %v1032_v41 = vld [vmem:[%s5530_s8 + $0x18] sm:$0xff] }
 0x448   :  { %938 = vst.msk [vmem:[#allocation5 + $0x130] sm:$0xff] %vm503_vm11, %v933_v6  ;;  %v1081_v48 = vld [vmem:[#allocation5 + $0x120] sm:$0xff] }
 0x449   :  { %953 = vst.msk [vmem:[#allocation5 + $0x130] sm:$0xff] %vm514_vm12, %v949_v4  ;;  %1165 = vmatpush.msra.mxu3 %v1071_v36  ;;  %v1077_v6 = vld [vmem:[#allocation5 + $0x100] sm:$0xff]  ;;  %v1035_v4 = vld [vmem:[%s5530_s8 + $0x30] sm:$0xff]  ;;  %v1036_v36 = vld [vmem:[%s5530_s8 + $0x38] sm:$0xff] }
 0x44b   :  { %1166 = vmatpush.msra.mxu3 %v1070_v5  ;;  %v1039_v5 = vld [vmem:[%s5530_s8 + $0x50] sm:$0xff] }
 0x44d   :  { %v924_v32 = vpop.permute.xlu0 %923  ;;  %v945_v57 = vpop.permute.xlu2 %944  ;;  %1167 = vmatpush.msra.mxu3 %v1069_v10  ;;  %v1040_v10 = vld [vmem:[%s5530_s8 + $0x58] sm:$0xff] }
 0x44e   :  { %v927_v24 = vsel %vm925_vm1, %v922_v54, %v924_v32  ;;  %v956_v9 = vpop.permute.xlu1 %955  ;;  %v1080_v11 = vld [vmem:[#allocation5 + $0x118] sm:$0xff]  ;;  %v1043_v32 = vld [vmem:[%s5530_s8 + $0x70] sm:$0xff] }
 0x44f   :  { %931 = vst.msk [vmem:[#allocation5 + $0x128] sm:$0xff] %vm514_vm12, %v927_v24  ;;  %1168 = vmatpush.msra.mxu3 %v1068_v23  ;;  %v4434_v24 = vpop.f32.mrf.mxu2 }
 0x450   :  { %961 = vst.msk [vmem:[#allocation5 + $0x140] sm:$0xff] %vm503_vm11, %v956_v9  ;;  %v1083_v14 = vld [vmem:[#allocation5 + $0x130] sm:$0xff] }
 0x451   :  { %969 = vst.msk [vmem:[#allocation5 + $0x140] sm:$0xff] %vm514_vm12, %v3872_v47  ;;  %1169 = vmatpush.msra.mxu3 %v1067_v0  ;;  %v1062_v47 = vld [vmem:[#allocation5 + $0x88] sm:$0xff] }
 0x453   :  { %1170 = vmatpush.msra.mxu3 %v1066_v17 }
 0x455   :  { %v947_v59 = vpop.permute.xlu0 %946  ;;  %v958_v8 = vpop.permute.xlu2 %957  ;;  %1171 = vmatpush.msra.mxu3 %v1065_v55 }
 0x456   :  { %v950_v13 = vsel %vm948_vm2, %v945_v57, %v947_v59  ;;  %962 = vst.msk [vmem:[#allocation5 + $0x148] sm:$0xff] %vm503_vm11, %v958_v8  ;;  %v1004_v43 = vpop.permute.xlu1 %1003  ;;  %v1082_v18 = vld [vmem:[#allocation5 + $0x128] sm:$0xff]  ;;  %v1044_v57 = vld [vmem:[%s5530_s8 + $0x78] sm:$0xff] }
 0x457   :  { %954 = vst.msk [vmem:[#allocation5 + $0x138] sm:$0xff] %vm514_vm12, %v950_v13  ;;  %1172 = vmatpush.msra.mxu3 %v1064_v12  ;;  %v4436_v9 = vpop.f32.mrf.mxu2 }
 0x458   :  { %1009 = vst.msk [vmem:[#allocation5 + $0x170] sm:$0xff] %vm503_vm11, %v1004_v43  ;;  %v1085_v54 = vld [vmem:[#allocation5 + $0x140] sm:$0xff] }
 0x459   :  { %1017 = vst.msk [vmem:[#allocation5 + $0x170] sm:$0xff] %vm514_vm12, %v3883_v50  ;;  %1173 = vmatpush.msra.mxu3 %v1063_v16  ;;  %v1034_v50 = vld [vmem:[%s5530_s8 + $0x28] sm:$0xff]  ;;  %s5693_s8 = smov 113  }
 0x45b   :  { %1174 = vmatpush.msra.mxu3 %v1062_v47 }
 0x45d   :  { %v998_v63 = vpop.permute.xlu0 %997  ;;  %v1006_v22 = vpop.permute.xlu2 %1005  ;;  %1175 = vmatpush.msra.mxu3 %v1061_v30 }
 0x45e   :  { %1010 = vst.msk [vmem:[#allocation5 + $0x178] sm:$0xff] %vm503_vm11, %v1006_v22  ;;  %v966_v26 = vpop.permute.xlu1 %965  ;;  %1176 = vmatmul.f32.vlgmr.msra.gmra.mxu3 %v1030_v49  ;;  %v1084_v46 = vld [vmem:[#allocation5 + $0x138] sm:$0xff] }
 0x45f   :  { %970 = vst.msk [vmem:[#allocation5 + $0x148] sm:$0xff] %vm514_vm12, %v966_v26  ;;  %v4438_v23 = vpop.f32.mrf.mxu2 }
 0x460   :  { %v1091_v58 = vld [vmem:[#allocation5 + $0x170] sm:$0xff] }
 0x465   :  { %v1024_v31 = vpop.permute.xlu0 %1023 }
 0x466   :  { %v1014_v53 = vpop.permute.xlu1 %1013  ;;  %1179 = vmatmul.f32.gmra.mxu3 %v1034_v50 }
 0x467   :  { %1018 = vst.msk [vmem:[#allocation5 + $0x178] sm:$0xff] %vm514_vm12, %v1014_v53  ;;  %v4440_v0 = vpop.f32.mrf.mxu2 }
 0x46d   :  { %v511_v15 = vpop.permute.xlu0 %510 }
 0x46e   :  { %516 = vst.msk [vmem:[#allocation5 + $0x8] sm:$0xff] %vm514_vm12, %v511_v15  ;;  %v990_v19 = vpop.permute.xlu1 %989  ;;  %v1092_v44 = vld [vmem:[#allocation5 + $0x178] sm:$0xff]  ;;  %1182 = vmatmul.f32.gmra.mxu3 %v1038_v60 }
 0x46f   :  { %1020 = vst.msk [vmem:[#allocation5 + $0x188] sm:$0xff] %vm503_vm11, %v511_v15  ;;  %1189 = vmatpush.msra.mxu0 %v1092_v44 }
 0x470   :  { %1028 = vst.msk [vmem:[#allocation5 + $0x188] sm:$0xff] %vm514_vm12, %v1024_v31 }
 0x471   :  { %994 = vst.msk [vmem:[#allocation5 + $0x168] sm:$0xff] %vm503_vm11, %v990_v19  ;;  %1190 = vmatpush.msra.mxu0 %v1091_v58 }
 0x472   :  { %1002 = vst.msk [vmem:[#allocation5 + $0x168] sm:$0xff] %vm514_vm12, %v998_v63 }
 0x475   :  { %v974_v38 = vpop.permute.xlu0 %973  ;;  %v1046_v62 = vld [vmem:[#allocation5 + $0x8] sm:$0xff] }
 0x476   :  { %978 = vst.msk [vmem:[#allocation5 + $0x158] sm:$0xff] %vm503_vm11, %v974_v38  ;;  %1145 = vmatpush.msra.mxu2 %v1046_v62  ;;  %1185 = vmatmul.f32.gmra.mxu3 %v1042_v25  ;;  %v1117_v62 = vpop.permute.xlu1 %1116 }
 0x477   :  { %986 = vst.msk [vmem:[#allocation5 + $0x158] sm:$0xff] %vm514_vm12, %v3885_v51  ;;  %v1094_v37 = vld [vmem:[#allocation5 + $0x188] sm:$0xff] }
 0x478   :  { %1146 = vmatpush.msra.mxu2 %v1045_v61  ;;  %v1086_v51 = vld [vmem:[#allocation5 + $0x148] sm:$0xff] }
 0x479   :  { %v1090_v20 = vld [vmem:[#allocation5 + $0x168] sm:$0xff]  ;;  %1147 = vmatmul.f32.vlgmr.msra.gmra.mxu2 %v1029_v7 }
 0x47a   :  { %1191 = vmatpush.msra.mxu0 %v1090_v20  ;;  %1232 = vmatpush.msrb.mxu2 %v1094_v37 }
 0x47c   :  { %1192 = vmatpush.msra.mxu0 %v1089_v45  ;;  %1233 = vmatpush.msrb.mxu2 %v1093_v42 }
 0x47d   :  { %v1112_v53 = vpop.permute.xlu0 %1111 }
 0x47e   :  { %v1088_v39 = vld [vmem:[#allocation5 + $0x158] sm:$0xff] }
 0x47f   :  { %1193 = vmatpush.msra.mxu0 %v1088_v39 }
 0x481   :  { %1150 = vmatmul.f32.gmra.mxu2 %v1033_v3  ;;  %1194 = vmatpush.msra.mxu0 %v1087_v40 }
 0x483   :  { %1195 = vmatpush.msra.mxu0 %v1086_v51 }
 0x485   :  { %1196 = vmatpush.msra.mxu0 %v1085_v54 }
 0x487   :  { %1197 = vmatpush.msra.mxu0 %v1084_v46  ;;  %v1251_v46 = vld [vmem:[%s5532_s10] sm:$0xff] }
 0x489   :  { %1153 = vmatmul.f32.gmra.mxu2 %v1037_v35  ;;  %1198 = vmatpush.msra.mxu0 %v1083_v14  ;;  %v1252_v35 = vld [vmem:[%s5532_s10 + $0x8] sm:$0xff]  ;;  %v1253_v14 = vld [vmem:[%s5532_s10 + $0x10] sm:$0xff] }
 0x48b   :  { %1199 = vmatpush.msra.mxu0 %v1082_v18  ;;  %v1254_v18 = vld [vmem:[%s5532_s10 + $0x18] sm:$0xff] }
 0x48d   :  { %1200 = vmatpush.msra.mxu0 %v1081_v48  ;;  %v3274_v48 = vld [vmem:[#allocation6] sm:$0xff] }
 0x48f   :  { %1201 = vmatpush.msra.mxu0 %v1080_v11  ;;  %v1255_v11 = vld [vmem:[%s5532_s10 + $0x20] sm:$0xff] }
 0x491   :  { %1156 = vmatmul.f32.gmra.mxu2 %v1041_v21  ;;  %1202 = vmatpush.msra.mxu0 %v1079_v52  ;;  %v4471_v21 = vpop.permute.xlu2 %1269  ;;  %v1256_v52 = vld [vmem:[%s5532_s10 + $0x28] sm:$0xff] }
 0x493   :  { %1203 = vmatpush.msra.mxu0 %v1078_v56 }
 0x495   :  { %1204 = vmatpush.msra.mxu0 %v1077_v6 }
 0x496   :  { %1205 = vmatmul.f32.vlgmr.msra.gmra.mxu0 %v1031_v1  ;;  %v1257_v1 = vld [vmem:[%s5532_s10 + $0x30] sm:$0xff] }
 0x499   :  { %3114 = vmatmul.msk.f32.vlgmr.msrb.gmra.mxu2 %vm405_vm7, %v1032_v41  ;;  %v4478_v56 = vpop.permute.xlu2 %1284  ;;  %v1258_v41 = vld [vmem:[%s5532_s10 + $0x38] sm:$0xff]  ;;  %s5647_s10 = smov 53  }
 0x49e   :  { %1208 = vmatmul.f32.gmra.mxu0 %v1035_v4 }
 0x4a1   :  { %3115 = vmatmul.msk.f32.gmra.mxu2 %vm405_vm7, %v1036_v36  ;;  %v4484_v6 = vpop.permute.xlu2 %1299  ;;  %v4491_v36 = vpop.permute.xlu0 %1274 }
 0x4a6   :  { %1211 = vmatmul.f32.gmra.mxu0 %v1039_v5  ;;  %v4493_v5 = vpop.permute.xlu1 %1279 }
 0x4a9   :  { %3116 = vmatmul.msk.f32.gmra.mxu2 %vm405_vm7, %v1040_v10 }
 0x4ae   :  { %1214 = vmatmul.f32.gmra.mxu0 %v1043_v32 }
 0x4b1   :  { %3117 = vmatmul.msk.f32.gmra.mxu2 %vm405_vm7, %v1044_v57  ;;  %vm1374_vm7 = vcmask 785408   ;;  %v4500_v57 = vpop.permute.xlu0 %1289 }
 0x4b2   :  { %1375 = vst.msk [vmem:[#allocation6 + $0x8] sm:$0xff] %vm1374_vm7, %v3274_v48 }
 0x4b3   :  { %1377 = vst.msk [vmem:[#allocation6 + $0x18] sm:$0xff] %vm1374_vm7, %v3274_v48 }
 0x4b4   :  { %1379 = vst.msk [vmem:[#allocation6 + $0x28] sm:$0xff] %vm1374_vm7, %v3274_v48 }
 0x4b5   :  { %1381 = vst.msk [vmem:[#allocation6 + $0x38] sm:$0xff] %vm1374_vm7, %v3274_v48 }
 0x4e1   :  { %v1177_v8 = vpop.f32.mrf.mxu3 }
 0x4e9   :  { %v1180_v47 = vpop.f32.mrf.mxu3 }
 0x4f1   :  { %v1183_v15 = vpop.f32.mrf.mxu3 }
 0x4f9   :  { %v1186_v37 = vpop.f32.mrf.mxu3 }
 0x4fc   :  { %v1148_v17 = vpop.f32.mrf.mxu2 }
 0x4fd   :  { %v1149_v12 = vadd.f32 %v1148_v17, %v3759_v34  ;;  %v4502_v17 = vpop.permute.xlu1 %1294 }
 0x4ff   :  { %v1178_v16 = vadd.f32 %v1177_v8, %v1149_v12 }
 0x504   :  { %v1151_v55 = vpop.f32.mrf.mxu2 }
 0x505   :  { %v1152_v22 = vadd.f32 %v1151_v55, %v3757_v33 }
 0x507   :  { %v1181_v31 = vadd.f32 %v1180_v47, %v1152_v22 }
 0x50c   :  { %v1154_v59 = vpop.f32.mrf.mxu2 }
 0x50d   :  { %v1155_v44 = vadd.f32 %v1154_v59, %v1112_v53  ;;  %v4510_v59 = vpop.permute.xlu0 %1304 }
 0x50f   :  { %v1184_v38 = vadd.f32 %v1183_v15, %v1155_v44 }
 0x513   :  { %v1206_v13 = vpop.f32.mrf.mxu0 }
 0x514   :  { %v1157_v43 = vpop.f32.mrf.mxu2  ;;  %v1207_v30 = vadd.f32 %v1206_v13, %v1178_v16 }
 0x515   :  { %v1158_v61 = vadd.f32 %v1157_v43, %v1117_v62 }
 0x517   :  { %v1187_v39 = vadd.f32 %v1186_v37, %v1158_v61 }
 0x51b   :  { %v1209_v49 = vpop.f32.mrf.mxu0 }
 0x51c   :  { %v1235_v63 = vpop.f32.mrf.mxu2  ;;  %v1210_v60 = vadd.f32 %v1209_v49, %v1181_v31 }
 0x51d   :  { %v1236_v26 = vadd.f32 %v1235_v63, %v1207_v30 }
 0x51f   :  { %v1247_v50 = vmax.f32 %v1236_v26, 0.0 }
 0x521   :  { %1403 = vrot.lane.b32.xlu2 %v1247_v50, %s5666_s20  ;;  %1386 = vrot.lane.b32.xlu1 %v1247_v50, %s5684_s5 }
 0x523   :  { %v1212_v58 = vpop.f32.mrf.mxu0 }
 0x524   :  { %v1238_v19 = vpop.f32.mrf.mxu2  ;;  %v1213_v33 = vadd.f32 %v1212_v58, %v1184_v38 }
 0x525   :  { %v1239_v34 = vadd.f32 %v1238_v19, %v1210_v60 }
 0x527   :  { %v1248_v25 = vmax.f32 %v1239_v34, 0.0 }
 0x529   :  { %1405 = vrot.lane.b32.xlu0 %v1248_v25, %s5666_s20  ;;  %1388 = vrot.lane.b32.xlu2 %v1248_v25, %s5684_s5 }
 0x52b   :  { %v1215_v42 = vpop.f32.mrf.mxu0 }
 0x52c   :  { %v1241_v7 = vpop.f32.mrf.mxu2  ;;  %v1216_v3 = vadd.f32 %v1215_v42, %v1187_v39 }
 0x52d   :  { %v1242_v20 = vadd.f32 %v1241_v7, %v1213_v33 }
 0x52f   :  { %v1249_v45 = vmax.f32 %v1242_v20, 0.0 }
 0x531   :  { %1390 = vrot.lane.b32.xlu0 %v1249_v45, %s5684_s5  ;;  %1407 = vrot.lane.b32.xlu1 %v1249_v45, %s5666_s20 }
 0x534   :  { %v1244_v40 = vpop.f32.mrf.mxu2 }
 0x535   :  { %v1245_v51 = vadd.f32 %v1244_v40, %v1216_v3 }
 0x537   :  { %v1250_v54 = vmax.f32 %v1245_v51, 0.0 }
 0x539   :  { %1344 = vmatpush.msrb.mxu3 %v1250_v54  ;;  %1409 = vrot.lane.b32.xlu2 %v1250_v54, %s5666_s20  ;;  %s5650_s20 = smov 47  }
 0x53a   :  { %1392 = vrot.lane.b32.xlu1 %v1250_v54, %s5684_s5  ;;  %s5690_s5 = smov 125  }
 0x53b   :  { %1345 = vmatpush.msrb.mxu3 %v1249_v45 }
 0x53d   :  { %1346 = vmatpush.msrb.mxu3 %v1248_v25 }
 0x53f   :  { %1347 = vmatpush.msrb.mxu3 %v1247_v50 }
 0x540   :  { %3118 = vmatmul.msk.f32.vlgmr.msrb.gmra.mxu3 %vm1307_vm6, %v1251_v46 }
 0x548   :  { %3119 = vmatmul.msk.f32.gmra.mxu3 %vm1307_vm6, %v1252_v35 }
 0x550   :  { %3120 = vmatmul.msk.f32.gmra.mxu3 %vm1307_vm6, %v1253_v14 }
 0x558   :  { %3121 = vmatmul.msk.f32.gmra.mxu3 %vm1307_vm6, %v1254_v18 }
 0x560   :  { %3122 = vmatmul.msk.f32.gmra.mxu3 %vm1307_vm6, %v1255_v11 }
 0x568   :  { %3123 = vmatmul.msk.f32.gmra.mxu3 %vm1307_vm6, %v1256_v52 }
 0x570   :  { %3124 = vmatmul.msk.f32.gmra.mxu3 %vm1307_vm6, %v1257_v1 }
 0x578   :  { %3125 = vmatmul.msk.f32.gmra.mxu3 %vm1307_vm6, %v1258_v41 }
 0x57b   :  { %v1404_v4 = vpop.permute.xlu2 %1403 }
 0x57c   :  { %1416 = vst.msk [vmem:[#allocation6 + $0x8] sm:$0xff] %vm1415_vm3, %v1404_v4 }
 0x583   :  { %v4495_v10 = vld [vmem:[#allocation6 + $0x8] sm:$0xff]  ;;  %v1389_v32 = vpop.permute.xlu2 %1388 }
 0x584   :  { %1400 = vst.msk [vmem:[#allocation6 + $0x10] sm:$0xff] %vm1398_vm4, %v1389_v32  ;;  %1442 = vrot.lane.b32.xlu1 %v4495_v10, %s5670_s24 }
 0x58b   :  { %v4504_v55 = vld [vmem:[#allocation6 + $0x10] sm:$0xff] }
 0x58c   :  { %1429 = vst.msk [vmem:[#allocation7 + $0x8] sm:$0xff] %vm503_vm11, %v4504_v55  ;;  %1486 = vrot.lane.b32.xlu1 %v4495_v10, %s5647_s10 }
 0x593   :  { %v1410_v8 = vpop.permute.xlu2 %1409  ;;  %v1387_v13 = vpop.permute.xlu1 %1386 }
 0x594   :  { %1419 = vst.msk [vmem:[#allocation6 + $0x38] sm:$0xff] %vm1415_vm3, %v1410_v8  ;;  %1531 = vrot.lane.b32.xlu1 %v4495_v10, %s5676_s6 }
 0x595   :  { %1399 = vst.msk [vmem:[#allocation6] sm:$0xff] %vm1398_vm4, %v1387_v13 }
 0x59b   :  { %v1406_v43 = vpop.permute.xlu0 %1405 }
 0x59c   :  { %v4516_v12 = vld [vmem:[#allocation6] sm:$0xff]  ;;  %1417 = vst.msk [vmem:[#allocation6 + $0x18] sm:$0xff] %vm1415_vm3, %v1406_v43  ;;  %1575 = vrot.lane.b32.xlu1 %v4495_v10, %s5650_s20 }
 0x59d   :  { %1428 = vst.msk [vmem:[#allocation7] sm:$0xff] %vm503_vm11, %v4516_v12  ;;  %1468 = vrot.lane.b32.xlu2 %v4516_v12, %s5690_s5  ;;  %1440 = vrot.lane.b32.xlu0 %v4516_v12, %s5670_s24 }
 0x5a3   :  { %v1391_v16 = vpop.permute.xlu0 %1390  ;;  %v1408_v47 = vpop.permute.xlu1 %1407  ;;  %v4592_v22 = vld [vmem:[#allocation6 + $0x18] sm:$0xff] }
 0x5a4   :  { %1401 = vst.msk [vmem:[#allocation6 + $0x20] sm:$0xff] %vm1398_vm4, %v1391_v16  ;;  %1620 = vrot.lane.b32.xlu1 %v4495_v10, %s5643_s26 }
 0x5a5   :  { %1418 = vst.msk [vmem:[#allocation6 + $0x28] sm:$0xff] %vm1415_vm3, %v1408_v47  ;;  %1513 = vrot.lane.b32.xlu2 %v4516_v12, %s5641_s15  ;;  %1484 = vrot.lane.b32.xlu0 %v4516_v12, %s5647_s10 }
 0x5ab   :  { %v4535_v30 = vld [vmem:[#allocation6 + $0x20] sm:$0xff] }
 0x5ac   :  { %1430 = vst.msk [vmem:[#allocation7 + $0x10] sm:$0xff] %vm503_vm11, %v4535_v30  ;;  %v1393_v49 = vpop.permute.xlu1 %1392  ;;  %1664 = vrot.lane.b32.xlu1 %v4495_v10, %s5633_s19 }
 0x5ad   :  { %1402 = vst.msk [vmem:[#allocation6 + $0x30] sm:$0xff] %vm1398_vm4, %v1393_v49  ;;  %1557 = vrot.lane.b32.xlu2 %v4516_v12, %s5691_s21  ;;  %1529 = vrot.lane.b32.xlu0 %v4516_v12, %s5676_s6 }
 0x5b4   :  { %v4546_v63 = vld [vmem:[#allocation6 + $0x30] sm:$0xff]  ;;  %1851 = vrot.lane.b32.xlu1 %v4516_v12, %s5692_s4 }
 0x5b5   :  { %1431 = vst.msk [vmem:[#allocation7 + $0x18] sm:$0xff] %vm503_vm11, %v4546_v63  ;;  %1602 = vrot.lane.b32.xlu2 %v4516_v12, %s5625_s22  ;;  %1573 = vrot.lane.b32.xlu0 %v4516_v12, %s5650_s20  ;;  %s5698_s22 = smov 83  }
 0x5bc   :  { %1739 = vrot.lane.b32.xlu1 %v4495_v10, %s5623_s17  ;;  %s5627_s17 = smov 29  }
 0x5bd   :  { %1646 = vrot.lane.b32.xlu2 %v4516_v12, %s5693_s8  ;;  %1618 = vrot.lane.b32.xlu0 %v4516_v12, %s5643_s26 }
 0x5c4   :  { %1787 = vrot.lane.b32.xlu1 %v4516_v12, %s5694_s11 }
 0x5c5   :  { %1691 = vrot.lane.b32.xlu2 %v4516_v12, %s5665_s27  ;;  %1662 = vrot.lane.b32.xlu0 %v4516_v12, %s5633_s19  ;;  %s5699_s19 = smov 127  }
 0x5cc   :  { %1771 = vrot.lane.b32.xlu1 %v4495_v10, %s5686_s18 }
 0x5cd   :  { %1723 = vrot.lane.b32.xlu2 %v4516_v12, %s5695_s23  ;;  %1707 = vrot.lane.b32.xlu0 %v4495_v10, %s5696_s28 }
 0x5d4   :  { %2235 = vrot.lane.b32.xlu1 %v4516_v12, %s5637_s9 }
 0x5d5   :  { %1835 = vrot.lane.b32.xlu2 %v4495_v10, %s5629_s16  ;;  %1867 = vrot.lane.b32.xlu0 %v4495_v10, %s5631_s1  ;;  %s5645_s16 = smov 14   ;;  %s5639_s1 = smov 71  }
 0x5dc   :  { %2251 = vrot.lane.b32.xlu1 %v4495_v10, %s5697_s12 }
 0x5dd   :  { %1803 = vrot.lane.b32.xlu2 %v4495_v10, %s5627_s17  ;;  %1819 = vrot.lane.b32.xlu0 %v4516_v12, %s5675_s29  ;;  %s5635_s17 = smov 11  }
 0x5e4   :  { %1725 = vrot.lane.b32.xlu1 %v4504_v55, %s5695_s23 }
 0x5e5   :  { %1979 = vrot.lane.b32.xlu2 %v4516_v12, %s5698_s22  ;;  %1755 = vrot.lane.b32.xlu0 %v4516_v12, %s5669_s7 }
 0x5ec   :  { %1709 = vrot.lane.b32.xlu1 %v4592_v22, %s5696_s28 }
 0x5ed   :  { %1947 = vrot.lane.b32.xlu2 %v4516_v12, %s5689_s25  ;;  %1995 = vrot.lane.b32.xlu0 %v4495_v10, %s5635_s17 }
 0x5f4   :  { %1757 = vrot.lane.b32.xlu1 %v4504_v55, %s5669_s7 }
 0x5f5   :  { %1963 = vrot.lane.b32.xlu2 %v4495_v10, %s5645_s16  ;;  %2107 = vrot.lane.b32.xlu0 %v4516_v12, %s5639_s1  ;;  %s5702_s1 = smov 26  }
 0x5f6   :  { %v1443_v26 = vpop.permute.xlu1 %1442 }
 0x5f7   :  { %v1469_v50 = vpop.permute.xlu2 %1468 }
 0x5f8   :  { %1480 = vst.msk [vmem:[#allocation7 + $0x20] sm:$0xff] %vm503_vm11, %v1469_v50 }
 0x5fc   :  { %1997 = vrot.lane.b32.xlu1 %v4592_v22, %s5635_s17  ;;  %s5700_s17 = smov 41  }
 0x5fd   :  { %1444 = vrot.lane.b32.xlu2 %v4504_v55, %s5670_s24  ;;  %2123 = vrot.lane.b32.xlu0 %v4495_v10, %s5699_s19 }
 0x5fe   :  { %v1487_v31 = vpop.permute.xlu1 %1486 }
 0x5ff   :  { %v1514_v53 = vpop.permute.xlu2 %1513 }
 0x600   :  { %1525 = vst.msk [vmem:[#allocation7 + $0x40] sm:$0xff] %vm503_vm11, %v1514_v53  ;;  %v4724_v53 = vld [vmem:[#allocation6 + $0x28] sm:$0xff] }
 0x604   :  { %2237 = vrot.lane.b32.xlu1 %v4504_v55, %s5637_s9  ;;  %s5701_s9 = smov 23  }
 0x605   :  { %1488 = vrot.lane.b32.xlu2 %v4504_v55, %s5647_s10  ;;  %1446 = vrot.lane.b32.xlu0 %v4592_v22, %s5670_s24 }
 0x606   :  { %v1532_v60 = vpop.permute.xlu1 %1531 }
 0x607   :  { %v1558_v15 = vpop.permute.xlu2 %1557 }
 0x608   :  { %1569 = vst.msk [vmem:[#allocation7 + $0x60] sm:$0xff] %vm503_vm11, %v1558_v15 }
 0x60c   :  { %2253 = vrot.lane.b32.xlu1 %v4592_v22, %s5697_s12 }
 0x60d   :  { %1533 = vrot.lane.b32.xlu2 %v4504_v55, %s5676_s6  ;;  %1470 = vrot.lane.b32.xlu0 %v4504_v55, %s5690_s5 }
 0x60e   :  { %v1576_v19 = vpop.permute.xlu1 %1575 }
 0x60f   :  { %v1603_v44 = vpop.permute.xlu2 %1602  ;;  %v1441_v34 = vpop.permute.xlu0 %1440 }
 0x610   :  { %1614 = vst.msk [vmem:[#allocation7 + $0x80] sm:$0xff] %vm503_vm11, %v1603_v44  ;;  %v1456_v58 = vsel %vm788_vm10, %v1441_v34, %v1443_v26 }
 0x611   :  { %1464 = vst.msk [vmem:[#allocation7] sm:$0xff] %vm514_vm12, %v1456_v58 }
 0x612   :  { %2271 = vst.msk [vmem:[#allocation7 + $0x300] sm:$0xff] %vm503_vm11, %v1441_v34 }
 0x614   :  { %1448 = vrot.lane.b32.xlu1 %v4535_v30, %s5670_s24 }
 0x615   :  { %1577 = vrot.lane.b32.xlu2 %v4504_v55, %s5650_s20  ;;  %1490 = vrot.lane.b32.xlu0 %v4592_v22, %s5647_s10 }
 0x616   :  { %v1621_v25 = vpop.permute.xlu1 %1620 }
 0x617   :  { %v1647_v38 = vpop.permute.xlu2 %1646  ;;  %v1485_v33 = vpop.permute.xlu0 %1484 }
 0x618   :  { %1658 = vst.msk [vmem:[#allocation7 + $0xa0] sm:$0xff] %vm503_vm11, %v1647_v38  ;;  %v1501_v62 = vsel %vm1500_vm5, %v1485_v33, %v1487_v31 }
 0x619   :  { %1509 = vst.msk [vmem:[#allocation7 + $0x20] sm:$0xff] %vm514_vm12, %v1501_v62 }
 0x61c   :  { %1472 = vrot.lane.b32.xlu1 %v4535_v30, %s5690_s5 }
 0x61d   :  { %1622 = vrot.lane.b32.xlu2 %v4504_v55, %s5643_s26  ;;  %1515 = vrot.lane.b32.xlu0 %v4504_v55, %s5641_s15 }
 0x61e   :  { %v1665_v7 = vpop.permute.xlu1 %1664 }
 0x61f   :  { %v1692_v61 = vpop.permute.xlu2 %1691  ;;  %v1530_v20 = vpop.permute.xlu0 %1529 }
 0x620   :  { %1703 = vst.msk [vmem:[#allocation7 + $0xc0] sm:$0xff] %vm503_vm11, %v1692_v61  ;;  %v1545_v37 = vsel %vm857_vm15, %v1530_v20, %v1532_v60 }
 0x621   :  { %1553 = vst.msk [vmem:[#allocation7 + $0x40] sm:$0xff] %vm514_vm12, %v1545_v37 }
 0x624   :  { %1492 = vrot.lane.b32.xlu1 %v4535_v30, %s5647_s10 }
 0x625   :  { %1666 = vrot.lane.b32.xlu2 %v4504_v55, %s5700_s17  ;;  %1535 = vrot.lane.b32.xlu0 %v4592_v22, %s5676_s6 }
 0x626   :  { %v1852_v45 = vpop.permute.xlu1 %1851 }
 0x627   :  { %v1724_v42 = vpop.permute.xlu2 %1723  ;;  %v1574_v39 = vpop.permute.xlu0 %1573  ;;  %1863 = vst.msk [vmem:[#allocation7 + $0x160] sm:$0xff] %vm503_vm11, %v1852_v45 }
 0x628   :  { %1735 = vst.msk [vmem:[#allocation7 + $0xe0] sm:$0xff] %vm503_vm11, %v1724_v42  ;;  %v1590_v3 = vsel %vm1589_vm8, %v1574_v39, %v1576_v19 }
 0x629   :  { %1598 = vst.msk [vmem:[#allocation7 + $0x60] sm:$0xff] %vm514_vm12, %v1590_v3 }
 0x62c   :  { %1517 = vrot.lane.b32.xlu1 %v4535_v30, %s5641_s15  ;;  %s5703_s15 = smov 116  }
 0x62d   :  { %1869 = vrot.lane.b32.xlu2 %v4592_v22, %s5701_s9  ;;  %1559 = vrot.lane.b32.xlu0 %v4504_v55, %s5691_s21 }
 0x62e   :  { %v1740_v40 = vpop.permute.xlu1 %1739 }
 0x62f   :  { %v1836_v51 = vpop.permute.xlu2 %1835  ;;  %v1619_v54 = vpop.permute.xlu0 %1618  ;;  %1751 = vst.msk [vmem:[#allocation7 + $0xe0] sm:$0xff] %vm514_vm12, %v1740_v40 }
 0x630   :  { %v1634_v46 = vsel %vm925_vm1, %v1619_v54, %v1621_v25 }
 0x631   :  { %1642 = vst.msk [vmem:[#allocation7 + $0x80] sm:$0xff] %vm514_vm12, %v1634_v46 }
 0x634   :  { %1537 = vrot.lane.b32.xlu1 %v4535_v30, %s5676_s6 }
 0x635   :  { %1837 = vrot.lane.b32.xlu2 %v4592_v22, %s5702_s1  ;;  %1579 = vrot.lane.b32.xlu0 %v4592_v22, %s5650_s20 }
 0x636   :  { %v1788_v35 = vpop.permute.xlu1 %1787 }
 0x637   :  { %v1804_v14 = vpop.permute.xlu2 %1803  ;;  %v1663_v18 = vpop.permute.xlu0 %1662  ;;  %1799 = vst.msk [vmem:[#allocation7 + $0x120] sm:$0xff] %vm503_vm11, %v1788_v35 }
 0x638   :  { %v1679_v48 = vsel %vm1678_vm9, %v1663_v18, %v1665_v7  ;;  %1815 = vst.msk [vmem:[#allocation7 + $0x120] sm:$0xff] %vm514_vm12, %v1804_v14 }
 0x639   :  { %1687 = vst.msk [vmem:[#allocation7 + $0xa0] sm:$0xff] %vm514_vm12, %v1679_v48 }
 0x63c   :  { %1561 = vrot.lane.b32.xlu1 %v4535_v30, %s5691_s21 }
 0x63d   :  { %1789 = vrot.lane.b32.xlu2 %v4504_v55, %s5694_s11  ;;  %1604 = vrot.lane.b32.xlu0 %v4504_v55, %s5703_s15 }
 0x63e   :  { %v1772_v11 = vpop.permute.xlu1 %1771 }
 0x63f   :  { %v1980_v52 = vpop.permute.xlu2 %1979  ;;  %v1708_v1 = vpop.permute.xlu0 %1707 }
 0x640   :  { %1991 = vst.msk [vmem:[#allocation7 + $0x1e0] sm:$0xff] %vm503_vm11, %v1980_v52  ;;  %v4808_v52 = vld [vmem:[#allocation6 + $0x38] sm:$0xff] }
 0x641   :  { %1719 = vst.msk [vmem:[#allocation7 + $0xc0] sm:$0xff] %vm514_vm12, %v1708_v1 }
 0x644   :  { %1581 = vrot.lane.b32.xlu1 %v4535_v30, %s5650_s20 }
 0x645   :  { %1773 = vrot.lane.b32.xlu2 %v4592_v22, %s5686_s18  ;;  %1624 = vrot.lane.b32.xlu0 %v4592_v22, %s5643_s26 }
 0x646   :  { %v2236_v41 = vpop.permute.xlu1 %2235 }
 0x647   :  { %v1948_v4 = vpop.permute.xlu2 %1947  ;;  %v1868_v32 = vpop.permute.xlu0 %1867  ;;  %2247 = vst.msk [vmem:[#allocation7 + $0x2e0] sm:$0xff] %vm503_vm11, %v2236_v41 }
 0x648   :  { %1959 = vst.msk [vmem:[#allocation7 + $0x1c0] sm:$0xff] %vm503_vm11, %v1948_v4 }
 0x649   :  { %1879 = vst.msk [vmem:[#allocation7 + $0x160] sm:$0xff] %vm514_vm12, %v1868_v32 }
 0x64c   :  { %1606 = vrot.lane.b32.xlu1 %v4535_v30, %s5703_s15 }
 0x64d   :  { %1949 = vrot.lane.b32.xlu2 %v4504_v55, %s5689_s25  ;;  %1648 = vrot.lane.b32.xlu0 %v4504_v55, %s5693_s8 }
 0x64e   :  { %v2252_v8 = vpop.permute.xlu1 %2251 }
 0x64f   :  { %v1964_v13 = vpop.permute.xlu2 %1963  ;;  %v1820_v43 = vpop.permute.xlu0 %1819  ;;  %2263 = vst.msk [vmem:[#allocation7 + $0x2e0] sm:$0xff] %vm514_vm12, %v2252_v8 }
 0x650   :  { %1975 = vst.msk [vmem:[#allocation7 + $0x1c0] sm:$0xff] %vm514_vm12, %v1964_v13 }
 0x651   :  { %1831 = vst.msk [vmem:[#allocation7 + $0x140] sm:$0xff] %vm503_vm11, %v1820_v43 }
 0x652   :  { %1847 = vst.msk [vmem:[#allocation7 + $0x140] sm:$0xff] %vm514_vm12, %v1836_v51 }
 0x654   :  { %1626 = vrot.lane.b32.xlu1 %v4535_v30, %s5643_s26  ;;  %s5704_s26 = smov 89  }
 0x655   :  { %1965 = vrot.lane.b32.xlu2 %v4592_v22, %s5645_s16  ;;  %1668 = vrot.lane.b32.xlu0 %v4592_v22, %s5700_s17  ;;  %s5705_s16 = smov 35  }
 0x656   :  { %v1726_v16 = vpop.permute.xlu1 %1725 }
 0x657   :  { %v1445_v47 = vpop.permute.xlu2 %1444  ;;  %v1756_v49 = vpop.permute.xlu0 %1755  ;;  %1736 = vst.msk [vmem:[#allocation7 + $0xe8] sm:$0xff] %vm503_vm11, %v1726_v16 }
 0x658   :  { %2272 = vst.msk [vmem:[#allocation7 + $0x308] sm:$0xff] %vm503_vm11, %v1445_v47 }
 0x659   :  { %1767 = vst.msk [vmem:[#allocation7 + $0x100] sm:$0xff] %vm503_vm11, %v1756_v49 }
 0x65a   :  { %1783 = vst.msk [vmem:[#allocation7 + $0x100] sm:$0xff] %vm514_vm12, %v1772_v11 }
 0x65c   :  { %1650 = vrot.lane.b32.xlu1 %v4535_v30, %s5693_s8 }
 0x65d   :  { %1917 = vrot.lane.b32.xlu2 %v4504_v55, %s5704_s26  ;;  %1693 = vrot.lane.b32.xlu0 %v4504_v55, %s5665_s27 }
 0x65e   :  { %v4721_v26 = vpop.permute.xlu1 %1709 }
 0x65f   :  { %v1489_v50 = vpop.permute.xlu2 %1488  ;;  %v1996_v31 = vpop.permute.xlu0 %1995 }
 0x660   :  { %2007 = vst.msk [vmem:[#allocation7 + $0x1e0] sm:$0xff] %vm514_vm12, %v1996_v31 }
 0x664   :  { %1670 = vrot.lane.b32.xlu1 %v4535_v30, %s5700_s17 }
 0x665   :  { %1853 = vrot.lane.b32.xlu0 %v4504_v55, %s5692_s4  ;;  %1450 = vrot.lane.b32.xlu2 %v4724_v53, %s5670_s24 }
 0x666   :  { %v1758_v60 = vpop.permute.xlu1 %1757 }
 0x667   :  { %v1534_v15 = vpop.permute.xlu2 %1533  ;;  %v2108_v19 = vpop.permute.xlu0 %2107  ;;  %1768 = vst.msk [vmem:[#allocation7 + $0x108] sm:$0xff] %vm503_vm11, %v1758_v60 }
 0x668   :  { %2119 = vst.msk [vmem:[#allocation7 + $0x260] sm:$0xff] %vm503_vm11, %v2108_v19 }
 0x66c   :  { %1695 = vrot.lane.b32.xlu1 %v4535_v30, %s5665_s27 }
 0x66d   :  { %1741 = vrot.lane.b32.xlu0 %v4592_v22, %s5705_s16  ;;  %1494 = vrot.lane.b32.xlu2 %v4724_v53, %s5647_s10  ;;  %s5706_s10 = smov 29  }
 0x66e   :  { %v4740_v44 = vpop.permute.xlu1 %1997 }
 0x66f   :  { %v4742_v34 = vpop.permute.xlu2 %1577  ;;  %v2124_v58 = vpop.permute.xlu0 %2123 }
 0x670   :  { %2135 = vst.msk [vmem:[#allocation7 + $0x260] sm:$0xff] %vm514_vm12, %v2124_v58 }
 0x674   :  { %1871 = vrot.lane.b32.xlu1 %v4724_v53, %s5701_s9 }
 0x675   :  { %1821 = vrot.lane.b32.xlu0 %v4504_v55, %s5675_s29  ;;  %1539 = vrot.lane.b32.xlu2 %v4724_v53, %s5676_s6 }
 0x676   :  { %v2238_v25 = vpop.permute.xlu1 %2237 }
 0x677   :  { %v4751_v38 = vpop.permute.xlu2 %1622  ;;  %v1447_v33 = vpop.permute.xlu0 %1446  ;;  %2248 = vst.msk [vmem:[#allocation7 + $0x2e8] sm:$0xff] %vm503_vm11, %v2238_v25 }
 0x678   :  { %v1457_v62 = vsel %vm788_vm10, %v1445_v47, %v1447_v33 }
 0x679   :  { %1465 = vst.msk [vmem:[#allocation7 + $0x8] sm:$0xff] %vm514_vm12, %v1457_v62 }
 0x67c   :  { %1711 = vrot.lane.b32.xlu1 %v4724_v53, %s5696_s28 }
 0x67d   :  { %1805 = vrot.lane.b32.xlu0 %v4592_v22, %s5706_s10  ;;  %1583 = vrot.lane.b32.xlu2 %v4724_v53, %s5650_s20  ;;  %s5708_s20 = smov 71  }
 0x67e   :  { %v2254_v7 = vpop.permute.xlu1 %2253 }
 0x67f   :  { %v4762_v61 = vpop.permute.xlu2 %1666  ;;  %v1471_v20 = vpop.permute.xlu0 %1470  ;;  %2264 = vst.msk [vmem:[#allocation7 + $0x2e8] sm:$0xff] %vm514_vm12, %v2254_v7 }
 0x680   :  { %1481 = vst.msk [vmem:[#allocation7 + $0x28] sm:$0xff] %vm503_vm11, %v1471_v20 }
 0x684   :  { %1807 = vrot.lane.b32.xlu1 %v4724_v53, %s5706_s10 }
 0x685   :  { %1981 = vrot.lane.b32.xlu0 %v4504_v55, %s5698_s22  ;;  %1628 = vrot.lane.b32.xlu2 %v4724_v53, %s5707_s14 }
 0x686   :  { %v4772_v37 = vpop.permute.xlu1 %1448 }
 0x687   :  { %v4774_v45 = vpop.permute.xlu2 %1869  ;;  %v1491_v42 = vpop.permute.xlu0 %1490  ;;  %2273 = vst.msk [vmem:[#allocation7 + $0x310] sm:$0xff] %vm503_vm11, %v4772_v37 }
 0x688   :  { %v1502_v39 = vsel %vm1500_vm5, %v1489_v50, %v1491_v42 }
 0x689   :  { %1510 = vst.msk [vmem:[#allocation7 + $0x28] sm:$0xff] %vm514_vm12, %v1502_v39 }
 0x68c   :  { %1983 = vrot.lane.b32.xlu1 %v4535_v30, %s5698_s22 }
 0x68d   :  { %2109 = vrot.lane.b32.xlu0 %v4504_v55, %s5708_s20  ;;  %1672 = vrot.lane.b32.xlu2 %v4724_v53, %s5700_s17 }
 0x68e   :  { %v1473_v3 = vpop.permute.xlu1 %1472 }
 0x68f   :  { %v4786_v40 = vpop.permute.xlu2 %1837  ;;  %v1516_v51 = vpop.permute.xlu0 %1515  ;;  %1482 = vst.msk [vmem:[#allocation7 + $0x30] sm:$0xff] %vm503_vm11, %v1473_v3 }
 0x690   :  { %1526 = vst.msk [vmem:[#allocation7 + $0x48] sm:$0xff] %vm503_vm11, %v1516_v51 }
 0x694   :  { %2239 = vrot.lane.b32.xlu1 %v4535_v30, %s5709_s3 }
 0x695   :  { %2125 = vrot.lane.b32.xlu0 %v4592_v22, %s5699_s19  ;;  %1743 = vrot.lane.b32.xlu2 %v4724_v53, %s5705_s16 }
 0x696   :  { %v1493_v54 = vpop.permute.xlu1 %1492 }
 0x697   :  { %v1790_v46 = vpop.permute.xlu2 %1789  ;;  %v1536_v35 = vpop.permute.xlu0 %1535 }
 0x698   :  { %1800 = vst.msk [vmem:[#allocation7 + $0x128] sm:$0xff] %vm503_vm11, %v1790_v46  ;;  %v1546_v14 = vsel %vm857_vm15, %v1534_v15, %v1536_v35 }
 0x699   :  { %1554 = vst.msk [vmem:[#allocation7 + $0x48] sm:$0xff] %vm514_vm12, %v1546_v14 }
 0x69c   :  { %2255 = vrot.lane.b32.xlu1 %v4724_v53, %s5697_s12 }
 0x69d   :  { %1855 = vrot.lane.b32.xlu0 %v4535_v30, %s5692_s4  ;;  %1839 = vrot.lane.b32.xlu2 %v4724_v53, %s5702_s1 }
 0x69e   :  { %v1518_v18 = vpop.permute.xlu1 %1517 }
 0x69f   :  { %v1774_v48 = vpop.permute.xlu2 %1773  ;;  %v1560_v11 = vpop.permute.xlu0 %1559  ;;  %1527 = vst.msk [vmem:[#allocation7 + $0x50] sm:$0xff] %vm503_vm11, %v1518_v18 }
 0x6a0   :  { %1784 = vst.msk [vmem:[#allocation7 + $0x108] sm:$0xff] %vm514_vm12, %v1774_v48 }
 0x6a1   :  { %1570 = vst.msk [vmem:[#allocation7 + $0x68] sm:$0xff] %vm503_vm11, %v1560_v11 }
 0x6a4   :  { %1454 = vrot.lane.b32.xlu1 %v4808_v52, %s5670_s24 }
 0x6a5   :  { %1727 = vrot.lane.b32.xlu0 %v4535_v30, %s5695_s23  ;;  %1759 = vrot.lane.b32.xlu2 %v4535_v30, %s5669_s7 }
 0x6a6   :  { %v1538_v1 = vpop.permute.xlu1 %1537 }
 0x6a7   :  { %v1950_v41 = vpop.permute.xlu2 %1949  ;;  %v1580_v4 = vpop.permute.xlu0 %1579 }
 0x6a8   :  { %1960 = vst.msk [vmem:[#allocation7 + $0x1c8] sm:$0xff] %vm503_vm11, %v1950_v41  ;;  %v1591_v32 = vsel %vm1589_vm8, %v4742_v34, %v1580_v4 }
 0x6a9   :  { %1599 = vst.msk [vmem:[#allocation7 + $0x68] sm:$0xff] %vm514_vm12, %v1591_v32 }
 0x6ac   :  { %1498 = vrot.lane.b32.xlu1 %v4808_v52, %s5710_s2 }
 0x6ad   :  { %1823 = vrot.lane.b32.xlu0 %v4535_v30, %s5675_s29  ;;  %1999 = vrot.lane.b32.xlu2 %v4724_v53, %s5711_s13 }
 0x6ae   :  { %v1562_v8 = vpop.permute.xlu1 %1561 }
 0x6af   :  { %v1966_v13 = vpop.permute.xlu2 %1965  ;;  %v1605_v43 = vpop.permute.xlu0 %1604  ;;  %1571 = vst.msk [vmem:[#allocation7 + $0x70] sm:$0xff] %vm503_vm11, %v1562_v8 }
 0x6b0   :  { %1976 = vst.msk [vmem:[#allocation7 + $0x1c8] sm:$0xff] %vm514_vm12, %v1966_v13 }
 0x6b1   :  { %1615 = vst.msk [vmem:[#allocation7 + $0x88] sm:$0xff] %vm503_vm11, %v1605_v43 }
 0x6b4   :  { %1543 = vrot.lane.b32.xlu1 %v4808_v52, %s5676_s6 }
 0x6b5   :  { %1791 = vrot.lane.b32.xlu0 %v4535_v30, %s5694_s11  ;;  %1951 = vrot.lane.b32.xlu2 %v4535_v30, %s5689_s25 }
 0x6b6   :  { %v1582_v16 = vpop.permute.xlu1 %1581 }
 0x6b7   :  { %v1918_v47 = vpop.permute.xlu2 %1917  ;;  %v1625_v49 = vpop.permute.xlu0 %1624 }
 0x6b8   :  { %1928 = vst.msk [vmem:[#allocation7 + $0x1a8] sm:$0xff] %vm503_vm11, %v1918_v47  ;;  %v1635_v50 = vsel %vm925_vm1, %v4751_v38, %v1625_v49 }
 0x6b9   :  { %1643 = vst.msk [vmem:[#allocation7 + $0x88] sm:$0xff] %vm514_vm12, %v1635_v50 }
 0x6bc   :  { %1587 = vrot.lane.b32.xlu1 %v4808_v52, %s5712_s30 }
 0x6bd   :  { %1775 = vrot.lane.b32.xlu0 %v4724_v53, %s5686_s18  ;;  %1967 = vrot.lane.b32.xlu2 %v4724_v53, %s5713_s0  ;;  %s3422_s0 = smov 17  }
 0x6be   :  { %v1607_v31 = vpop.permute.xlu1 %1606 }
 0x6bf   :  { %v1649_v60 = vpop.permute.xlu0 %1648  ;;  %v1451_v15 = vpop.permute.xlu2 %1450  ;;  %1616 = vst.msk [vmem:[#allocation7 + $0x90] sm:$0xff] %vm503_vm11, %v1607_v31 }
 0x6c0   :  { %1659 = vst.msk [vmem:[#allocation7 + $0xa8] sm:$0xff] %vm503_vm11, %v1649_v60  ;;  %v1458_v19 = vsel %vm788_vm10, %v4772_v37, %v1451_v15 }
 0x6c1   :  { %1466 = vst.msk [vmem:[#allocation7 + $0x10] sm:$0xff] %vm514_vm12, %v1458_v19 }
 0x6c4   :  { %1632 = vrot.lane.b32.xlu1 %v4808_v52, %s5707_s14 }
 0x6c5   :  { %2111 = vrot.lane.b32.xlu0 %v4535_v30, %s5708_s20  ;;  %1919 = vrot.lane.b32.xlu2 %v4535_v30, %s5704_s26  ;;  %s5714_s26 = smov 74  }
 0x6c6   :  { %v1627_v34 = vpop.permute.xlu1 %1626 }
 0x6c7   :  { %v1669_v58 = vpop.permute.xlu0 %1668  ;;  %v1495_v25 = vpop.permute.xlu2 %1494 }
 0x6c8   :  { %v1680_v38 = vsel %vm1678_vm9, %v4762_v61, %v1669_v58  ;;  %v1503_v33 = vsel %vm1500_vm5, %v1493_v54, %v1495_v25 }
 0x6c9   :  { %1688 = vst.msk [vmem:[#allocation7 + $0xa8] sm:$0xff] %vm514_vm12, %v1680_v38 }
 0x6ca   :  { %1511 = vst.msk [vmem:[#allocation7 + $0x30] sm:$0xff] %vm514_vm12, %v1503_v33 }
 0x6cc   :  { %1676 = vrot.lane.b32.xlu1 %v4808_v52, %s5700_s17 }
 0x6cd   :  { %2127 = vrot.lane.b32.xlu0 %v4724_v53, %s5699_s19  ;;  %1935 = vrot.lane.b32.xlu2 %v4724_v53, %s3422_s0 }
 0x6ce   :  { %v1651_v62 = vpop.permute.xlu1 %1650 }
 0x6cf   :  { %v1694_v7 = vpop.permute.xlu0 %1693  ;;  %v1540_v20 = vpop.permute.xlu2 %1539  ;;  %1660 = vst.msk [vmem:[#allocation7 + $0xb0] sm:$0xff] %vm503_vm11, %v1651_v62 }
 0x6d0   :  { %1704 = vst.msk [vmem:[#allocation7 + $0xc8] sm:$0xff] %vm503_vm11, %v1694_v7  ;;  %v1547_v61 = vsel %vm857_vm15, %v1538_v1, %v1540_v20 }
 0x6d1   :  { %1720 = vst.msk [vmem:[#allocation7 + $0xc8] sm:$0xff] %vm514_vm12, %v4721_v26 }
 0x6d2   :  { %1555 = vst.msk [vmem:[#allocation7 + $0x50] sm:$0xff] %vm514_vm12, %v1547_v61 }
 0x6d4   :  { %1857 = vrot.lane.b32.xlu1 %v4546_v63, %s5692_s4  ;;  %s3423_s4 = smov 2  }
 0x6d5   :  { %2079 = vrot.lane.b32.xlu0 %v4535_v30, %s5714_s26  ;;  %1474 = vrot.lane.b32.xlu2 %v4546_v63, %s5690_s5  ;;  %s5715_s5 = smov 122  }
 0x6d6   :  { %v1671_v37 = vpop.permute.xlu1 %1670 }
 0x6d7   :  { %v1854_v42 = vpop.permute.xlu0 %1853  ;;  %v1584_v39 = vpop.permute.xlu2 %1583 }
 0x6d8   :  { %1864 = vst.msk [vmem:[#allocation7 + $0x168] sm:$0xff] %vm503_vm11, %v1854_v42  ;;  %v1592_v3 = vsel %vm1589_vm8, %v1582_v16, %v1584_v39 }
 0x6d9   :  { %1880 = vst.msk [vmem:[#allocation7 + $0x168] sm:$0xff] %vm514_vm12, %v4774_v45 }
 0x6da   :  { %1600 = vst.msk [vmem:[#allocation7 + $0x70] sm:$0xff] %vm514_vm12, %v1592_v3 }
 0x6dc   :  { %1745 = vrot.lane.b32.xlu1 %v4808_v52, %s5705_s16  ;;  %s3425_s16 = smov 20  }
 0x6dd   :  { %2095 = vrot.lane.b32.xlu0 %v4724_v53, %s3423_s4  ;;  %1519 = vrot.lane.b32.xlu2 %v4546_v63, %s5715_s5 }
 0x6de   :  { %v1696_v26 = vpop.permute.xlu1 %1695 }
 0x6df   :  { %v1742_v51 = vpop.permute.xlu0 %1741  ;;  %v1629_v54 = vpop.permute.xlu2 %1628  ;;  %1705 = vst.msk [vmem:[#allocation7 + $0xd0] sm:$0xff] %vm503_vm11, %v1696_v26 }
 0x6e0   :  { %1752 = vst.msk [vmem:[#allocation7 + $0xe8] sm:$0xff] %vm514_vm12, %v1742_v51  ;;  %v1636_v45 = vsel %vm925_vm1, %v1627_v34, %v1629_v54 }
 0x6e1   :  { %1644 = vst.msk [vmem:[#allocation7 + $0x90] sm:$0xff] %vm514_vm12, %v1636_v45 }
 0x6e4   :  { %1841 = vrot.lane.b32.xlu1 %v4808_v52, %s5702_s1  ;;  %s3426_s1 = smov 77  }
 0x6e5   :  { %1563 = vrot.lane.b32.xlu2 %v4546_v63, %s5691_s21  ;;  %1452 = vrot.lane.b32.xlu0 %v4546_v63, %s5670_s24  ;;  %s5724_s24 = smov 80  }
 0x6e6   :  { %v1872_v46 = vpop.permute.xlu1 %1871 }
 0x6e7   :  { %v1822_v35 = vpop.permute.xlu0 %1821  ;;  %v1673_v14 = vpop.permute.xlu2 %1672 }
 0x6e8   :  { %1832 = vst.msk [vmem:[#allocation7 + $0x148] sm:$0xff] %vm503_vm11, %v1822_v35  ;;  %v1681_v18 = vsel %vm1678_vm9, %v1671_v37, %v1673_v14 }
 0x6e9   :  { %1848 = vst.msk [vmem:[#allocation7 + $0x148] sm:$0xff] %vm514_vm12, %v4786_v40 }
 0x6ea   :  { %1689 = vst.msk [vmem:[#allocation7 + $0xb0] sm:$0xff] %vm514_vm12, %v1681_v18 }
 0x6ec   :  { %1713 = vrot.lane.b32.xlu1 %v4808_v52, %s5696_s28 }
 0x6ed   :  { %1608 = vrot.lane.b32.xlu2 %v4546_v63, %s5703_s15  ;;  %1496 = vrot.lane.b32.xlu0 %v4546_v63, %s5710_s2  ;;  %s5716_s2 = smov 62   ;;  %s5720_s15 = smov 92  }
 0x6ee   :  { %v1712_v48 = vpop.permute.xlu1 %1711 }
 0x6ef   :  { %v1806_v11 = vpop.permute.xlu0 %1805  ;;  %v1744_v1 = vpop.permute.xlu2 %1743  ;;  %1721 = vst.msk [vmem:[#allocation7 + $0xd0] sm:$0xff] %vm514_vm12, %v1712_v48 }
 0x6f0   :  { %1816 = vst.msk [vmem:[#allocation7 + $0x128] sm:$0xff] %vm514_vm12, %v1806_v11 }
 0x6f4   :  { %1777 = vrot.lane.b32.xlu1 %v4808_v52, %s5686_s18  ;;  %s5734_s18 = sld [smem:[#allocation21_spill]] }
 0x6f5   :  { %1652 = vrot.lane.b32.xlu2 %v4546_v63, %s5693_s8  ;;  %1541 = vrot.lane.b32.xlu0 %v4546_v63, %s5676_s6  ;;  %s5726_s6 = smov 68  }
 0x6f6   :  { %v1808_v40 = vpop.permute.xlu1 %1807 }
 0x6f7   :  { %v1982_v41 = vpop.permute.xlu0 %1981  ;;  %v1840_v4 = vpop.permute.xlu2 %1839 }
 0x6f8   :  { %1992 = vst.msk [vmem:[#allocation7 + $0x1e8] sm:$0xff] %vm503_vm11, %v1982_v41 }
 0x6f9   :  { %2008 = vst.msk [vmem:[#allocation7 + $0x1e8] sm:$0xff] %vm514_vm12, %v4740_v44 }
 0x6fc   :  { %1953 = vrot.lane.b32.xlu1 %v4546_v63, %s5689_s25 }
 0x6fd   :  { %1697 = vrot.lane.b32.xlu2 %v4546_v63, %s5665_s27  ;;  %1585 = vrot.lane.b32.xlu0 %v4546_v63, %s5712_s30  ;;  %s5722_s27 = smov 112   ;;  %s5727_s30 = sld [smem:[#allocation20_spill]] }
 0x6fe   :  { %v1984_v32 = vpop.permute.xlu1 %1983 }
 0x6ff   :  { %v2110_v8 = vpop.permute.xlu0 %2109  ;;  %v1760_v13 = vpop.permute.xlu2 %1759  ;;  %1993 = vst.msk [vmem:[#allocation7 + $0x1f0] sm:$0xff] %vm503_vm11, %v1984_v32 }
 0x700   :  { %2120 = vst.msk [vmem:[#allocation7 + $0x268] sm:$0xff] %vm503_vm11, %v2110_v8 }
 0x701   :  { %1769 = vst.msk [vmem:[#allocation7 + $0x110] sm:$0xff] %vm503_vm11, %v1760_v13 }
 0x704   :  { %2129 = vrot.lane.b32.xlu1 %v4808_v52, %s5699_s19 }
 0x705   :  { %1873 = vrot.lane.b32.xlu2 %v4808_v52, %s5701_s9  ;;  %1630 = vrot.lane.b32.xlu0 %v4546_v63, %s5707_s14  ;;  %s5718_s14 = smov 14  }
 0x706   :  { %v2240_v44 = vpop.permute.xlu1 %2239 }
 0x707   :  { %v2126_v43 = vpop.permute.xlu0 %2125  ;;  %v2000_v16 = vpop.permute.xlu2 %1999  ;;  %2249 = vst.msk [vmem:[#allocation7 + $0x2f0] sm:$0xff] %vm503_vm11, %v2240_v44 }
 0x708   :  { %2136 = vst.msk [vmem:[#allocation7 + $0x268] sm:$0xff] %vm514_vm12, %v2126_v43 }
 0x709   :  { %2009 = vst.msk [vmem:[#allocation7 + $0x1f0] sm:$0xff] %vm514_vm12, %v2000_v16 }
 0x70c   :  { %2241 = vrot.lane.b32.xlu1 %v4546_v63, %s5709_s3  ;;  %s5717_s3 = smov 118  }
 0x70d   :  { %1729 = vrot.lane.b32.xlu2 %v4546_v63, %s5695_s23  ;;  %1674 = vrot.lane.b32.xlu0 %v4546_v63, %s5700_s17 }
 0x70e   :  { %v2256_v47 = vpop.permute.xlu1 %2255 }
 0x70f   :  { %v1856_v49 = vpop.permute.xlu0 %1855  ;;  %v1952_v50 = vpop.permute.xlu2 %1951  ;;  %2265 = vst.msk [vmem:[#allocation7 + $0x2f0] sm:$0xff] %vm514_vm12, %v2256_v47  ;;  %v2392_v47 = vld [vmem:[#allocation7 + $0x168] sm:$0xff] }
 0x710   :  { %1865 = vst.msk [vmem:[#allocation7 + $0x170] sm:$0xff] %vm503_vm11, %v1856_v49  ;;  %v2391_v49 = vld [vmem:[#allocation7 + $0x160] sm:$0xff] }
 0x711   :  { %1881 = vst.msk [vmem:[#allocation7 + $0x170] sm:$0xff] %vm514_vm12, %v1872_v46 }
 0x712   :  { %1961 = vst.msk [vmem:[#allocation7 + $0x1d0] sm:$0xff] %vm503_vm11, %v1952_v50 }
 0x714   :  { %2257 = vrot.lane.b32.xlu1 %v4808_v52, %s5697_s12  ;;  %s3427_s12 = smov 5  }
 0x715   :  { %1825 = vrot.lane.b32.xlu2 %v4546_v63, %s5675_s29  ;;  %1793 = vrot.lane.b32.xlu0 %v4546_v63, %s5694_s11  ;;  %s5725_s29 = smov 124   ;;  %s5729_s11 = sld [smem:[#allocation19_spill]] }
 0x716   :  { %v4956_v31 = vpop.permute.xlu1 %1454 }
 0x717   :  { %v1728_v60 = vpop.permute.xlu0 %1727  ;;  %v1968_v15 = vpop.permute.xlu2 %1967 }
 0x718   :  { %1737 = vst.msk [vmem:[#allocation7 + $0xf0] sm:$0xff] %vm503_vm11, %v1728_v60  ;;  %v2393_v16 = vld [vmem:[#allocation7 + $0x170] sm:$0xff] }
 0x719   :  { %1753 = vst.msk [vmem:[#allocation7 + $0xf0] sm:$0xff] %vm514_vm12, %v1744_v1 }
 0x71a   :  { %1977 = vst.msk [vmem:[#allocation7 + $0x1d0] sm:$0xff] %vm514_vm12, %v1968_v15 }
 0x71c   :  { %2209 = vrot.lane.b32.xlu1 %v4546_v63, %s5716_s2 }
 0x71d   :  { %1809 = vrot.lane.b32.xlu2 %v4808_v52, %s5706_s10  ;;  %1761 = vrot.lane.b32.xlu0 %v4546_v63, %s5669_s7  ;;  %s5723_s7 = smov 8  }
 0x71e   :  { %v4967_v19 = vpop.permute.xlu1 %1498 }
 0x71f   :  { %v1824_v34 = vpop.permute.xlu0 %1823  ;;  %v1920_v58 = vpop.permute.xlu2 %1919 }
 0x720   :  { %1833 = vst.msk [vmem:[#allocation7 + $0x150] sm:$0xff] %vm503_vm11, %v1824_v34  ;;  %v2377_v34 = vld [vmem:[#allocation7 + $0xf0] sm:$0xff] }
 0x721   :  { %1849 = vst.msk [vmem:[#allocation7 + $0x150] sm:$0xff] %vm514_vm12, %v1840_v4 }
 0x722   :  { %1929 = vst.msk [vmem:[#allocation7 + $0x1b0] sm:$0xff] %vm503_vm11, %v1920_v58  ;;  %v2376_v58 = vld [vmem:[#allocation7 + $0xe8] sm:$0xff] }
 0x724   :  { %2225 = vrot.lane.b32.xlu1 %v4808_v52, %s5717_s3 }
 0x725   :  { %1985 = vrot.lane.b32.xlu2 %v4546_v63, %s5698_s22  ;;  %2001 = vrot.lane.b32.xlu0 %v4808_v52, %s5711_s13  ;;  %s5719_s13 = smov 89   ;;  %s3424_s22 = smov 65  }
 0x726   :  { %v4978_v25 = vpop.permute.xlu1 %1543 }
 0x727   :  { %v1792_v38 = vpop.permute.xlu0 %1791  ;;  %v1936_v33 = vpop.permute.xlu2 %1935 }
 0x728   :  { %1801 = vst.msk [vmem:[#allocation7 + $0x130] sm:$0xff] %vm503_vm11, %v1792_v38 }
 0x729   :  { %1817 = vst.msk [vmem:[#allocation7 + $0x130] sm:$0xff] %vm514_vm12, %v1808_v40 }
 0x72a   :  { %1945 = vst.msk [vmem:[#allocation7 + $0x1b0] sm:$0xff] %vm514_vm12, %v1936_v33 }
 0x72c   :  { %2207 = vrot.lane.b32.xlu1 %v4535_v30, %s5716_s2 }
 0x72d   :  { %2113 = vrot.lane.b32.xlu2 %v4546_v63, %s5708_s20  ;;  %1969 = vrot.lane.b32.xlu0 %v4808_v52, %s5718_s14 }
 0x72e   :  { %v4989_v62 = vpop.permute.xlu1 %1587 }
 0x72f   :  { %v1776_v7 = vpop.permute.xlu0 %1775  ;;  %v1475_v20 = vpop.permute.xlu2 %1474 }
 0x730   :  { %1785 = vst.msk [vmem:[#allocation7 + $0x110] sm:$0xff] %vm514_vm12, %v1776_v7 }
 0x731   :  { %1483 = vst.msk [vmem:[#allocation7 + $0x38] sm:$0xff] %vm503_vm11, %v1475_v20 }
 0x734   :  { %2223 = vrot.lane.b32.xlu1 %v4724_v53, %s5717_s3 }
 0x735   :  { %1921 = vrot.lane.b32.xlu2 %v4546_v63, %s5719_s13  ;;  %2081 = vrot.lane.b32.xlu0 %v4546_v63, %s5714_s26 }
 0x736   :  { %v4999_v61 = vpop.permute.xlu1 %1632 }
 0x737   :  { %v2112_v37 = vpop.permute.xlu0 %2111  ;;  %v1520_v42 = vpop.permute.xlu2 %1519 }
 0x738   :  { %2121 = vst.msk [vmem:[#allocation7 + $0x270] sm:$0xff] %vm503_vm11, %v2112_v37 }
 0x739   :  { %1528 = vst.msk [vmem:[#allocation7 + $0x58] sm:$0xff] %vm503_vm11, %v1520_v42 }
 0x73c   :  { %2205 = vrot.lane.b32.xlu1 %v4504_v55, %s5716_s2 }
 0x73d   :  { %1937 = vrot.lane.b32.xlu2 %v4808_v52, %s3422_s0  ;;  %2097 = vrot.lane.b32.xlu0 %v4808_v52, %s3423_s4 }
 0x73e   :  { %v5009_v39 = vpop.permute.xlu1 %1676 }
 0x73f   :  { %v2128_v3 = vpop.permute.xlu0 %2127  ;;  %v1564_v26 = vpop.permute.xlu2 %1563 }
 0x740   :  { %2137 = vst.msk [vmem:[#allocation7 + $0x270] sm:$0xff] %vm514_vm12, %v2128_v3  ;;  %v2389_v3 = vld [vmem:[#allocation7 + $0x150] sm:$0xff] }
 0x741   :  { %1572 = vst.msk [vmem:[#allocation7 + $0x78] sm:$0xff] %vm503_vm11, %v1564_v26  ;;  %v2361_v26 = vld [vmem:[#allocation7 + $0x70] sm:$0xff] }
 0x744   :  { %2221 = vrot.lane.b32.xlu1 %v4592_v22, %s5717_s3 }
 0x745   :  { %1933 = vrot.lane.b32.xlu2 %v4592_v22, %s3422_s0  ;;  %2077 = vrot.lane.b32.xlu0 %v4504_v55, %s5714_s26 }
 0x746   :  { %v1858_v51 = vpop.permute.xlu1 %1857 }
 0x747   :  { %v2080_v54 = vpop.permute.xlu0 %2079  ;;  %v1609_v45 = vpop.permute.xlu2 %1608  ;;  %1866 = vst.msk [vmem:[#allocation7 + $0x178] sm:$0xff] %vm503_vm11, %v1858_v51  ;;  %v2373_v51 = vld [vmem:[#allocation7 + $0xd0] sm:$0xff] }
 0x748   :  { %2089 = vst.msk [vmem:[#allocation7 + $0x250] sm:$0xff] %vm503_vm11, %v2080_v54  ;;  %v2372_v54 = vld [vmem:[#allocation7 + $0xc8] sm:$0xff] }
 0x749   :  { %1617 = vst.msk [vmem:[#allocation7 + $0x98] sm:$0xff] %vm503_vm11, %v1609_v45  ;;  %v2388_v45 = vld [vmem:[#allocation7 + $0x148] sm:$0xff] }
 0x74c   :  { %2203 = vrot.lane.b32.xlu1 %v4516_v12, %s5716_s2 }
 0x74d   :  { %1915 = vrot.lane.b32.xlu2 %v4516_v12, %s5719_s13  ;;  %2093 = vrot.lane.b32.xlu0 %v4592_v22, %s3423_s4 }
 0x74e   :  { %v1746_v46 = vpop.permute.xlu1 %1745 }
 0x74f   :  { %v2096_v35 = vpop.permute.xlu0 %2095  ;;  %v1653_v14 = vpop.permute.xlu2 %1652 }
 0x750   :  { %2105 = vst.msk [vmem:[#allocation7 + $0x250] sm:$0xff] %vm514_vm12, %v2096_v35 }
 0x751   :  { %1661 = vst.msk [vmem:[#allocation7 + $0xb8] sm:$0xff] %vm503_vm11, %v1653_v14 }
 0x754   :  { %2219 = vrot.lane.b32.xlu1 %v4495_v10, %s5717_s3 }
 0x755   :  { %1931 = vrot.lane.b32.xlu2 %v4495_v10, %s3422_s0  ;;  %2075 = vrot.lane.b32.xlu0 %v4516_v12, %s5714_s26  ;;  %s5721_s26 = smov 121  }
 0x756   :  { %v1842_v18 = vpop.permute.xlu1 %1841 }
 0x757   :  { %v1698_v48 = vpop.permute.xlu2 %1697  ;;  %v1453_v11 = vpop.permute.xlu0 %1452 }
 0x758   :  { %1706 = vst.msk [vmem:[#allocation7 + $0xd8] sm:$0xff] %vm503_vm11, %v1698_v48  ;;  %v1459_v1 = vsel %vm788_vm10, %v1453_v11, %v4956_v31  ;;  %vm2834_vm10 = vcmask 654336  }
 0x759   :  { %1467 = vst.msk [vmem:[#allocation7 + $0x18] sm:$0xff] %vm514_vm12, %v1459_v1  ;;  %v2387_v1 = vld [vmem:[#allocation7 + $0x140] sm:$0xff] }
 0x75a   :  { %2274 = vst.msk [vmem:[#allocation7 + $0x318] sm:$0xff] %vm503_vm11, %v1453_v11  ;;  %v2371_v11 = vld [vmem:[#allocation7 + $0xc0] sm:$0xff] }
 0x75c   :  { %2177 = vrot.lane.b32.xlu1 %v4546_v63, %s3424_s22 }
 0x75d   :  { %1889 = vrot.lane.b32.xlu2 %v4546_v63, %s5720_s15  ;;  %2091 = vrot.lane.b32.xlu0 %v4495_v10, %s3423_s4 }
 0x75e   :  { %v1714_v40 = vpop.permute.xlu1 %1713 }
 0x75f   :  { %v1874_v41 = vpop.permute.xlu2 %1873  ;;  %v1497_v4 = vpop.permute.xlu0 %1496  ;;  %1722 = vst.msk [vmem:[#allocation7 + $0xd8] sm:$0xff] %vm514_vm12, %v1714_v40 }
 0x760   :  { %1882 = vst.msk [vmem:[#allocation7 + $0x178] sm:$0xff] %vm514_vm12, %v1874_v41  ;;  %v1504_v32 = vsel %vm1500_vm5, %v1497_v4, %v4967_v19  ;;  %v2357_v41 = vld [vmem:[#allocation7 + $0x50] sm:$0xff]  ;;  %v2356_v4 = vld [vmem:[#allocation7 + $0x48] sm:$0xff] }
 0x761   :  { %1512 = vst.msk [vmem:[#allocation7 + $0x38] sm:$0xff] %vm514_vm12, %v1504_v32 }
 0x764   :  { %2193 = vrot.lane.b32.xlu1 %v4808_v52, %s5721_s26 }
 0x765   :  { %1905 = vrot.lane.b32.xlu2 %v4808_v52, %s3425_s16  ;;  %2049 = vrot.lane.b32.xlu0 %v4546_v63, %s3426_s1 }
 0x766   :  { %v5058_v10 = vpop.permute.xlu1 %1777  ;;  %v2374_v42 = vld [vmem:[#allocation7 + $0xd8] sm:$0xff] }
 0x767   :  { %v1730_v8 = vpop.permute.xlu2 %1729  ;;  %v1542_v13 = vpop.permute.xlu0 %1541  ;;  %v2394_v44 = vld [vmem:[#allocation7 + $0x178] sm:$0xff] }
 0x768   :  { %1738 = vst.msk [vmem:[#allocation7 + $0xf8] sm:$0xff] %vm503_vm11, %v1730_v8  ;;  %v1548_v43 = vsel %vm857_vm15, %v1542_v13, %v4978_v25  ;;  %2601 = vmatpush.msra.mxu2 %v2394_v44  ;;  %v2355_v13 = vld [vmem:[#allocation7 + $0x40] sm:$0xff] }
 0x769   :  { %1754 = vst.msk [vmem:[#allocation7 + $0xf8] sm:$0xff] %vm514_vm12, %v1746_v46 }
 0x76a   :  { %1556 = vst.msk [vmem:[#allocation7 + $0x58] sm:$0xff] %vm514_vm12, %v1548_v43  ;;  %2602 = vmatpush.msra.mxu2 %v2393_v16  ;;  %v2354_v43 = vld [vmem:[#allocation7 + $0x38] sm:$0xff]  ;;  %v2369_v16 = vld [vmem:[#allocation7 + $0xb0] sm:$0xff] }
 0x76c   :  { %2603 = vmatpush.msra.mxu2 %v2392_v47  ;;  %2175 = vrot.lane.b32.xlu1 %v4535_v30, %s3424_s22  ;;  %v5113_v47 = vld [vmem:[#allocation6 + $0x18] sm:$0xff] }
 0x76d   :  { %1887 = vrot.lane.b32.xlu2 %v4535_v30, %s5720_s15  ;;  %2065 = vrot.lane.b32.xlu0 %v4808_v52, %s3427_s12 }
 0x76e   :  { %2604 = vmatpush.msra.mxu2 %v2391_v49  ;;  %v1954_v50 = vpop.permute.xlu1 %1953  ;;  %v2352_v49 = vld [vmem:[#allocation7 + $0x28] sm:$0xff] }
 0x76f   :  { %v1826_v31 = vpop.permute.xlu2 %1825  ;;  %v1586_v60 = vpop.permute.xlu0 %1585  ;;  %1962 = vst.msk [vmem:[#allocation7 + $0x1d8] sm:$0xff] %vm503_vm11, %v1954_v50  ;;  %v2368_v50 = vld [vmem:[#allocation7 + $0xa8] sm:$0xff] }
 0x770   :  { %1834 = vst.msk [vmem:[#allocation7 + $0x158] sm:$0xff] %vm503_vm11, %v1826_v31  ;;  %v1593_v15 = vsel %vm1589_vm8, %v1586_v60, %v4989_v62  ;;  %v2378_v19 = vld [vmem:[#allocation7 + $0xf8] sm:$0xff]  ;;  %v2375_v62 = vld [vmem:[#allocation7 + $0xe0] sm:$0xff] }
 0x771   :  { %1850 = vst.msk [vmem:[#allocation7 + $0x158] sm:$0xff] %vm514_vm12, %v1842_v18  ;;  %2560 = vmatpush.msrb.mxu0 %v2378_v19  ;;  %v2359_v18 = vld [vmem:[#allocation7 + $0x60] sm:$0xff]  ;;  %v2358_v40 = vld [vmem:[#allocation7 + $0x58] sm:$0xff] }
 0x772   :  { %1601 = vst.msk [vmem:[#allocation7 + $0x78] sm:$0xff] %vm514_vm12, %v1593_v15  ;;  %v2351_v19 = vld [vmem:[#allocation7 + $0x20] sm:$0xff] }
 0x773   :  { %2561 = vmatpush.msrb.mxu0 %v2377_v34  ;;  %v2367_v34 = vld [vmem:[#allocation7 + $0xa0] sm:$0xff] }
 0x774   :  { %2191 = vrot.lane.b32.xlu1 %v4724_v53, %s5721_s26 }
 0x775   :  { %1903 = vrot.lane.b32.xlu2 %v4724_v53, %s3425_s16  ;;  %2047 = vrot.lane.b32.xlu0 %v4535_v30, %s3426_s1 }
 0x776   :  { %2562 = vmatpush.msrb.mxu0 %v2376_v58  ;;  %v2130_v25 = vpop.permute.xlu1 %2129  ;;  %v2350_v58 = vld [vmem:[#allocation7 + $0x18] sm:$0xff] }
 0x777   :  { %v5083_v38 = vpop.permute.xlu2 %1809  ;;  %v1631_v33 = vpop.permute.xlu0 %1630 }
 0x778   :  { %v1637_v7 = vsel %vm925_vm1, %v1631_v33, %v4999_v61  ;;  %2563 = vmatpush.msrb.mxu0 %v2375_v62  ;;  %v2390_v20 = vld [vmem:[#allocation7 + $0x158] sm:$0xff]  ;;  %v2360_v61 = vld [vmem:[#allocation7 + $0x68] sm:$0xff]  ;;  %v2349_v33 = vld [vmem:[#allocation7 + $0x10] sm:$0xff] }
 0x779   :  { %1645 = vst.msk [vmem:[#allocation7 + $0x98] sm:$0xff] %vm514_vm12, %v1637_v7  ;;  %v2362_v37 = vld [vmem:[#allocation7 + $0x78] sm:$0xff]  ;;  %2605 = vmatpush.msra.mxu2 %v2390_v20  ;;  %v2365_v62 = vld [vmem:[#allocation7 + $0x90] sm:$0xff]  ;;  %v5124_v20 = vld [vmem:[#allocation6 + $0x8] sm:$0xff] }
 0x77a   :  { %2519 = vmatpush.msrb.mxu1 %v2362_v37  ;;  %2564 = vmatpush.msrb.mxu0 %v2374_v42  ;;  %v2385_v7 = vld [vmem:[#allocation7 + $0x130] sm:$0xff]  ;;  %v2364_v42 = vld [vmem:[#allocation7 + $0x88] sm:$0xff] }
 0x77b   :  { %2606 = vmatpush.msra.mxu2 %v2389_v3  ;;  %v2384_v3 = vld [vmem:[#allocation7 + $0x128] sm:$0xff] }
 0x77c   :  { %2520 = vmatpush.msrb.mxu1 %v2361_v26  ;;  %2565 = vmatpush.msrb.mxu0 %v2373_v51 }
 0x77d   :  { %1885 = vrot.lane.b32.xlu2 %v4504_v55, %s5720_s15  ;;  %2063 = vrot.lane.b32.xlu0 %v4724_v53, %s3427_s12 }
 0x77e   :  { %2173 = vrot.lane.b32.xlu1 %v4504_v55, %s3424_s22  ;;  %2521 = vmatpush.msrb.mxu1 %v2360_v61  ;;  %v2242_v46 = vpop.permute.xlu1 %2241  ;;  %v2347_v61 = vld [vmem:[#allocation7] sm:$0xff] }
 0x77f   :  { %2566 = vmatpush.msrb.mxu0 %v2372_v54  ;;  %2607 = vmatpush.msra.mxu2 %v2388_v45  ;;  %v1986_v35 = vpop.permute.xlu2 %1985  ;;  %v1675_v14 = vpop.permute.xlu0 %1674  ;;  %2250 = vst.msk [vmem:[#allocation7 + $0x2f8] sm:$0xff] %vm503_vm11, %v2242_v46  ;;  %v2291_v54 = vld [vmem:[#allocation10] sm:$0xff]  ;;  %v2363_v45 = vld [vmem:[#allocation7 + $0x80] sm:$0xff] }
 0x780   :  { %1994 = vst.msk [vmem:[#allocation7 + $0x1f8] sm:$0xff] %vm503_vm11, %v1986_v35  ;;  %v1682_v48 = vsel %vm1678_vm9, %v1675_v14, %v5009_v39  ;;  %2522 = vmatpush.msrb.mxu1 %v2359_v18  ;;  %v2383_v46 = vld [vmem:[#allocation7 + $0x120] sm:$0xff]  ;;  %v2292_v18 = vld [vmem:[#allocation10 + $0x8] sm:$0xff] }
 0x781   :  { %1690 = vst.msk [vmem:[#allocation7 + $0xb8] sm:$0xff] %vm514_vm12, %v1682_v48  ;;  %2567 = vmatpush.msrb.mxu0 %v2371_v11  ;;  %2608 = vmatpush.msra.mxu2 %v2387_v1  ;;  %v2425_v11 = vld [vmem:[#allocation7 + $0x270] sm:$0xff] }
 0x782   :  { %2523 = vmatpush.msrb.mxu1 %v2358_v40  ;;  %v2441_v1 = vld [vmem:[#allocation7 + $0x2f0] sm:$0xff] }
 0x783   :  { %v2381_v40 = vld [vmem:[#allocation7 + $0x110] sm:$0xff] }
 0x784   :  { %2524 = vmatpush.msrb.mxu1 %v2357_v41 }
 0x785   :  { %1901 = vrot.lane.b32.xlu2 %v4592_v22, %s3425_s16  ;;  %2045 = vrot.lane.b32.xlu0 %v4504_v55, %s3426_s1 }
 0x786   :  { %2189 = vrot.lane.b32.xlu1 %v4592_v22, %s5721_s26  ;;  %2525 = vmatpush.msrb.mxu1 %v2356_v4  ;;  %v2258_v39 = vpop.permute.xlu1 %2257  ;;  %v2353_v22 = vld [vmem:[#allocation7 + $0x30] sm:$0xff]  ;;  %v2424_v4 = vld [vmem:[#allocation7 + $0x268] sm:$0xff] }
 0x787   :  { %v2114_v32 = vpop.permute.xlu2 %2113  ;;  %v1794_v8 = vpop.permute.xlu0 %1793  ;;  %2266 = vst.msk [vmem:[#allocation7 + $0x2f8] sm:$0xff] %vm514_vm12, %v2258_v39  ;;  %v2440_v39 = vld [vmem:[#allocation7 + $0x2e8] sm:$0xff] }
 0x788   :  { %2122 = vst.msk [vmem:[#allocation7 + $0x278] sm:$0xff] %vm503_vm11, %v2114_v32  ;;  %2526 = vmatpush.msrb.mxu1 %v2355_v13  ;;  %v2370_v44 = vld [vmem:[#allocation7 + $0xb8] sm:$0xff]  ;;  %v2298_v13 = vld [vmem:[#allocation10 + $0x38] sm:$0xff] }
 0x789   :  { %2138 = vst.msk [vmem:[#allocation7 + $0x278] sm:$0xff] %vm514_vm12, %v2130_v25  ;;  %2568 = vmatpush.msrb.mxu0 %v2370_v44  ;;  %v2366_v25 = vld [vmem:[#allocation7 + $0x98] sm:$0xff]  ;;  %v2380_v44 = vld [vmem:[#allocation7 + $0x108] sm:$0xff] }
 0x78a   :  { %1802 = vst.msk [vmem:[#allocation7 + $0x138] sm:$0xff] %vm503_vm11, %v1794_v8  ;;  %2527 = vmatpush.msrb.mxu1 %v2354_v43  ;;  %v2423_v43 = vld [vmem:[#allocation7 + $0x260] sm:$0xff] }
 0x78b   :  { %1818 = vst.msk [vmem:[#allocation7 + $0x138] sm:$0xff] %vm514_vm12, %v5083_v38  ;;  %2569 = vmatpush.msrb.mxu0 %v2369_v16 }
 0x78c   :  { %2528 = vmatpush.msrb.mxu1 %v2353_v22  ;;  %v2439_v22 = vld [vmem:[#allocation7 + $0x2e0] sm:$0xff] }
 0x78d   :  { %1883 = vrot.lane.b32.xlu2 %v4516_v12, %s5720_s15  ;;  %2061 = vrot.lane.b32.xlu0 %v5113_v47, %s3427_s12 }
 0x78e   :  { %2171 = vrot.lane.b32.xlu1 %v4516_v12, %s3424_s22  ;;  %2529 = vmatpush.msrb.mxu1 %v2352_v49  ;;  %v2210_v31 = vpop.permute.xlu1 %2209  ;;  %v2442_v14 = vld [vmem:[#allocation7 + $0x2f8] sm:$0xff]  ;;  %v2293_v49 = vld [vmem:[#allocation10 + $0x10] sm:$0xff]  ;;  %s5728_s22 = sld [smem:[#allocation18_spill]] }
 0x78f   :  { %2570 = vmatpush.msrb.mxu0 %v2368_v50  ;;  %v1922_v60 = vpop.permute.xlu2 %1921  ;;  %v1762_v15 = vpop.permute.xlu0 %1761  ;;  %2218 = vst.msk [vmem:[#allocation7 + $0x2d8] sm:$0xff] %vm503_vm11, %v2210_v31  ;;  %v2379_v31 = vld [vmem:[#allocation7 + $0x100] sm:$0xff] }
 0x790   :  { %1930 = vst.msk [vmem:[#allocation7 + $0x1b8] sm:$0xff] %vm503_vm11, %v1922_v60  ;;  %2530 = vmatpush.msrb.mxu1 %v2351_v19  ;;  %v2426_v48 = vld [vmem:[#allocation7 + $0x278] sm:$0xff]  ;;  %v2299_v60 = vld [vmem:[#allocation10 + $0x40] sm:$0xff]  ;;  %v2408_v19 = vld [vmem:[#allocation7 + $0x1e8] sm:$0xff] }
 0x791   :  { %1770 = vst.msk [vmem:[#allocation7 + $0x118] sm:$0xff] %vm503_vm11, %v1762_v15  ;;  %2571 = vmatpush.msrb.mxu0 %v2367_v34  ;;  %v2409_v15 = vld [vmem:[#allocation7 + $0x1f0] sm:$0xff] }
 0x792   :  { %1786 = vst.msk [vmem:[#allocation7 + $0x118] sm:$0xff] %vm514_vm12, %v5058_v10  ;;  %2531 = vmatpush.msrb.mxu1 %v2350_v58  ;;  %v2386_v38 = vld [vmem:[#allocation7 + $0x138] sm:$0xff]  ;;  %v2348_v10 = vld [vmem:[#allocation7 + $0x8] sm:$0xff] }
 0x793   :  { %2572 = vmatpush.msrb.mxu0 %v2366_v25  ;;  %2609 = vmatpush.msra.mxu2 %v2386_v38  ;;  %v2305_v25 = vld [vmem:[#allocation10 + $0x70] sm:$0xff] }
 0x794   :  { %2532 = vmatpush.msrb.mxu1 %v2349_v33  ;;  %v2407_v38 = vld [vmem:[#allocation7 + $0x1e0] sm:$0xff] }
 0x795   :  { %2573 = vmatpush.msrb.mxu0 %v2365_v62  ;;  %2610 = vmatpush.msra.mxu2 %v2385_v7  ;;  %v2300_v62 = vld [vmem:[#allocation10 + $0x48] sm:$0xff]  ;;  %v2306_v7 = vld [vmem:[#allocation10 + $0x78] sm:$0xff] }
 0x796   :  { %1899 = vrot.lane.b32.xlu2 %v5124_v20, %s3425_s16  ;;  %2043 = vrot.lane.b32.xlu0 %v4516_v12, %s3426_s1  ;;  %v2226_v37 = vpop.permute.xlu1 %2225 }
 0x797   :  { %2279 = vrot.lane.b32.xlu1 %v4724_v53, %s5722_s27  ;;  %2533 = vmatpush.msrb.mxu1 %v2348_v10  ;;  %v1938_v26 = vpop.permute.xlu2 %1937  ;;  %v2002_v51 = vpop.permute.xlu0 %2001  ;;  %2234 = vst.msk [vmem:[#allocation7 + $0x2d8] sm:$0xff] %vm514_vm12, %v2226_v37  ;;  %v2405_v10 = vld [vmem:[#allocation7 + $0x1d0] sm:$0xff] }
 0x798   :  { %2574 = vmatpush.msrb.mxu0 %v2364_v42  ;;  %2611 = vmatpush.msra.mxu2 %v2384_v3  ;;  %1946 = vst.msk [vmem:[#allocation7 + $0x1b8] sm:$0xff] %vm514_vm12, %v1938_v26  ;;  %v2404_v3 = vld [vmem:[#allocation7 + $0x1c8] sm:$0xff] }
 0x799   :  { %2010 = vst.msk [vmem:[#allocation7 + $0x1f8] sm:$0xff] %vm514_vm12, %v2002_v51  ;;  %2534 = vmatpush.msrb.mxu1 %v2347_v61  ;;  %v2382_v35 = vld [vmem:[#allocation7 + $0x118] sm:$0xff] }
 0x79a   :  { %2575 = vmatpush.msrb.mxu0 %v2363_v45  ;;  %2612 = vmatpush.msra.mxu2 %v2383_v46  ;;  %v2312_v61 = vld [vmem:[#allocation10 + $0xa8] sm:$0xff]  ;;  %v2403_v45 = vld [vmem:[#allocation7 + $0x1c0] sm:$0xff]  ;;  %v2307_v46 = vld [vmem:[#allocation10 + $0x80] sm:$0xff] }
 0x79b   :  { %2535 = vmatmul.f32.vlgmr.msrb.gmra.mxu1 %v2291_v54  ;;  %2576 = vmatmul.f32.vlgmr.msrb.gmra.mxu0 %v2292_v18  ;;  %v3277_v54 = vld [vmem:[#allocation6 + $0x28] sm:$0xff]  ;;  %v2401_v18 = vld [vmem:[#allocation7 + $0x1b0] sm:$0xff] }
 0x79c   :  { %2724 = vmatpush.msra.mxu0 %v2442_v14  ;;  %2683 = vmatpush.msra.mxu1 %v2426_v48  ;;  %v2313_v14 = vld [vmem:[#allocation10 + $0xb0] sm:$0xff] }
 0x79d   :  { %2613 = vmatpush.msra.mxu2 %v2382_v35 }
 0x79e   :  { %2684 = vmatpush.msra.mxu1 %v2425_v11  ;;  %2725 = vmatpush.msra.mxu0 %v2441_v1  ;;  %v2208_v41 = vpop.permute.xlu1 %2207  ;;  %v2438_v50 = vld [vmem:[#allocation7 + $0x2d8] sm:$0xff] }
 0x79f   :  { %2614 = vmatpush.msra.mxu2 %v2381_v40  ;;  %2281 = vrot.lane.b32.xlu2 %v4808_v52, %s5722_s27  ;;  %v1934_v32 = vpop.permute.xlu2 %1933  ;;  %v1970_v8 = vpop.permute.xlu0 %1969  ;;  %2217 = vst.msk [vmem:[#allocation7 + $0x2d0] sm:$0xff] %vm503_vm11, %v2208_v41  ;;  %v2402_v35 = vld [vmem:[#allocation7 + $0x1b8] sm:$0xff] }
 0x7a0   :  { %2685 = vmatpush.msra.mxu1 %v2424_v4  ;;  %2726 = vmatpush.msra.mxu0 %v2440_v39  ;;  %1944 = vst.msk [vmem:[#allocation7 + $0x1a8] sm:$0xff] %vm514_vm12, %v1934_v32  ;;  %v2410_v16 = vld [vmem:[#allocation7 + $0x1f8] sm:$0xff]  ;;  %v2319_v4 = vld [vmem:[#allocation10 + $0xe0] sm:$0xff]  ;;  %v2314_v32 = vld [vmem:[#allocation10 + $0xb8] sm:$0xff] }
 0x7a1   :  { %2059 = vrot.lane.b32.xlu0 %v5124_v20, %s3427_s12  ;;  %2031 = vrot.lane.b32.xlu1 %v4724_v53, %s5723_s7  ;;  %1978 = vst.msk [vmem:[#allocation7 + $0x1d8] sm:$0xff] %vm514_vm12, %v1970_v8  ;;  %v2421_v8 = vld [vmem:[#allocation7 + $0x250] sm:$0xff] }
 0x7a2   :  { %2615 = vmatpush.msra.mxu2 %v2380_v44  ;;  %2686 = vmatpush.msra.mxu1 %v2423_v43 }
 0x7a3   :  { %2727 = vmatpush.msra.mxu0 %v2439_v22  ;;  %2538 = vmatmul.f32.gmra.mxu1 %v2298_v13  ;;  %v2327_v22 = vld [vmem:[#allocation10 + $0x120] sm:$0xff] }
 0x7a4   :  { %2616 = vmatpush.msra.mxu2 %v2379_v31  ;;  %2642 = vmatpush.msra.mxu3 %v2410_v16  ;;  %v2321_v16 = vld [vmem:[#allocation10 + $0xf0] sm:$0xff] }
 0x7a5   :  { %2617 = vmatmul.f32.vlgmr.msra.gmra.mxu2 %v2293_v49  ;;  %2728 = vmatpush.msra.mxu0 %v2438_v50 }
 0x7a6   :  { %2579 = vmatmul.f32.gmra.mxu0 %v2299_v60  ;;  %2643 = vmatpush.msra.mxu3 %v2409_v15  ;;  %v2224_v53 = vpop.permute.xlu1 %2223  ;;  %v2333_v15 = vld [vmem:[#allocation10 + $0x150] sm:$0xff] }
 0x7a7   :  { %2033 = vrot.lane.b32.xlu2 %v4808_v52, %s5723_s7  ;;  %v1916_v34 = vpop.permute.xlu2 %1915  ;;  %v2082_v58 = vpop.permute.xlu0 %2081  ;;  %2233 = vst.msk [vmem:[#allocation7 + $0x2d0] sm:$0xff] %vm514_vm12, %v2224_v53  ;;  %v2400_v11 = vld [vmem:[#allocation7 + $0x1a8] sm:$0xff] }
 0x7a8   :  { %2644 = vmatpush.msra.mxu3 %v2408_v19  ;;  %1927 = vst.msk [vmem:[#allocation7 + $0x1a0] sm:$0xff] %vm503_vm11, %v1916_v34  ;;  %v2406_v33 = vld [vmem:[#allocation7 + $0x1d8] sm:$0xff]  ;;  %v2334_v34 = vld [vmem:[#allocation10 + $0x158] sm:$0xff] }
 0x7a9   :  { %2017 = vrot.lane.b32.xlu0 %v4546_v63, %s5724_s24  ;;  %2013 = vrot.lane.b32.xlu1 %v4504_v55, %s5724_s24  ;;  %2090 = vst.msk [vmem:[#allocation7 + $0x258] sm:$0xff] %vm503_vm11, %v2082_v58  ;;  %v2328_v19 = vld [vmem:[#allocation10 + $0x128] sm:$0xff]  ;;  %v2451_v58 = vld [vmem:[%s5727_s30 + $0x20] sm:$0xff] }
 0x7aa   :  { %2645 = vmatpush.msra.mxu3 %v2407_v38 }
 0x7ab   :  { %2541 = vmatmul.f32.gmra.mxu1 %v2305_v25 }
 0x7ac   :  { %2646 = vmatpush.msra.mxu3 %v2406_v33 }
 0x7ad   :  { %2620 = vmatmul.f32.gmra.mxu2 %v2300_v62 }
 0x7ae   :  { %2582 = vmatmul.f32.gmra.mxu0 %v2306_v7  ;;  %2647 = vmatpush.msra.mxu3 %v2405_v10  ;;  %v2206_v37 = vpop.permute.xlu1 %2205  ;;  %v2437_v42 = vld [vmem:[#allocation7 + $0x2d0] sm:$0xff]  ;;  %v2340_v7 = vld [vmem:[#allocation10 + $0x188] sm:$0xff] }
 0x7af   :  { %2015 = vrot.lane.b32.xlu2 %v4535_v30, %s5724_s24  ;;  %v1932_v26 = vpop.permute.xlu2 %1931  ;;  %v2098_v51 = vpop.permute.xlu0 %2097  ;;  %2216 = vst.msk [vmem:[#allocation7 + $0x2c8] sm:$0xff] %vm503_vm11, %v2206_v37  ;;  %2729 = vmatpush.msra.mxu0 %v2437_v42  ;;  %v2335_v10 = vld [vmem:[#allocation10 + $0x160] sm:$0xff]  ;;  %v2341_v37 = vld [vmem:[#allocation10 + $0x190] sm:$0xff] }
 0x7b0   :  { %2648 = vmatpush.msra.mxu3 %v2404_v3  ;;  %1943 = vst.msk [vmem:[#allocation7 + $0x1a0] sm:$0xff] %vm514_vm12, %v1932_v26  ;;  %v2454_v42 = vld [vmem:[%s5727_s30 + $0x38] sm:$0xff] }
 0x7b1   :  { %2187 = vrot.lane.b32.xlu0 %v5124_v20, %s5721_s26  ;;  %2159 = vrot.lane.b32.xlu1 %v3277_v54, %s5725_s29  ;;  %2106 = vst.msk [vmem:[#allocation7 + $0x258] sm:$0xff] %vm514_vm12, %v2098_v51  ;;  %v2342_v54 = vld [vmem:[#allocation10 + $0x198] sm:$0xff] }
 0x7b2   :  { %2649 = vmatpush.msra.mxu3 %v2403_v45  ;;  %v2447_v45 = vld [vmem:[%s5727_s30] sm:$0xff] }
 0x7b3   :  { %2544 = vmatmul.f32.gmra.mxu1 %v2312_v61 }
 0x7b4   :  { %2650 = vmatpush.msra.mxu3 %v2402_v35 }
 0x7b5   :  { %2623 = vmatmul.f32.gmra.mxu2 %v2307_v46 }
 0x7b6   :  { %2585 = vmatmul.f32.gmra.mxu0 %v2313_v14  ;;  %2651 = vmatpush.msra.mxu3 %v2401_v18  ;;  %v2222_v48 = vpop.permute.xlu1 %2221 }
 0x7b7   :  { %2161 = vrot.lane.b32.xlu2 %v4808_v52, %s5725_s29  ;;  %v1890_v1 = vpop.permute.xlu2 %1889  ;;  %v2078_v40 = vpop.permute.xlu0 %2077  ;;  %2232 = vst.msk [vmem:[#allocation7 + $0x2c8] sm:$0xff] %vm514_vm12, %v2222_v48  ;;  %v2399_v41 = vld [vmem:[#allocation7 + $0x1a0] sm:$0xff]  ;;  %v2320_v52 = vld [vmem:[#allocation10 + $0xe8] sm:$0xff] }
 0x7b8   :  { %2652 = vmatpush.msra.mxu3 %v2400_v11  ;;  %1898 = vst.msk [vmem:[#allocation7 + $0x198] sm:$0xff] %vm503_vm11, %v1890_v1  ;;  %v2422_v39 = vld [vmem:[#allocation7 + $0x258] sm:$0xff]  ;;  %v2450_v48 = vld [vmem:[%s5727_s30 + $0x18] sm:$0xff] }
 0x7b9   :  { %2145 = vrot.lane.b32.xlu0 %v4546_v63, %s5726_s6  ;;  %2141 = vrot.lane.b32.xlu1 %v4504_v55, %s5726_s6  ;;  %2088 = vst.msk [vmem:[#allocation7 + $0x248] sm:$0xff] %vm503_vm11, %v2078_v40  ;;  %v2326_v55 = vld [vmem:[#allocation10 + $0x118] sm:$0xff] }
 0x7ba   :  { %2653 = vmatpush.msra.mxu3 %v2399_v41  ;;  %2687 = vmatpush.msra.mxu1 %v2422_v39  ;;  %v2453_v39 = vld [vmem:[%s5727_s30 + $0x30] sm:$0xff] }
 0x7bb   :  { %2547 = vmatmul.f32.gmra.mxu1 %v2319_v4 }
 0x7bc   :  { %2688 = vmatpush.msra.mxu1 %v2421_v8 }
 0x7bd   :  { %2626 = vmatmul.f32.gmra.mxu2 %v2314_v32 }
 0x7be   :  { %2588 = vmatmul.f32.gmra.mxu0 %v2320_v52  ;;  %v2204_v13 = vpop.permute.xlu1 %2203  ;;  %v2436_v44 = vld [vmem:[#allocation7 + $0x2c8] sm:$0xff] }
 0x7bf   :  { %2143 = vrot.lane.b32.xlu2 %v4535_v30, %s5726_s6  ;;  %v1906_v63 = vpop.permute.xlu2 %1905  ;;  %v2094_v43 = vpop.permute.xlu0 %2093  ;;  %2215 = vst.msk [vmem:[#allocation7 + $0x2c0] sm:$0xff] %vm503_vm11, %v2204_v13  ;;  %2730 = vmatpush.msra.mxu0 %v2436_v44  ;;  %v2448_v30 = vld [vmem:[%s5727_s30 + $0x8] sm:$0xff] }
 0x7c0   :  { %1914 = vst.msk [vmem:[#allocation7 + $0x198] sm:$0xff] %vm514_vm12, %v1906_v63 }
 0x7c1   :  { %2277 = vrot.lane.b32.xlu0 %v5113_v47, %s5722_s27  ;;  %2139 = vrot.lane.b32.xlu1 %v4516_v12, %s5726_s6  ;;  %2104 = vst.msk [vmem:[#allocation7 + $0x248] sm:$0xff] %vm514_vm12, %v2094_v43  ;;  %v2294_v43 = vld [vmem:[#allocation10 + $0x18] sm:$0xff] }
 0x7c3   :  { %2550 = vmatmul.f32.gmra.mxu1 %v2326_v55 }
 0x7c5   :  { %2629 = vmatmul.f32.gmra.mxu2 %v2321_v16 }
 0x7c6   :  { %2591 = vmatmul.f32.gmra.mxu0 %v2327_v22  ;;  %v2220_v49 = vpop.permute.xlu1 %2219 }
 0x7c7   :  { %2275 = vrot.lane.b32.xlu2 %v5124_v20, %s5722_s27  ;;  %v1888_v50 = vpop.permute.xlu2 %1887  ;;  %v2076_v31 = vpop.permute.xlu0 %2075  ;;  %2231 = vst.msk [vmem:[#allocation7 + $0x2c0] sm:$0xff] %vm514_vm12, %v2220_v49  ;;  %v2398_v60 = vld [vmem:[#allocation7 + $0x198] sm:$0xff]  ;;  %v2301_v49 = vld [vmem:[#allocation10 + $0x50] sm:$0xff] }
 0x7c8   :  { %1897 = vst.msk [vmem:[#allocation7 + $0x190] sm:$0xff] %vm503_vm11, %v1888_v50  ;;  %2654 = vmatpush.msra.mxu3 %v2398_v60  ;;  %v2420_v53 = vld [vmem:[#allocation7 + $0x248] sm:$0xff] }
 0x7c9   :  { %2029 = vrot.lane.b32.xlu0 %v5113_v47, %s5723_s7  ;;  %2462 = vperm.xlu1 %3270, %v2448_v30   ;;  %2087 = vst.msk [vmem:[#allocation7 + $0x240] sm:$0xff] %vm503_vm11, %v2076_v31 }
 0x7ca   :  { %2689 = vmatpush.msra.mxu1 %v2420_v53 }
 0x7cb   :  { %2553 = vmatmul.f32.gmra.mxu1 %v2333_v15 }
 0x7cd   :  { %2632 = vmatmul.f32.gmra.mxu2 %v2328_v19  ;;  %v2308_v19 = vld [vmem:[#allocation10 + $0x88] sm:$0xff] }
 0x7ce   :  { %2594 = vmatmul.f32.gmra.mxu0 %v2334_v34  ;;  %v2178_v25 = vpop.permute.xlu1 %2177  ;;  %v2435_v38 = vld [vmem:[#allocation7 + $0x2c0] sm:$0xff] }
 0x7cf   :  { %2027 = vrot.lane.b32.xlu2 %v5124_v20, %s5723_s7  ;;  %v1904_v33 = vpop.permute.xlu2 %1903  ;;  %v2092_v62 = vpop.permute.xlu0 %2091  ;;  %2186 = vst.msk [vmem:[#allocation7 + $0x2b8] sm:$0xff] %vm503_vm11, %v2178_v25  ;;  %2731 = vmatpush.msra.mxu0 %v2435_v38 }
 0x7d0   :  { %1913 = vst.msk [vmem:[#allocation7 + $0x190] sm:$0xff] %vm514_vm12, %v1904_v33  ;;  %v2832_v33 = vld [vmem:[%s5728_s22 + $0x40] sm:$0xff] }
 0x7d1   :  { %2011 = vrot.lane.b32.xlu0 %v4516_v12, %s5724_s24  ;;  %2477 = vperm.xlu1 %3270, %v2451_v58   ;;  %2103 = vst.msk [vmem:[#allocation7 + $0x240] sm:$0xff] %vm514_vm12, %v2092_v62  ;;  %v2833_v58 = vld [vmem:[%s5728_s22 + $0x48] sm:$0xff]  ;;  %v2831_v62 = vld [vmem:[%s5728_s22 + $0x38] sm:$0xff] }
 0x7d3   :  { %2556 = vmatmul.f32.gmra.mxu1 %v2340_v7  ;;  %v2315_v7 = vld [vmem:[#allocation10 + $0xc0] sm:$0xff] }
 0x7d5   :  { %2635 = vmatmul.f32.gmra.mxu2 %v2335_v10  ;;  %v2830_v10 = vld [vmem:[%s5728_s22 + $0x30] sm:$0xff] }
 0x7d6   :  { %2597 = vmatmul.f32.gmra.mxu0 %v2341_v37  ;;  %v2194_v3 = vpop.permute.xlu1 %2193 }
 0x7d7   :  { %2155 = vrot.lane.b32.xlu2 %v5124_v20, %s5725_s29  ;;  %v1886_v26 = vpop.permute.xlu2 %1885  ;;  %v2050_v51 = vpop.permute.xlu0 %2049  ;;  %2202 = vst.msk [vmem:[#allocation7 + $0x2b8] sm:$0xff] %vm514_vm12, %v2194_v3  ;;  %v2397_v12 = vld [vmem:[#allocation7 + $0x190] sm:$0xff]  ;;  %v2449_v20 = vld [vmem:[%s5727_s30 + $0x10] sm:$0xff] }
 0x7d8   :  { %1896 = vst.msk [vmem:[#allocation7 + $0x188] sm:$0xff] %vm503_vm11, %v1886_v26  ;;  %2655 = vmatpush.msra.mxu3 %v2397_v12  ;;  %v2419_v61 = vld [vmem:[#allocation7 + $0x240] sm:$0xff]  ;;  %v2829_v3 = vld [vmem:[%s5728_s22 + $0x28] sm:$0xff]  ;;  %v2828_v12 = vld [vmem:[%s5728_s22 + $0x20] sm:$0xff] }
 0x7d9   :  { %2157 = vrot.lane.b32.xlu0 %v5113_v47, %s5725_s29  ;;  %2492 = vperm.xlu1 %3270, %v2454_v42   ;;  %2058 = vst.msk [vmem:[#allocation7 + $0x238] sm:$0xff] %vm503_vm11, %v2050_v51  ;;  %v2452_v47 = vld [vmem:[%s5727_s30 + $0x28] sm:$0xff] }
 0x7da   :  { %2690 = vmatpush.msra.mxu1 %v2419_v61  ;;  %v2827_v61 = vld [vmem:[%s5728_s22 + $0x18] sm:$0xff] }
 0x7dd   :  { %2638 = vmatmul.f32.gmra.mxu2 %v2342_v54  ;;  %v2322_v54 = vld [vmem:[#allocation10 + $0xf8] sm:$0xff] }
 0x7de   :  { %v2176_v46 = vpop.permute.xlu1 %2175  ;;  %v2434_v35 = vld [vmem:[#allocation7 + $0x2b8] sm:$0xff] }
 0x7df   :  { %2467 = vperm.xlu2 %3268, %v2449_v20   ;;  %v1902_v14 = vpop.permute.xlu2 %1901  ;;  %v2066_v18 = vpop.permute.xlu0 %2065  ;;  %2185 = vst.msk [vmem:[#allocation7 + $0x2b0] sm:$0xff] %vm503_vm11, %v2176_v46  ;;  %2732 = vmatpush.msra.mxu0 %v2434_v35  ;;  %v2826_v20 = vld [vmem:[%s5728_s22 + $0x10] sm:$0xff]  ;;  %v2825_v46 = vld [vmem:[%s5728_s22 + $0x8] sm:$0xff] }
 0x7e0   :  { %1912 = vst.msk [vmem:[#allocation7 + $0x188] sm:$0xff] %vm514_vm12, %v1902_v14 }
 0x7e1   :  { %2457 = vperm.xlu0 %3269, %v2447_v45   ;;  %2074 = vst.msk [vmem:[#allocation7 + $0x238] sm:$0xff] %vm514_vm12, %v2066_v18 }
 0x7e6   :  { %v2192_v11 = vpop.permute.xlu1 %2191 }
 0x7e7   :  { %2482 = vperm.xlu2 %3268, %v2452_v47   ;;  %v1884_v1 = vpop.permute.xlu2 %1883  ;;  %v2048_v40 = vpop.permute.xlu0 %2047  ;;  %2201 = vst.msk [vmem:[#allocation7 + $0x2b0] sm:$0xff] %vm514_vm12, %v2192_v11  ;;  %v2396_v41 = vld [vmem:[#allocation7 + $0x188] sm:$0xff] }
 0x7e8   :  { %1895 = vst.msk [vmem:[#allocation7 + $0x180] sm:$0xff] %vm503_vm11, %v1884_v1  ;;  %2656 = vmatpush.msra.mxu3 %v2396_v41  ;;  %v2418_v4 = vld [vmem:[#allocation7 + $0x238] sm:$0xff]  ;;  %v2824_v47 = vld [vmem:[%s5728_s22] sm:$0xff] }
 0x7e9   :  { %2472 = vperm.xlu0 %3269, %v2450_v48   ;;  %2057 = vst.msk [vmem:[#allocation7 + $0x230] sm:$0xff] %vm503_vm11, %v2048_v40  ;;  %2691 = vmatpush.msra.mxu1 %v2418_v4  ;;  %v2329_v48 = vld [vmem:[#allocation10 + $0x130] sm:$0xff] }
 0x7ee   :  { %v2433_v32 = vld [vmem:[#allocation7 + $0x2b0] sm:$0xff] }
 0x7ef   :  { %v2064_v52 = vpop.permute.xlu0 %2063  ;;  %2733 = vmatpush.msra.mxu0 %v2433_v32  ;;  %v2336_v32 = vld [vmem:[#allocation10 + $0x168] sm:$0xff] }
 0x7f0   :  { %v1900_v8 = vpop.permute.xlu2 %1899  ;;  %2073 = vst.msk [vmem:[#allocation7 + $0x230] sm:$0xff] %vm514_vm12, %v2064_v52  ;;  %v2174_v13 = vpop.permute.xlu1 %2173 }
 0x7f1   :  { %2487 = vperm.xlu0 %3269, %v2453_v39   ;;  %1911 = vst.msk [vmem:[#allocation7 + $0x180] sm:$0xff] %vm514_vm12, %v1900_v8  ;;  %v1349_v39 = vpop.f32.mrf.mxu3 }
 0x7f2   :  { %2184 = vst.msk [vmem:[#allocation7 + $0x2a8] sm:$0xff] %vm503_vm11, %v2174_v13 }
 0x7f7   :  { %v2046_v44 = vpop.permute.xlu0 %2045  ;;  %v2417_v63 = vld [vmem:[#allocation7 + $0x230] sm:$0xff] }
 0x7f8   :  { %2056 = vst.msk [vmem:[#allocation7 + $0x228] sm:$0xff] %vm503_vm11, %v2046_v44  ;;  %v2190_v55 = vpop.permute.xlu1 %2189  ;;  %v2395_v16 = vld [vmem:[#allocation7 + $0x180] sm:$0xff]  ;;  %2692 = vmatpush.msra.mxu1 %v2417_v63  ;;  %v2343_v63 = vld [vmem:[#allocation10 + $0x1a0] sm:$0xff] }
 0x7f9   :  { %v2282_v22 = vpop.permute.xlu2 %2281  ;;  %2200 = vst.msk [vmem:[#allocation7 + $0x2a8] sm:$0xff] %vm514_vm12, %v2190_v55  ;;  %2657 = vmatpush.msra.mxu3 %v2395_v16 }
 0x7fa   :  { %2290 = vst.msk [vmem:[#allocation7 + $0x318] sm:$0xff] %vm514_vm12, %v2282_v22  ;;  %2658 = vmatmul.f32.vlgmr.msra.gmra.mxu3 %v2294_v43  ;;  %v1352_v43 = vpop.f32.mrf.mxu3 }
 0x7fb   :  { %2865 = vmatpush.msrb.mxu3 %v2833_v58 }
 0x7fd   :  { %2866 = vmatpush.msrb.mxu3 %v2832_v33 }
 0x7ff   :  { %v2062_v30 = vpop.permute.xlu0 %2061  ;;  %2867 = vmatpush.msrb.mxu3 %v2831_v62 }
 0x800   :  { %2072 = vst.msk [vmem:[#allocation7 + $0x228] sm:$0xff] %vm514_vm12, %v2062_v30  ;;  %v2172_v50 = vpop.permute.xlu1 %2171  ;;  %v2432_v31 = vld [vmem:[#allocation7 + $0x2a8] sm:$0xff] }
 0x801   :  { %v2034_v60 = vpop.permute.xlu2 %2033  ;;  %2183 = vst.msk [vmem:[#allocation7 + $0x2a0] sm:$0xff] %vm503_vm11, %v2172_v50  ;;  %2734 = vmatpush.msra.mxu0 %v2432_v31  ;;  %v2446_v15 = vld [vmem:[#allocation7 + $0x318] sm:$0xff]  ;;  %2868 = vmatpush.msrb.mxu3 %v2830_v10  ;;  %v1350_v50 = vadd.f32 %v1349_v39, %v4471_v21  ;;  %v2311_v10 = vld [vmem:[#allocation10 + $0xa0] sm:$0xff]  ;;  %v2818_v39 = vld [vmem:[#allocation8 + $0x20] sm:$0xff] }
 0x802   :  { %2777 = vmatpush.msrb.mxu2 %v2446_v15  ;;  %2661 = vmatmul.f32.gmra.mxu3 %v2301_v49  ;;  %v1355_v31 = vpop.f32.mrf.mxu3  ;;  %v2304_v21 = vld [vmem:[#allocation10 + $0x68] sm:$0xff] }
 0x803   :  { %2869 = vmatpush.msrb.mxu3 %v2829_v3  ;;  %v1356_v33 = vadd.f32 %v1355_v31, %v4493_v5  ;;  %v2296_v5 = vld [vmem:[#allocation10 + $0x28] sm:$0xff] }
 0x805   :  { %2870 = vmatpush.msrb.mxu3 %v2828_v12 }
 0x807   :  { %v2416_v53 = vld [vmem:[#allocation7 + $0x228] sm:$0xff]  ;;  %2871 = vmatpush.msrb.mxu3 %v2827_v61  ;;  %v5301_v61 = vpop.f32.mrf.mxu1 }
 0x808   :  { %v2044_v34 = vpop.permute.xlu0 %2043  ;;  %2693 = vmatpush.msra.mxu1 %v2416_v53  ;;  %v2297_v53 = vld [vmem:[#allocation10 + $0x30] sm:$0xff] }
 0x809   :  { %v2016_v25 = vpop.permute.xlu2 %2015  ;;  %2055 = vst.msk [vmem:[#allocation7 + $0x220] sm:$0xff] %vm503_vm11, %v2044_v34  ;;  %v2280_v38 = vpop.permute.xlu1 %2279  ;;  %2872 = vmatpush.msrb.mxu3 %v2826_v20  ;;  %v1353_v34 = vadd.f32 %v1352_v43, %v4491_v36  ;;  %v2822_v20 = vld [vmem:[#allocation8 + $0x40] sm:$0xff] }
 0x80a   :  { %2025 = vst.msk [vmem:[#allocation7 + $0x210] sm:$0xff] %vm503_vm11, %v2016_v25  ;;  %2664 = vmatmul.f32.gmra.mxu3 %v2308_v19 }
 0x80b   :  { %2289 = vst.msk [vmem:[#allocation7 + $0x310] sm:$0xff] %vm514_vm12, %v2280_v38  ;;  %2873 = vmatpush.msrb.mxu3 %v2825_v46  ;;  %v1358_v38 = vpop.f32.mrf.mxu3  ;;  %v2309_v46 = vld [vmem:[#allocation10 + $0x90] sm:$0xff] }
 0x80d   :  { %2874 = vmatpush.msrb.mxu3 %v2824_v47  ;;  %v2820_v47 = vld [vmem:[#allocation8 + $0x30] sm:$0xff] }
 0x811   :  { %v2162_v37 = vpop.permute.xlu2 %2161 }
 0x812   :  { %v2445_v42 = vld [vmem:[#allocation7 + $0x310] sm:$0xff]  ;;  %2667 = vmatmul.f32.gmra.mxu3 %v2315_v7 }
 0x813   :  { %v2060_v26 = vpop.permute.xlu0 %2059  ;;  %v2032_v51 = vpop.permute.xlu1 %2031  ;;  %2778 = vmatpush.msrb.mxu2 %v2445_v42  ;;  %v2295_v7 = vld [vmem:[#allocation10 + $0x20] sm:$0xff]  ;;  %v1359_v42 = vadd.f32 %v1358_v38, %v4478_v56 }
 0x814   :  { %2071 = vst.msk [vmem:[#allocation7 + $0x220] sm:$0xff] %vm514_vm12, %v2060_v26  ;;  %v2302_v26 = vld [vmem:[#allocation10 + $0x58] sm:$0xff] }
 0x815   :  { %2041 = vst.msk [vmem:[#allocation7 + $0x210] sm:$0xff] %vm514_vm12, %v2032_v51  ;;  %v2318_v51 = vld [vmem:[#allocation10 + $0xd8] sm:$0xff] }
 0x819   :  { %v2144_v45 = vpop.permute.xlu2 %2143 }
 0x81a   :  { %2153 = vst.msk [vmem:[#allocation7 + $0x290] sm:$0xff] %vm503_vm11, %v2144_v45  ;;  %2670 = vmatmul.f32.gmra.mxu3 %v2322_v54  ;;  %v2823_v54 = vld [vmem:[#allocation8 + $0x48] sm:$0xff] }
 0x81b   :  { %v2018_v35 = vpop.permute.xlu0 %2017  ;;  %v2014_v14 = vpop.permute.xlu1 %2013  ;;  %v2415_v18 = vld [vmem:[#allocation7 + $0x220] sm:$0xff] }
 0x81c   :  { %2026 = vst.msk [vmem:[#allocation7 + $0x218] sm:$0xff] %vm503_vm11, %v2018_v35  ;;  %2694 = vmatpush.msra.mxu1 %v2415_v18  ;;  %v2413_v4 = vld [vmem:[#allocation7 + $0x210] sm:$0xff]  ;;  %v2821_v18 = vld [vmem:[#allocation8 + $0x38] sm:$0xff] }
 0x81d   :  { %2042 = vst.msk [vmem:[#allocation7 + $0x218] sm:$0xff] %vm514_vm12, %v2034_v60  ;;  %v2303_v35 = vld [vmem:[#allocation10 + $0x60] sm:$0xff] }
 0x81e   :  { %2024 = vst.msk [vmem:[#allocation7 + $0x208] sm:$0xff] %vm503_vm11, %v2014_v14  ;;  %v2325_v14 = vld [vmem:[#allocation10 + $0x110] sm:$0xff] }
 0x821   :  { %v2276_v11 = vpop.permute.xlu2 %2275 }
 0x822   :  { %2287 = vst.msk [vmem:[#allocation7 + $0x300] sm:$0xff] %vm514_vm12, %v2276_v11  ;;  %2673 = vmatmul.f32.gmra.mxu3 %v2329_v48  ;;  %v5308_v11 = vpop.f32.mrf.mxu1 }
 0x823   :  { %v2188_v1 = vpop.permute.xlu0 %2187  ;;  %v2160_v40 = vpop.permute.xlu1 %2159 }
 0x824   :  { %2199 = vst.msk [vmem:[#allocation7 + $0x2a0] sm:$0xff] %vm514_vm12, %v2188_v1  ;;  %v2414_v41 = vld [vmem:[#allocation7 + $0x218] sm:$0xff] }
 0x825   :  { %2169 = vst.msk [vmem:[#allocation7 + $0x290] sm:$0xff] %vm514_vm12, %v2160_v40  ;;  %2695 = vmatpush.msra.mxu1 %v2414_v41  ;;  %v2316_v40 = vld [vmem:[#allocation10 + $0xc8] sm:$0xff]  ;;  %v2310_v41 = vld [vmem:[#allocation10 + $0x98] sm:$0xff] }
 0x827   :  { %2696 = vmatpush.msra.mxu1 %v2413_v4  ;;  %v2332_v4 = vld [vmem:[#allocation10 + $0x148] sm:$0xff] }
 0x828   :  { %v5318_v31 = vpop.f32.mrf.mxu2 }
 0x829   :  { %v2028_v52 = vpop.permute.xlu2 %2027  ;;  %v2443_v19 = vld [vmem:[#allocation7 + $0x300] sm:$0xff] }
 0x82a   :  { %2676 = vmatmul.f32.gmra.mxu3 %v2336_v32  ;;  %v2817_v32 = vld [vmem:[#allocation8 + $0x18] sm:$0xff] }
 0x82b   :  { %v2146_v8 = vpop.permute.xlu0 %2145  ;;  %v2431_v13 = vld [vmem:[#allocation7 + $0x2a0] sm:$0xff]  ;;  %v2142_v44 = vpop.permute.xlu1 %2141 }
 0x82c   :  { %2154 = vst.msk [vmem:[#allocation7 + $0x298] sm:$0xff] %vm503_vm11, %v2146_v8  ;;  %2735 = vmatpush.msra.mxu0 %v2431_v13  ;;  %v2429_v49 = vld [vmem:[#allocation7 + $0x290] sm:$0xff]  ;;  %v453_v8 = vpop.f32.mrf.mxu1 }
 0x82d   :  { %2170 = vst.msk [vmem:[#allocation7 + $0x298] sm:$0xff] %vm514_vm12, %v2162_v37  ;;  %v1361_v37 = vpop.f32.mrf.mxu3  ;;  %v2323_v13 = vld [vmem:[#allocation10 + $0x100] sm:$0xff] }
 0x82e   :  { %2152 = vst.msk [vmem:[#allocation7 + $0x288] sm:$0xff] %vm503_vm11, %v2142_v44  ;;  %v1362_v45 = vadd.f32 %v1361_v37, %v4500_v57  ;;  %v2819_v57 = vld [vmem:[#allocation8 + $0x28] sm:$0xff]  ;;  %v2317_v44 = vld [vmem:[#allocation10 + $0xd0] sm:$0xff] }
 0x82f   :  { %v2973_v37 = vld [vmem:[%s5729_s11 + $0x40] sm:$0xff] }
 0x831   :  { %v2156_v55 = vpop.permute.xlu2 %2155 }
 0x832   :  { %2679 = vmatmul.f32.gmra.mxu3 %v2343_v63  ;;  %v2339_v63 = vld [vmem:[#allocation10 + $0x180] sm:$0xff] }
 0x833   :  { %v2278_v16 = vpop.permute.xlu0 %2277  ;;  %v2140_v22 = vpop.permute.xlu1 %2139 }
 0x834   :  { %2288 = vst.msk [vmem:[#allocation7 + $0x308] sm:$0xff] %vm514_vm12, %v2278_v16  ;;  %v2430_v30 = vld [vmem:[#allocation7 + $0x298] sm:$0xff]  ;;  %v2814_v16 = vld [vmem:[#allocation8] sm:$0xff] }
 0x835   :  { %2151 = vst.msk [vmem:[#allocation7 + $0x280] sm:$0xff] %vm503_vm11, %v2140_v22  ;;  %2736 = vmatpush.msra.mxu0 %v2430_v30  ;;  %v1364_v56 = vpop.f32.mrf.mxu3  ;;  %v2324_v30 = vld [vmem:[#allocation10 + $0x108] sm:$0xff] }
 0x836   :  { %2167 = vst.msk [vmem:[#allocation7 + $0x280] sm:$0xff] %vm514_vm12, %v2156_v55  ;;  %v1365_v48 = vadd.f32 %v1364_v56, %v4502_v17  ;;  %v2815_v55 = vld [vmem:[#allocation8 + $0x8] sm:$0xff] }
 0x837   :  { %2737 = vmatpush.msra.mxu0 %v2429_v49  ;;  %v2346_v49 = vld [vmem:[#allocation10 + $0x1b8] sm:$0xff] }
 0x838   :  { %v2969_v56 = vld [vmem:[%s5729_s11 + $0x20] sm:$0xff] }
 0x83a   :  { %3134 = vmatmul.msk.f32.vlgmr.msrb.gmra.mxu3 %vm2834_vm10, %v1350_v50  ;;  %v456_v50 = vpop.f32.mrf.mxu1 }
 0x83b   :  { %v2030_v60 = vpop.permute.xlu0 %2029  ;;  %v2444_v15 = vld [vmem:[#allocation7 + $0x308] sm:$0xff] }
 0x83c   :  { %2040 = vst.msk [vmem:[#allocation7 + $0x208] sm:$0xff] %vm514_vm12, %v2030_v60  ;;  %2779 = vmatpush.msrb.mxu2 %v2444_v15  ;;  %v2337_v60 = vld [vmem:[#allocation10 + $0x170] sm:$0xff]  ;;  %v2331_v15 = vld [vmem:[#allocation10 + $0x140] sm:$0xff] }
 0x83d   :  { %v2427_v12 = vld [vmem:[#allocation7 + $0x280] sm:$0xff]  ;;  %v1367_v1 = vpop.f32.mrf.mxu3 }
 0x83e   :  { %2780 = vmatpush.msrb.mxu2 %v2443_v19  ;;  %v1368_v17 = vadd.f32 %v1367_v1, %v4484_v6  ;;  %v2330_v6 = vld [vmem:[#allocation10 + $0x138] sm:$0xff]  ;;  %v2344_v19 = vld [vmem:[#allocation10 + $0x1a8] sm:$0xff] }
 0x83f   :  { %3126 = vmatmul.msk.f32.vlgmr.msrb.gmra.mxu2 %vm1307_vm6, %v2297_v53  ;;  %v2965_v1 = vld [vmem:[%s5729_s11] sm:$0xff] }
 0x842   :  { %3135 = vmatmul.msk.f32.gmra.mxu3 %vm2834_vm10, %v1353_v34  ;;  %v5320_v53 = vpop.f32.mrf.mxu1  ;;  %v2338_v34 = vld [vmem:[#allocation10 + $0x178] sm:$0xff] }
 0x843   :  { %v2012_v58 = vpop.permute.xlu0 %2011  ;;  %v2412_v25 = vld [vmem:[#allocation7 + $0x208] sm:$0xff] }
 0x844   :  { %2023 = vst.msk [vmem:[#allocation7 + $0x200] sm:$0xff] %vm503_vm11, %v2012_v58  ;;  %2697 = vmatpush.msra.mxu1 %v2412_v25  ;;  %v5324_v58 = vpop.f32.mrf.mxu0  ;;  %vm3048_vm11 = vcmask 48128  }
 0x845   :  { %2039 = vst.msk [vmem:[#allocation7 + $0x200] sm:$0xff] %vm514_vm12, %v2028_v52  ;;  %v2816_v52 = vld [vmem:[#allocation8 + $0x10] sm:$0xff]  ;;  %v1370_v43 = vpop.f32.mrf.mxu3 }
 0x846   :  { %v1371_v22 = vadd.f32 %v1370_v43, %v4510_v59  ;;  %v5322_v59 = vpop.f32.mrf.mxu2 }
 0x847   :  { %3127 = vmatmul.msk.f32.gmra.mxu2 %vm1307_vm6, %v2304_v21  ;;  %v448_v21 = vadd.f32 %v5301_v61, %v3688_v2 }
 0x84a   :  { %3136 = vmatmul.msk.f32.gmra.mxu3 %vm2834_vm10, %v1356_v33  ;;  %v5326_v25 = vpop.f32.mrf.mxu1  ;;  %v2345_v33 = vld [vmem:[#allocation10 + $0x1b0] sm:$0xff] }
 0x84b   :  { %v2158_v62 = vpop.permute.xlu0 %2157 }
 0x84c   :  { %2168 = vst.msk [vmem:[#allocation7 + $0x288] sm:$0xff] %vm514_vm12, %v2158_v62  ;;  %v2411_v36 = vld [vmem:[#allocation7 + $0x200] sm:$0xff]  ;;  %v2974_v62 = vld [vmem:[%s5729_s11 + $0x48] sm:$0xff] }
 0x84d   :  { %2698 = vmatpush.msra.mxu1 %v2411_v36 }
 0x84e   :  { %2699 = vmatmul.f32.vlgmr.msra.gmra.mxu1 %v2295_v7  ;;  %v5330_v38 = vpop.f32.mrf.mxu2  ;;  %v5336_v7 = vpop.f32.mrf.mxu0 }
 0x84f   :  { %3128 = vmatmul.msk.f32.gmra.mxu2 %vm1307_vm6, %v2311_v10  ;;  %2930 = vmatpush.msrb.mxu1 %v2823_v54  ;;  %v451_v10 = vadd.f32 %v5308_v11, %v3745_v27  ;;  %v2972_v27 = vld [vmem:[%s5729_s11 + $0x38] sm:$0xff] }
 0x851   :  { %2931 = vmatpush.msrb.mxu1 %v2822_v20  ;;  %v5730_v20 = vld [vmem:[#allocation16_spill] sm:$0xff] }
 0x852   :  { %3137 = vmatmul.msk.f32.gmra.mxu3 %vm2834_vm10, %v1359_v42  ;;  %v5338_v36 = vpop.f32.mrf.mxu1 }
 0x853   :  { %v2428_v3 = vld [vmem:[#allocation7 + $0x288] sm:$0xff]  ;;  %2932 = vmatpush.msrb.mxu1 %v2821_v18 }
 0x854   :  { %2738 = vmatpush.msra.mxu0 %v2428_v3 }
 0x855   :  { %2933 = vmatpush.msrb.mxu1 %v2820_v47  ;;  %v2968_v47 = vld [vmem:[%s5729_s11 + $0x18] sm:$0xff] }
 0x856   :  { %2702 = vmatmul.f32.gmra.mxu1 %v2302_v26  ;;  %2739 = vmatpush.msra.mxu0 %v2427_v12  ;;  %v5342_v2 = vpop.f32.mrf.mxu2  ;;  %v5348_v42 = vpop.f32.mrf.mxu0  ;;  %v454_v26 = vadd.f32 %v453_v8, %v3749_v29  ;;  %v2971_v29 = vld [vmem:[%s5729_s11 + $0x30] sm:$0xff] }
 0x857   :  { %2740 = vmatmul.f32.vlgmr.msra.gmra.mxu0 %v2296_v5  ;;  %3129 = vmatmul.msk.f32.gmra.mxu2 %vm1307_vm6, %v2318_v51  ;;  %v457_v51 = vadd.f32 %v456_v50, %v3747_v28  ;;  %v2970_v28 = vld [vmem:[%s5729_s11 + $0x28] sm:$0xff] }
 0x858   :  { %2934 = vmatpush.msrb.mxu1 %v2819_v57  ;;  %3005 = vmatpush.msrb.mxu0 %v2974_v62 }
 0x85a   :  { %3138 = vmatmul.msk.f32.gmra.mxu3 %vm2834_vm10, %v1362_v45  ;;  %2935 = vmatpush.msrb.mxu1 %v2818_v39  ;;  %v5350_v3 = vpop.f32.mrf.mxu1  ;;  %v460_v45 = vadd.f32 %v4434_v24, %v5730_v20 }
 0x85b   :  { %3006 = vmatpush.msrb.mxu0 %v2973_v37 }
 0x85c   :  { %2936 = vmatpush.msrb.mxu1 %v2817_v32 }
 0x85d   :  { %3007 = vmatpush.msrb.mxu0 %v2972_v27 }
 0x85e   :  { %2705 = vmatmul.f32.gmra.mxu1 %v2309_v46  ;;  %v5357_v5 = vpop.f32.mrf.mxu2  ;;  %v5360_v12 = vpop.f32.mrf.mxu0 }
 0x85f   :  { %2743 = vmatmul.f32.gmra.mxu0 %v2303_v35  ;;  %3130 = vmatmul.msk.f32.gmra.mxu2 %vm1307_vm6, %v2325_v14  ;;  %v5731_v14 = vld [vmem:[#allocation15_spill] sm:$0xff] }
 0x860   :  { %2937 = vmatpush.msrb.mxu1 %v2816_v52  ;;  %3008 = vmatpush.msrb.mxu0 %v2971_v29  ;;  %v463_v24 = vadd.f32 %v4436_v9, %v5731_v14  ;;  %v2966_v9 = vld [vmem:[%s5729_s11 + $0x8] sm:$0xff]  ;;  %v5733_v52 = vld [vmem:[#allocation17_spill] sm:$0xff] }
 0x861   :  { %v469_v8 = vadd.f32 %v4440_v0, %v5733_v52  ;;  %v2468_v0 = vpop.permute.xlu2 %2467 }
 0x862   :  { %3139 = vmatmul.msk.f32.gmra.mxu3 %vm2834_vm10, %v1365_v48  ;;  %2938 = vmatpush.msrb.mxu1 %v2815_v55  ;;  %v5362_v61 = vpop.f32.mrf.mxu1  ;;  %v2967_v48 = vld [vmem:[%s5729_s11 + $0x10] sm:$0xff] }
 0x863   :  { %3009 = vmatpush.msrb.mxu0 %v2970_v28 }
 0x864   :  { %2939 = vmatpush.msrb.mxu1 %v2814_v16  ;;  %v2463_v16 = vpop.permute.xlu1 %2462 }
 0x865   :  { %3010 = vmatpush.msrb.mxu0 %v2969_v56 }
 0x866   :  { %2708 = vmatmul.f32.gmra.mxu1 %v2316_v40  ;;  %v5368_v54 = vpop.f32.mrf.mxu2  ;;  %v5378_v46 = vpop.f32.mrf.mxu0  ;;  %v5732_v40 = vld [vmem:[#allocation14_spill] sm:$0xff] }
 0x867   :  { %2746 = vmatmul.f32.gmra.mxu0 %v2310_v41  ;;  %3131 = vmatmul.msk.f32.gmra.mxu2 %vm1307_vm6, %v2332_v4  ;;  %v466_v41 = vadd.f32 %v4438_v23, %v5732_v40 }
 0x868   :  { %3160 = vmatpush.msra.mxu1 %v2974_v62  ;;  %3011 = vmatpush.msrb.mxu0 %v2968_v47 }
 0x86a   :  { %3140 = vmatmul.msk.f32.gmra.mxu3 %vm2834_vm10, %v1368_v17  ;;  %3161 = vmatpush.msra.mxu1 %v2973_v37  ;;  %v5381_v35 = vpop.f32.mrf.mxu1 }
 0x86b   :  { %3012 = vmatpush.msrb.mxu0 %v2967_v48 }
 0x86c   :  { %3162 = vmatpush.msra.mxu1 %v2972_v27  ;;  %v2478_v14 = vpop.permute.xlu1 %2477 }
 0x86d   :  { %3013 = vmatpush.msrb.mxu0 %v2966_v9  ;;  %v2549_v40 = vadd.f32 %v5362_v61, %v2478_v14 }
 0x86e   :  { %2711 = vmatmul.f32.gmra.mxu1 %v2323_v13  ;;  %v5385_v18 = vpop.f32.mrf.mxu2  ;;  %v5394_v11 = vpop.f32.mrf.mxu0 }
 0x86f   :  { %2749 = vmatmul.f32.gmra.mxu0 %v2317_v44  ;;  %3132 = vmatmul.msk.f32.gmra.mxu2 %vm1307_vm6, %v2339_v63  ;;  %v2458_v13 = vpop.permute.xlu0 %2457 }
 0x870   :  { %3163 = vmatpush.msra.mxu1 %v2971_v29  ;;  %3014 = vmatpush.msrb.mxu0 %v2965_v1  ;;  %v2537_v23 = vadd.f32 %v5320_v53, %v2458_v13 }
 0x872   :  { %3141 = vmatmul.msk.f32.gmra.mxu3 %vm2834_vm10, %v1371_v22  ;;  %3164 = vmatpush.msra.mxu1 %v2970_v28  ;;  %v5396_v57 = vpop.f32.mrf.mxu1  ;;  %v2578_v43 = vadd.f32 %v5324_v58, %v2537_v23  ;;  %v2543_v58 = vadd.f32 %v5338_v36, %v2468_v0 }
 0x874   :  { %3165 = vmatpush.msra.mxu1 %v2969_v56 }
 0x876   :  { %2714 = vmatmul.f32.gmra.mxu1 %v2330_v6  ;;  %v5406_v4 = vpop.f32.mrf.mxu2  ;;  %v5409_v32 = vpop.f32.mrf.mxu0  ;;  %v2540_v6 = vadd.f32 %v5326_v25, %v2463_v16 }
 0x877   :  { %2752 = vmatmul.f32.gmra.mxu0 %v2324_v30  ;;  %3133 = vmatmul.msk.f32.gmra.mxu2 %vm1307_vm6, %v2346_v49  ;;  %v2619_v30 = vadd.f32 %v5318_v31, %v2578_v43  ;;  %v2584_v31 = vadd.f32 %v5348_v42, %v2543_v58 }
 0x878   :  { %3166 = vmatpush.msra.mxu1 %v2968_v47 }
 0x879   :  { %v2625_v36 = vadd.f32 %v5330_v38, %v2584_v31 }
 0x87a   :  { %3167 = vmatpush.msra.mxu1 %v2967_v48  ;;  %v5411_v17 = vpop.f32.mrf.mxu1 }
 0x87c   :  { %3168 = vmatpush.msra.mxu1 %v2966_v9 }
 0x87d   :  { %v2659_v39 = vpop.f32.mrf.mxu3 }
 0x87e   :  { %2717 = vmatmul.f32.gmra.mxu1 %v2337_v60  ;;  %v5418_v22 = vpop.f32.mrf.mxu0  ;;  %v2660_v50 = vadd.f32 %v2659_v39, %v2619_v30  ;;  %v2581_v60 = vadd.f32 %v5336_v7, %v2540_v6  ;;  %v2473_v7 = vpop.permute.xlu0 %2472 }
 0x87f   :  { %2755 = vmatmul.f32.gmra.mxu0 %v2331_v15  ;;  %3169 = vmatpush.msra.mxu1 %v2965_v1 }
 0x885   :  { %v2662_v63 = vpop.f32.mrf.mxu3 }
 0x886   :  { %2720 = vmatmul.f32.gmra.mxu1 %v2344_v19 }
 0x887   :  { %2758 = vmatmul.f32.gmra.mxu0 %v2338_v34 }
 0x88d   :  { %v2665_v34 = vpop.f32.mrf.mxu3 }
 0x88e   :  { %3142 = vmatmul.msk.f32.vlgmr.msrb.gmra.mxu1 %vm2834_vm10, %v448_v21 }
 0x88f   :  { %2761 = vmatmul.f32.gmra.mxu0 %v2345_v33  ;;  %v2622_v33 = vadd.f32 %v5322_v59, %v2581_v60  ;;  %v2666_v59 = vadd.f32 %v2665_v34, %v2625_v36 }
 0x895   :  { %v2668_v20 = vpop.f32.mrf.mxu3 }
 0x896   :  { %3143 = vmatmul.msk.f32.gmra.mxu1 %vm2834_vm10, %v451_v10  ;;  %v2663_v10 = vadd.f32 %v2662_v63, %v2622_v33  ;;  %v2483_v63 = vpop.permute.xlu2 %2482 }
 0x897   :  { %v2552_v61 = vadd.f32 %v5381_v35, %v2483_v63 }
 0x899   :  { %v2593_v60 = vadd.f32 %v5394_v11, %v2552_v61 }
 0x89d   :  { %v2671_v39 = vpop.f32.mrf.mxu3 }
 0x89e   :  { %3144 = vmatmul.msk.f32.gmra.mxu1 %vm2834_vm10, %v454_v26 }
 0x8a5   :  { %v2674_v30 = vpop.f32.mrf.mxu3 }
 0x8a6   :  { %3145 = vmatmul.msk.f32.gmra.mxu1 %vm2834_vm10, %v457_v51 }
 0x8ae   :  { %3146 = vmatmul.msk.f32.gmra.mxu1 %vm2834_vm10, %v460_v45  ;;  %v2546_v45 = vadd.f32 %v5350_v3, %v2473_v7 }
 0x8b6   :  { %3147 = vmatmul.msk.f32.gmra.mxu1 %vm2834_vm10, %v463_v24  ;;  %v2587_v24 = vadd.f32 %v5360_v12, %v2546_v45 }
 0x8be   :  { %3148 = vmatmul.msk.f32.gmra.mxu1 %vm2834_vm10, %v466_v41  ;;  %v2628_v41 = vadd.f32 %v5342_v2, %v2587_v24 }
 0x8c0   :  { %v2669_v38 = vadd.f32 %v2668_v20, %v2628_v41 }
 0x8c2   :  { %v2782_v44 = vpop.f32.mrf.mxu2 }
 0x8c6   :  { %3149 = vmatmul.msk.f32.gmra.mxu1 %vm2834_vm10, %v469_v8  ;;  %v2590_v8 = vadd.f32 %v5378_v46, %v2549_v40 }
 0x8ca   :  { %v2785_v49 = vpop.f32.mrf.mxu2 }
 0x8cb   :  { %v2700_v55 = vpop.f32.mrf.mxu1 }
 0x8cc   :  { %v2701_v15 = vadd.f32 %v2700_v55, %v2660_v50  ;;  %v2631_v55 = vadd.f32 %v5357_v5, %v2590_v8 }
 0x8ce   :  { %v2672_v2 = vadd.f32 %v2671_v39, %v2631_v55 }
 0x8d2   :  { %v2788_v25 = vpop.f32.mrf.mxu2 }
 0x8d3   :  { %v2703_v19 = vpop.f32.mrf.mxu1 }
 0x8d4   :  { %v2741_v53 = vpop.f32.mrf.mxu0  ;;  %v2704_v26 = vadd.f32 %v2703_v19, %v2663_v10  ;;  %v2634_v19 = vadd.f32 %v5368_v54, %v2593_v60 }
 0x8d5   :  { %v2742_v21 = vadd.f32 %v2741_v53, %v2701_v15 }
 0x8d7   :  { %v2783_v62 = vadd.f32 %v2782_v44, %v2742_v21  ;;  %v2675_v21 = vadd.f32 %v2674_v30, %v2634_v19 }
 0x8d9   :  { %v2806_v37 = vmax.f32 %v2783_v62, 0.0  ;;  %v2677_v62 = vpop.f32.mrf.mxu3 }
 0x8da   :  { %v2791_v9 = vpop.f32.mrf.mxu2 }
 0x8db   :  { %v2706_v27 = vpop.f32.mrf.mxu1  ;;  %3150 = vmatmul.msk.f32.vlgmr.msrb.gmra.mxu0 %vm2834_vm10, %v2806_v37 }
 0x8dc   :  { %v2744_v51 = vpop.f32.mrf.mxu0  ;;  %v2707_v47 = vadd.f32 %v2706_v27, %v2666_v59 }
 0x8dd   :  { %v2745_v29 = vadd.f32 %v2744_v51, %v2704_v26  ;;  %v2493_v26 = vpop.permute.xlu1 %2492 }
 0x8de   :  { %v2558_v54 = vadd.f32 %v5411_v17, %v2493_v26 }
 0x8df   :  { %v2786_v28 = vadd.f32 %v2785_v49, %v2745_v29  ;;  %v2488_v49 = vpop.permute.xlu0 %2487 }
 0x8e0   :  { %v2555_v34 = vadd.f32 %v5396_v57, %v2488_v49  ;;  %v2599_v29 = vadd.f32 %v5418_v22, %v2558_v54 }
 0x8e1   :  { %v2807_v56 = vmax.f32 %v2786_v28, 0.0  ;;  %v2680_v45 = vpop.f32.mrf.mxu3 }
 0x8e2   :  { %v2794_v43 = vpop.f32.mrf.mxu2  ;;  %v2596_v58 = vadd.f32 %v5409_v32, %v2555_v34  ;;  %v2640_v36 = vadd.f32 %v5406_v4, %v2599_v29 }
 0x8e3   :  { %v2709_v42 = vpop.f32.mrf.mxu1  ;;  %3151 = vmatmul.msk.f32.gmra.mxu0 %vm2834_vm10, %v2807_v56 }
 0x8e4   :  { %v2747_v48 = vpop.f32.mrf.mxu0  ;;  %v2710_v13 = vadd.f32 %v2709_v42, %v2669_v38  ;;  %v2637_v11 = vadd.f32 %v5385_v18, %v2596_v58  ;;  %v2681_v18 = vadd.f32 %v2680_v45, %v2640_v36 }
 0x8e5   :  { %v2748_v1 = vadd.f32 %v2747_v48, %v2707_v47 }
 0x8e6   :  { %v2678_v57 = vadd.f32 %v2677_v62, %v2637_v11 }
 0x8e7   :  { %v2789_v3 = vadd.f32 %v2788_v25, %v2748_v1 }
 0x8e9   :  { %v2808_v52 = vmax.f32 %v2789_v3, 0.0  ;;  %v2876_v22 = vpop.f32.mrf.mxu3 }
 0x8ea   :  { %v2797_v53 = vpop.f32.mrf.mxu2 }
 0x8eb   :  { %v2712_v44 = vpop.f32.mrf.mxu1  ;;  %3152 = vmatmul.msk.f32.gmra.mxu0 %vm2834_vm10, %v2808_v52 }
 0x8ec   :  { %v2750_v12 = vpop.f32.mrf.mxu0  ;;  %v2713_v50 = vadd.f32 %v2712_v44, %v2672_v2 }
 0x8ed   :  { %v2751_v23 = vadd.f32 %v2750_v12, %v2710_v13 }
 0x8ef   :  { %v2792_v16 = vadd.f32 %v2791_v9, %v2751_v23 }
 0x8f1   :  { %v2809_v6 = vmax.f32 %v2792_v16, 0.0  ;;  %v2879_v40 = vpop.f32.mrf.mxu3 }
 0x8f2   :  { %v2800_v7 = vpop.f32.mrf.mxu2 }
 0x8f3   :  { %3153 = vmatmul.msk.f32.gmra.mxu0 %vm2834_vm10, %v2809_v6  ;;  %v2715_v46 = vpop.f32.mrf.mxu1 }
 0x8f4   :  { %v2753_v0 = vpop.f32.mrf.mxu0  ;;  %v2716_v33 = vadd.f32 %v2715_v46, %v2675_v21 }
 0x8f5   :  { %v2754_v15 = vadd.f32 %v2753_v0, %v2713_v50 }
 0x8f7   :  { %v2795_v5 = vadd.f32 %v2794_v43, %v2754_v15 }
 0x8f9   :  { %v2810_v35 = vmax.f32 %v2795_v5, 0.0  ;;  %v2882_v38 = vpop.f32.mrf.mxu3 }
 0x8fa   :  { %v2803_v24 = vpop.f32.mrf.mxu2 }
 0x8fb   :  { %3154 = vmatmul.msk.f32.gmra.mxu0 %vm2834_vm10, %v2810_v35  ;;  %v2718_v25 = vpop.f32.mrf.mxu1 }
 0x8fc   :  { %v2756_v10 = vpop.f32.mrf.mxu0  ;;  %v2719_v51 = vadd.f32 %v2718_v25, %v2678_v57 }
 0x8fd   :  { %v2757_v37 = vadd.f32 %v2756_v10, %v2716_v33 }
 0x8ff   :  { %v2798_v31 = vadd.f32 %v2797_v53, %v2757_v37 }
 0x901   :  { %v2811_v27 = vmax.f32 %v2798_v31, 0.0  ;;  %v2885_v12 = vpop.f32.mrf.mxu3 }
 0x903   :  { %3155 = vmatmul.msk.f32.gmra.mxu0 %vm2834_vm10, %v2811_v27  ;;  %v2721_v59 = vpop.f32.mrf.mxu1 }
 0x904   :  { %v2759_v32 = vpop.f32.mrf.mxu0  ;;  %v2722_v14 = vadd.f32 %v2721_v59, %v2681_v18 }
 0x905   :  { %v2760_v20 = vadd.f32 %v2759_v32, %v2719_v51 }
 0x907   :  { %v2801_v28 = vadd.f32 %v2800_v7, %v2760_v20 }
 0x909   :  { %v2812_v56 = vmax.f32 %v2801_v28, 0.0  ;;  %v2888_v61 = vpop.f32.mrf.mxu3 }
 0x90b   :  { %3156 = vmatmul.msk.f32.gmra.mxu0 %vm2834_vm10, %v2812_v56  ;;  %v2941_v9 = vpop.f32.mrf.mxu1 }
 0x90c   :  { %v2762_v17 = vpop.f32.mrf.mxu0  ;;  %v2942_v4 = vadd.f32 %v2941_v9, %v2876_v22 }
 0x90d   :  { %v2763_v47 = vadd.f32 %v2762_v17, %v2722_v14 }
 0x90f   :  { %v2804_v42 = vadd.f32 %v2803_v24, %v2763_v47 }
 0x911   :  { %v2813_v48 = vmax.f32 %v2804_v42, 0.0  ;;  %v2891_v0 = vpop.f32.mrf.mxu3 }
 0x913   :  { %3157 = vmatmul.msk.f32.vlgmr.msra.gmra.mxu1 %vm2834_vm10, %v2813_v48  ;;  %v2944_v1 = vpop.f32.mrf.mxu1 }
 0x914   :  { %v2945_v52 = vadd.f32 %v2944_v1, %v2879_v40 }
 0x919   :  { %v2894_v5 = vpop.f32.mrf.mxu3 }
 0x91b   :  { %v2947_v41 = vpop.f32.mrf.mxu1 }
 0x91c   :  { %v2948_v23 = vadd.f32 %v2947_v41, %v2882_v38 }
 0x921   :  { %v2897_v33 = vpop.f32.mrf.mxu3 }
 0x923   :  { %v2950_v8 = vpop.f32.mrf.mxu1 }
 0x924   :  { %v2951_v16 = vadd.f32 %v2950_v8, %v2885_v12 }
 0x92b   :  { %v2953_v55 = vpop.f32.mrf.mxu1 }
 0x92c   :  { %v2954_v49 = vadd.f32 %v2953_v55, %v2888_v61 }
 0x933   :  { %v2956_v30 = vpop.f32.mrf.mxu1 }
 0x934   :  { %v2957_v15 = vadd.f32 %v2956_v30, %v2891_v0 }
 0x93b   :  { %v2959_v60 = vpop.f32.mrf.mxu1 }
 0x93c   :  { %v2960_v53 = vadd.f32 %v2959_v60, %v2894_v5 }
 0x943   :  { %v2962_v21 = vpop.f32.mrf.mxu1 }
 0x944   :  { %v2963_v62 = vadd.f32 %v2962_v21, %v2897_v33 }
 0x958   :  { %v3016_v3 = vpop.f32.mrf.mxu0 }
 0x959   :  { %v3040_v39 = vadd.f32 %v3016_v3, %v2942_v4 }
 0x95b   :  { %3049 = vst.msk [vmem:[%s5734_s18] sm:$0xff] %vm3048_vm11, %v3040_v39  ;;  %3065 = vrot.lane.b32.xlu2 %v3040_v39, %s5715_s5 }
 0x960   :  { %v3019_v13 = vpop.f32.mrf.mxu0 }
 0x961   :  { %v3041_v44 = vadd.f32 %v3019_v13, %v2945_v52 }
 0x963   :  { %3050 = vst.msk [vmem:[%s5734_s18 + $0x8] sm:$0xff] %vm3048_vm11, %v3041_v44  ;;  %3067 = vrot.lane.b32.xlu0 %v3041_v44, %s5715_s5 }
 0x968   :  { %v3022_v63 = vpop.f32.mrf.mxu0 }
 0x969   :  { %v3042_v43 = vadd.f32 %v3022_v63, %v2948_v23 }
 0x96b   :  { %3051 = vst.msk [vmem:[%s5734_s18 + $0x10] sm:$0xff] %vm3048_vm11, %v3042_v43  ;;  %3069 = vrot.lane.b32.xlu1 %v3042_v43, %s5715_s5 }
 0x970   :  { %v3025_v2 = vpop.f32.mrf.mxu0 }
 0x971   :  { %v3043_v6 = vadd.f32 %v3025_v2, %v2951_v16 }
 0x973   :  { %3052 = vst.msk [vmem:[%s5734_s18 + $0x18] sm:$0xff] %vm3048_vm11, %v3043_v6  ;;  %3071 = vrot.lane.b32.xlu2 %v3043_v6, %s5715_s5 }
 0x978   :  { %v3028_v50 = vpop.f32.mrf.mxu0 }
 0x979   :  { %v3044_v46 = vadd.f32 %v3028_v50, %v2954_v49 }
 0x97b   :  { %3053 = vst.msk [vmem:[%s5734_s18 + $0x20] sm:$0xff] %vm3048_vm11, %v3044_v46  ;;  %3073 = vrot.lane.b32.xlu0 %v3044_v46, %s5715_s5 }
 0x980   :  { %v3031_v19 = vpop.f32.mrf.mxu0 }
 0x981   :  { %v3045_v34 = vadd.f32 %v3031_v19, %v2957_v15 }
 0x983   :  { %3054 = vst.msk [vmem:[%s5734_s18 + $0x28] sm:$0xff] %vm3048_vm11, %v3045_v34  ;;  %3075 = vrot.lane.b32.xlu1 %v3045_v34, %s5715_s5 }
 0x988   :  { %v3034_v35 = vpop.f32.mrf.mxu0 }
 0x989   :  { %v3046_v58 = vadd.f32 %v3034_v35, %v2960_v53 }
 0x98b   :  { %3055 = vst.msk [vmem:[%s5734_s18 + $0x30] sm:$0xff] %vm3048_vm11, %v3046_v58  ;;  %3077 = vrot.lane.b32.xlu2 %v3046_v58, %s5715_s5 }
 0x990   :  { %v3037_v10 = vpop.f32.mrf.mxu1 }
 0x991   :  { %v3047_v37 = vadd.f32 %v3037_v10, %v2963_v62 }
 0x993   :  { %3056 = vst.msk [vmem:[%s5734_s18 + $0x38] sm:$0xff] %vm3048_vm11, %v3047_v37  ;;  %3079 = vrot.lane.b32.xlu0 %v3047_v37, %s5715_s5 }
 0x9b5   :  { %v3066_v25 = vpop.permute.xlu2 %3065 }
 0x9b6   :  { %3089 = vst.msk [vmem:[%s5734_s18 + $0x40] sm:$0xff] %vm3048_vm11, %v3066_v25 }
 0x9cd   :  { %v3072_v11 = vpop.permute.xlu2 %3071 }
 0x9ce   :  { %3092 = vst.msk [vmem:[%s5734_s18 + $0x58] sm:$0xff] %vm3048_vm11, %v3072_v11 }
 0x9d5   :  { %v3068_v31 = vpop.permute.xlu0 %3067 }
 0x9d6   :  { %3090 = vst.msk [vmem:[%s5734_s18 + $0x48] sm:$0xff] %vm3048_vm11, %v3068_v31 }
 0x9dd   :  { %v3070_v26 = vpop.permute.xlu1 %3069 }
 0x9de   :  { %3091 = vst.msk [vmem:[%s5734_s18 + $0x50] sm:$0xff] %vm3048_vm11, %v3070_v26 }
 0x9e5   :  { %v3078_v54 = vpop.permute.xlu2 %3077 }
 0x9e6   :  { %3095 = vst.msk [vmem:[%s5734_s18 + $0x70] sm:$0xff] %vm3048_vm11, %v3078_v54 }
 0x9ed   :  { %v3074_v57 = vpop.permute.xlu0 %3073 }
 0x9ee   :  { %3093 = vst.msk [vmem:[%s5734_s18 + $0x60] sm:$0xff] %vm3048_vm11, %v3074_v57 }
 0x9f5   :  { %v3076_v27 = vpop.permute.xlu1 %3075 }
 0x9f6   :  { %3094 = vst.msk [vmem:[%s5734_s18 + $0x68] sm:$0xff] %vm3048_vm11, %v3076_v27 }
 0xa05   :  { %v3080_v7 = vpop.permute.xlu0 %3079 }
 0xa06   :  { %3096 = vst.msk [vmem:[%s5734_s18 + $0x78] sm:$0xff] %vm3048_vm11, %v3080_v7 }
 0xa07   :  { %3101 = vsyncpa [#allocation9], 1 }
 0xa08   :  { %3102 = vsyncpa [#allocation11], 1 }

</bundles_post_ra>
